<compile_context>
chip_gen: v5e
topology: v5e:2x2
jax: 0.10.0
libtpu: 0.0.40
codegen_flags: <defaults>
</compile_context>

<pallas_src>
import math
from functools import partial

import jax
import jax.numpy as jnp
from jax import lax
from jax.experimental import pallas as pl
from jax.experimental.pallas import tpu as pltpu


def _round_up(n, m):
    return ((n + m - 1) // m) * m


# ----------------------------------------------------------------------------
# Pallas kernel: one fused lane-dense matmul (+ in-kernel masked softmax)
# ----------------------------------------------------------------------------
def _mman_fused_kernel(x_ref, w_ref, b_ref, out_ref, *, ka, k):
    # bf16 operands on the MXU, f32 accumulation; epilogue stays f32.
    y = jnp.dot(x_ref[...], w_ref[...], preferred_element_type=jnp.float32)
    y = y + b_ref[...]                                        # (Bt, P) f32

    if k > 0:  # train_categorical_weights: softmax over the logit columns
        col = lax.broadcasted_iota(jnp.int32, y.shape, 1)
        is_logit = (col >= ka) & (col < ka + k)
        masked = jnp.where(is_logit, y, jnp.float32(-1e30))   # full-width VPU op
        m = jnp.max(masked, axis=-1, keepdims=True)
        e = jnp.exp(masked - m)                               # non-logit cols -> 0
        s = jnp.sum(e, axis=-1, keepdims=True)
        probs = e * pl.reciprocal(s)                          # exact recip-multiply
        y = jnp.where(is_logit, probs, y)                     # means kept, logits -> probs

    out_ref[...] = y                                          # single lane-dense store


def _run_mman_kernel(x, w_packed, b_packed, *, ka, k, b_tile, compute_dtype):
    B, L = x.shape
    P = w_packed.shape[1]

    # Batch tile: multiple of 32 sublanes (covers f32/bf16 packing), bounded by B.
    bt = min(_round_up(b_tile, 32), _round_up(B, 32))
    B_pad = _round_up(B, bt)
    if B_pad != B:
        x = jnp.pad(x, ((0, B_pad - B), (0, 0)))

    xc = x.astype(compute_dtype)
    wc = w_packed.astype(compute_dtype)
    bc = b_packed.astype(jnp.float32)

    out = pl.pallas_call(
        partial(_mman_fused_kernel, ka=ka, k=k),
        out_shape=jax.ShapeDtypeStruct((B_pad, P), jnp.float32),
        grid=(B_pad // bt,),
        in_specs=[
            pl.BlockSpec((bt, L), lambda i: (i, 0)),   # batch tile, pipelined
            pl.BlockSpec((L, P), lambda i: (0, 0)),    # packed weights, resident
            pl.BlockSpec((1, P), lambda i: (0, 0)),    # packed bias, resident
        ],
        out_specs=pl.BlockSpec((bt, P), lambda i: (i, 0)),
        compiler_params=pltpu.CompilerParams(
            dimension_semantics=("parallel",),         # batch tiles -> both TCs on v7x
            vmem_limit_bytes=32 * 1024 * 1024,         # safe on v5e/v6e/v7x
        ),
    )(xc, wc, bc)
    return out[:B]


# ----------------------------------------------------------------------------
# Module wrapper (parameter packing + output split/reshape = glue, stays in JAX)
# ----------------------------------------------------------------------------
def init_multimodal_action_net(key, num_components, latent_dimension,
                               action_dimension, train_categorical_weights):
    """Deterministic init mimicking nn.Linear's U(-1/sqrt(fan_in), 1/sqrt(fan_in))."""
    bound = 1.0 / math.sqrt(latent_dimension)
    keys = jax.random.split(key, 2 * num_components + 2)

    w_list, b_list = [], []
    for c in range(num_components):
        w = jax.random.uniform(keys[2 * c], (latent_dimension, action_dimension),
                               jnp.float32, -bound, bound)
        b = jax.random.uniform(keys[2 * c + 1], (action_dimension,),
                               jnp.float32, -bound, bound)
        w_list.append(w)
        b_list.append(b)
    w_means = jnp.concatenate(w_list, axis=1)                 # (L, K*A)
    b_means = jnp.concatenate(b_list, axis=0)[None, :]        # (1, K*A)

    if train_categorical_weights:
        w_logits = jax.random.uniform(keys[-2], (latent_dimension, num_components),
                                      jnp.float32, -bound, bound)
        b_logits = jax.random.uniform(keys[-1], (num_components,),
                                      jnp.float32, -bound, bound)[None, :]
    else:
        w_logits, b_logits = None, None

    return dict(
        w_means=w_means, b_means=b_means,
        w_logits=w_logits, b_logits=b_logits,
        num_components=num_components,
        action_dimension=action_dimension,
        train_categorical_weights=train_categorical_weights,
    )


def multimodal_action_net_forward(params, x, *, use_pallas=None,
                                  min_pallas_batch=64, b_tile=512,
                                  compute_dtype=jnp.bfloat16):
    """Returns (weights, means) matching the PyTorch module's forward."""
    B = x.shape[0]
    K = params["num_components"]
    A = params["action_dimension"]
    train = params["train_categorical_weights"]

    if use_pallas is None:
        use_pallas = B >= min_pallas_batch
    if not use_pallas:
        # Tiny batches: pallas_call launch overhead dominates; plain XLA is optimal.
        return _reference_forward(params, x)

    ka = K * A
    if train:
        w_cat = jnp.concatenate([params["w_means"], params["w_logits"]], axis=1)
        b_cat = jnp.concatenate([params["b_means"], params["b_logits"]], axis=1)
        width, k_soft = ka + K, K
    else:
        w_cat, b_cat, width, k_soft = params["w_means"], params["b_means"], ka, 0

    P = _round_up(width, 128)                                 # lane-dense padded width
    w_packed = jnp.pad(w_cat, ((0, 0), (0, P - width)))
    b_packed = jnp.pad(b_cat, ((0, 0), (0, P - width)))

    out = _run_mman_kernel(x, w_packed, b_packed, ka=ka, k=k_soft,
                           b_tile=b_tile, compute_dtype=compute_dtype)

    means = out[:, :ka].reshape(B, K, A)
    if train:
        weights = out[:, ka:ka + K]
    else:
        weights = jnp.full((B, K), 1.0 / K, dtype=jnp.float32)
    return weights, means


# ----------------------------------------------------------------------------
# Pure-JAX reference for correctness checks (and the tiny-batch fallback path)
# ----------------------------------------------------------------------------
def _reference_forward(params, x, compute_dtype=None):
    K = params["num_components"]
    A = params["action_dimension"]
    xc, wm = x, params["w_means"]
    if compute_dtype is not None:
        xc, wm = x.astype(compute_dtype), wm.astype(compute_dtype)
    means = jnp.dot(xc, wm, preferred_element_type=jnp.float32) + params["b_means"]
    means = means.reshape(x.shape[0], K, A)
    if params["train_categorical_weights"]:
        wl = params["w_logits"]
        if compute_dtype is not None:
            wl = wl.astype(compute_dtype)
        logits = jnp.dot(xc, wl, preferred_element_type=jnp.float32) + params["b_logits"]
        weights = jax.nn.softmax(logits, axis=-1)
    else:
        weights = jnp.full((x.shape[0], K), 1.0 / K, dtype=jnp.float32)
    return weights, means


if __name__ == "__main__":
    key = jax.random.PRNGKey(0)
    k_param, k_param2, k_input = jax.random.split(key, 3)

    num_components = 4
    latent_dimension = 32
    action_dimension = 16
    batch = 1024           # large enough to take the Pallas path (grid=(2,), b_tile=512)

    x = jax.random.normal(k_input, (batch, latent_dimension), jnp.float32)

    # --- variant 1: trained categorical weights (fused softmax head in-kernel) ---
    params = init_multimodal_action_net(
        k_param, num_components, latent_dimension, action_dimension, True)
    weights, means = multimodal_action_net_forward(params, x)
    weights, means = jax.block_until_ready((weights, means))

    ref_w, ref_m = _reference_forward(params, x, compute_dtype=jnp.bfloat16)
    assert weights.shape == (batch, num_components)
    assert means.shape == (batch, num_components, action_dimension)
    assert jnp.allclose(weights, ref_w, atol=1e-4, rtol=1e-4)
    assert jnp.allclose(means, ref_m, atol=1e-4, rtol=1e-4)
    assert jnp.allclose(jnp.sum(weights, axis=-1), 1.0, atol=1e-5)

    # --- variant 2: fixed uniform categorical weights (logit head compiled out) ---
    params2 = init_multimodal_action_net(
        k_param2, num_components, latent_dimension, action_dimension, False)
    weights2, means2 = multimodal_action_net_forward(params2, x)
    weights2, means2 = jax.block_until_ready((weights2, means2))

    ref_w2, ref_m2 = _reference_forward(params2, x, compute_dtype=jnp.bfloat16)
    assert jnp.allclose(weights2, ref_w2, atol=1e-6)
    assert jnp.allclose(means2, ref_m2, atol=1e-4, rtol=1e-4)

    print("KERNEL_OK")
</pallas_src>

<mosaic_0001>
module attributes {stable_mosaic.version = 11 : i64} {
  func.func @_mman_fused_kernel(%arg0: i32, %arg1: memref<512x32xbf16, #tpu.memory_space<vmem>>, %arg2: memref<32x128xbf16, #tpu.memory_space<vmem>>, %arg3: memref<1x128xf32, #tpu.memory_space<vmem>>, %arg4: memref<512x128xf32, #tpu.memory_space<vmem>>) attributes {dimension_semantics = [#tpu.dimension_semantics<parallel>], iteration_bounds = array<i64: 2>, scalar_prefetch = 0 : i64, scratch_operands = 0 : i64, tpu.core_type = #tpu.core_type<tc>, window_params = [{transform_indices = @transform_0, window_bounds = array<i64: 512, 32>}, {pipeline_mode = #tpu.pipeline_mode<synchronous>, transform_indices = @transform_1, window_bounds = array<i64: 32, 128>}, {pipeline_mode = #tpu.pipeline_mode<synchronous>, transform_indices = @transform_2, window_bounds = array<i64: 1, 128>}, {transform_indices = @transform_3, window_bounds = array<i64: 512, 128>}]} {
    %c0 = arith.constant 0 : index
    %c0_0 = arith.constant 0 : index
    %0 = vector.load %arg1[%c0, %c0_0] : memref<512x32xbf16, #tpu.memory_space<vmem>>, vector<512x32xbf16>
    %c0_1 = arith.constant 0 : index
    %c0_2 = arith.constant 0 : index
    %1 = vector.load %arg2[%c0_1, %c0_2] : memref<32x128xbf16, #tpu.memory_space<vmem>>, vector<32x128xbf16>
    %cst = arith.constant dense<0.000000e+00> : vector<512x128xf32>
    %2 = tpu.matmul %0, %1, %cst {dimension_numbers = #tpu.dot_dimension_numbers<[1], [0], [0], [1], [0, 0, 1, 1], [], []>} : vector<512x32xbf16>, vector<32x128xbf16>, vector<512x128xf32> -> vector<512x128xf32>
    %c0_3 = arith.constant 0 : index
    %c0_4 = arith.constant 0 : index
    %3 = vector.load %arg3[%c0_3, %c0_4] : memref<1x128xf32, #tpu.memory_space<vmem>>, vector<1x128xf32>
    %4 = vector.broadcast %3 : vector<1x128xf32> to vector<512x128xf32>
    %5 = arith.addf %2, %4 : vector<512x128xf32>
    %6 = tpu.iota {dimensions = array<i32: 1>} : vector<512x128xi32>
    %c64_i32 = arith.constant 64 : i32
    %7 = vector.broadcast %c64_i32 : i32 to vector<512x128xi32>
    %8 = arith.cmpi sge, %6, %7 : vector<512x128xi32>
    %c68_i32 = arith.constant 68 : i32
    %9 = vector.broadcast %c68_i32 : i32 to vector<512x128xi32>
    %10 = arith.cmpi slt, %6, %9 : vector<512x128xi32>
    %11 = arith.andi %8, %10 : vector<512x128xi1>
    %cst_5 = arith.constant -1.000000e+30 : f32
    %12 = vector.broadcast %cst_5 : f32 to vector<512x128xf32>
    %13 = arith.select %11, %5, %12 : vector<512x128xi1>, vector<512x128xf32>
    %cst_6 = arith.constant dense<0xFF800000> : vector<512xf32>
    %14 = vector.multi_reduction <maximumf>, %13, %cst_6 [1] : vector<512x128xf32> to vector<512xf32>
    %15 = vector.shape_cast %14 : vector<512xf32> to vector<512x1xf32>
    %16 = vector.broadcast %15 : vector<512x1xf32> to vector<512x128xf32>
    %17 = arith.subf %13, %16 : vector<512x128xf32>
    %18 = math.exp %17 : vector<512x128xf32>
    %cst_7 = arith.constant dense<0.000000e+00> : vector<512xf32>
    %19 = vector.multi_reduction <add>, %18, %cst_7 [1] : vector<512x128xf32> to vector<512xf32>
    %20 = vector.shape_cast %19 : vector<512xf32> to vector<512x1xf32>
    %21 = tpu.reciprocal %20 : vector<512x1xf32> -> vector<512x1xf32>
    %22 = vector.broadcast %21 : vector<512x1xf32> to vector<512x128xf32>
    %23 = arith.mulf %18, %22 : vector<512x128xf32>
    %24 = arith.select %11, %23, %5 : vector<512x128xi1>, vector<512x128xf32>
    %c0_8 = arith.constant 0 : index
    %c0_9 = arith.constant 0 : index
    %25 = vector.load %arg4[%c0_8, %c0_9] : memref<512x128xf32, #tpu.memory_space<vmem>>, vector<512x128xf32>
    tpu.vector_store %arg4[%c0_8, %c0_9], %24 {strides = array<i32>} : memref<512x128xf32, #tpu.memory_space<vmem>>, vector<512x128xf32>,
    return
  }
  func.func @transform_0(%arg0: i32) -> (i32, i32) {
    %c0_i32 = arith.constant 0 : i32
    %c0_i32_0 = arith.constant 0 : i32
    return %arg0, %c0_i32 : i32, i32
  }
  func.func @transform_1(%arg0: i32) -> (i32, i32) {
    %c0_i32 = arith.constant 0 : i32
    %c0_i32_0 = arith.constant 0 : i32
    %c0_i32_1 = arith.constant 0 : i32
    return %c0_i32, %c0_i32_0 : i32, i32
  }
  func.func @transform_2(%arg0: i32) -> (i32, i32) {
    %c0_i32 = arith.constant 0 : i32
    %c0_i32_0 = arith.constant 0 : i32
    %c0_i32_1 = arith.constant 0 : i32
    return %c0_i32, %c0_i32_0 : i32, i32
  }
  func.func @transform_3(%arg0: i32) -> (i32, i32) {
    %c0_i32 = arith.constant 0 : i32
    %c0_i32_0 = arith.constant 0 : i32
    return %arg0, %c0_i32 : i32, i32
  }
}

</mosaic_0001>

<bundles_post_ra>
// kernel: tpu_custom_call.1
= control target key start
LH: loop header
LB: loop body
LE: loop exit
PB: predicated region body
PF: predicated region fallthrough
CT: control target
= control target key end

     0   :  { %8 = vsyncpa [#allocation3], 0  ;;  %s5360_s0 = inlined_call_operand.vmem [shape: bf16[1024,32], index: 0, kind: input, shape index: {}]   ;;  %s5361_s1 = inlined_call_operand.vmem [shape: bf16[32,128], index: 1, kind: input, shape index: {}]   ;;  %s5362_s2 = inlined_call_operand.vmem [shape: f32[1,128], index: 2, kind: input, shape index: {}]   ;;  %s5363_s3 = inlined_call_operand.hbm [shape: f32[1024,128], index: 3, kind: output, shape index: {}]  }
   0x1   :  { %10 = vsyncpa [#allocation3 + $0x1], 0  ;;  %s2971_s12 = smov 0   ;;  %s2973_s13 = smov 0  }
   0x2   :  { %s2975_s14 = smov 0   ;;  %s2977_s15 = smov 0  }
   0x3 LB: > { %s2992_s16 = sadd.s32 4294967295, %s2947_s15   ;;  %s2366_s17 = sadd.s32 4294967294, %s2947_s15   ;;  %s2947_s15 = sphi %s2977_s15, %s5827_s15   ;;  %s2943_s14 = sphi %s2975_s14, %s5826_s14   ;;  %s2939_s13 = sphi %s2973_s13, %s5825_s13   ;;  %s2935_s12 = sphi %s2971_s12, %s5824_s12  }
   0x4   : > { %s2996_s18 = sadd.s32 1, %s2947_s15   ;;  %s91_s19 = sadd.s32 1, %s2943_s14 }
   0x5   : > { %s88_s20 = ssub.s32 %s2947_s15, %s2996_s18  ;;  %p101_p0 = scmp.ne.s32.totalorder %s2943_s14, %s2939_s13 }
   0x6   : > { %p89_p1 = scmp.eq.s32.totalorder %s88_s20, 0  ;;  %p102_p2 = scmp.eq.s32.totalorder %s2992_s16, 1 }
   0x7   : > { %p107_p3 = scmp.ne.s32.totalorder %s2939_s13, %s2935_s12  ;;  %p108_p4 = scmp.eq.s32.totalorder %s2366_s17, 1 }
   0x8   : > { %s3007_s21 = scalar_select %p89_p1, %s2943_s14, %s91_s19  }
   0x9   : > { %p3009_p5 = por %p102_p2, %p101_p0  ;;  %p3013_p6 = por %p108_p4, %p107_p3 }
   0xa   : > { %p2369_p7 = scmp.ge.s32.totalorder %s2947_s15, 1  ;;  %p141_p8 = scmp.lt.s32.totalorder %s2947_s15, 3 }
   0xc   : > { %p142_p9 = pnand %p2369_p7, %p141_p8 }
   0xe   : > { %145 = sbr.rel (%p142_p9) target bundleno = 706 (0x2c2), region = 32 }
  0x13   : > { %v2579_v0 = vld [vmem:[%s5361_s1 + $0x8] sm:$0xff]  ;;  %s2371_s26 = sshll.u32 %s2992_s16, 6  ;;  %v2578_v1 = vld [vmem:[%s5361_s1] sm:$0xff]  ;;  %vm417_vm0 = vcmask 261120   ;;  %v683_v31 = vlaneseq  ;;  %s162_s8 = sand.u32 1, %s2939_s13  }
  0x14   : > { %p166_p10 = scmp.lt.s32.totalorder %s2371_s26, 127  ;;  %520 = vmatpush.bf16.msra.mxu0 %v2579_v0  ;;  %2581 = vmatpush.bf16.msra.mxu1 %v2579_v0  ;;  %v3098_v36 = vld [vmem:[%s5362_s2] ss:$0 sm:$0xff]  ;;  %s4144_s9 = sshll.u32 %s162_s8, 9 }
  0x15   : > { %2582 = vmatpush.bf16.msra.mxu2 %v2579_v0  ;;  %2583 = vmatpush.bf16.msra.mxu3 %v2579_v0  ;;  %v684_v34 = vand.u32 127, %v683_v31  ;;  %s4189_s10 = scalar_lea.vmem [#allocation2], %s4144_s9  ;;  %s2580_s11 = sshll.u32 %s2992_s16, 9 }
  0x16   : > { %s5829_s26 = smov (!%p166_p10, %s2371_s26), 127  ;;  %s2300_s19 = scalar_lea.hbm %s5363_s3, %s2580_s11 }
  0x17   : > { %s2372_s29 = sshll.u32 %s5829_s26, 2  ;;  %vm685_vm1 = vcmp.ge.s32.totalorder %v684_v34, 64  ;;  %vm686_vm2 = vcmp.lt.s32.totalorder %v684_v34, 68  ;;  %s2301_s20 = sshll.u32 %s4189_s10, 4  ;;  %s2302_s20 = int_to_ptr.vmem [resolvable:$true] %s2301_s20 }
  0x18   : > { %521 = vmatpush.bf16.msra.mxu0 %v2578_v1  ;;  %2584 = vmatpush.bf16.msra.mxu1 %v2578_v1  ;;  %s3029_s5 = scalar_lea.vmem %s5360_s0, %s2372_s29  ;;  %vm3100_vm3 = vmand %vm685_vm1, %vm686_vm2  ;;  %s2303_s24 = sshll.u32 %s2300_s19, 4  ;;  %s2304_s24 = int_to_ptr.hbm [resolvable:$true] %s2303_s24 }
  0x19   : > { %2585 = vmatpush.bf16.msra.mxu2 %v2578_v1  ;;  %2586 = vmatpush.bf16.msra.mxu3 %v2578_v1  ;;  %v2546_v2 = vld [vmem:[%s3029_s5] sm:$0xff]  ;;  %v2547_v6 = vld [vmem:[%s3029_s5 + $0x8] sm:$0xff]  ;;  %v2548_v10 = vld [vmem:[%s3029_s5 + $0x10] sm:$0xff]  ;;  %s2289_s25 = scalar_lea.sflag [#allocation3], %s162_s8  ;;  %s2899_s26 = sshra.s32 %s2304_s24, 4  ;;  %s2900_s26 = int_to_ptr.hbm [resolvable:$true] %s2899_s26 }
  0x1a   : > { %v2554_v3 = vld [vmem:[%s3029_s5 + $0x40] sm:$0xff]  ;;  %v2555_v7 = vld [vmem:[%s3029_s5 + $0x48] sm:$0xff]  ;;  %v2556_v11 = vld [vmem:[%s3029_s5 + $0x50] sm:$0xff]  ;;  %s2901_s27 = scalar_lea.hbm %s2900_s26, 512  ;;  %s2905_s30 = scalar_lea.hbm %s5363_s3, 1024 }
  0x1b   : > { %v2562_v4 = vld [vmem:[%s3029_s5 + $0x80] sm:$0xff]  ;;  %2509 = vmatmul.msk.bf16.vlgmr.msra.gmra.mxu0 %vm417_vm0, %v2546_v2  ;;  %2517 = vmatmul.msk.bf16.vlgmr.msra.gmra.mxu1 %vm417_vm0, %v2554_v3  ;;  %v2563_v8 = vld [vmem:[%s3029_s5 + $0x88] sm:$0xff]  ;;  %v2564_v12 = vld [vmem:[%s3029_s5 + $0x90] sm:$0xff]  ;;  %p2902_p11 = scmp.ne.s32.totalorder %s2900_s26, %s2901_s27  ;;  %p2906_p0 = scmp.lt.s32.totalorder %s2900_s26, %s5363_s3 }
  0x1c   : > { %v2570_v5 = vld [vmem:[%s3029_s5 + $0xc0] sm:$0xff]  ;;  %2525 = vmatmul.msk.bf16.vlgmr.msra.gmra.mxu2 %vm417_vm0, %v2562_v4  ;;  %v2571_v9 = vld [vmem:[%s3029_s5 + $0xc8] sm:$0xff]  ;;  %v2572_v13 = vld [vmem:[%s3029_s5 + $0xd0] sm:$0xff]  ;;  %p2907_p1 = scmp.lt.s32.totalorder %s2905_s30, %s2901_s27 }
  0x1d   : > { %2533 = vmatmul.msk.bf16.vlgmr.msra.gmra.mxu3 %vm417_vm0, %v2570_v5  ;;  %v2549_v14 = vld [vmem:[%s3029_s5 + $0x18] sm:$0xff]  ;;  %v2550_v18 = vld [vmem:[%s3029_s5 + $0x20] sm:$0xff]  ;;  %v2551_v22 = vld [vmem:[%s3029_s5 + $0x28] sm:$0xff]  ;;  %p2903_p12 = pnand %p2902_p11, %p3009_p5 }
  0x1e   : > { %v2557_v15 = vld [vmem:[%s3029_s5 + $0x58] sm:$0xff]  ;;  %v2558_v19 = vld [vmem:[%s3029_s5 + $0x60] sm:$0xff]  ;;  %v2559_v23 = vld [vmem:[%s3029_s5 + $0x68] sm:$0xff]  ;;  %p2908_p2 = por %p2907_p1, %p2906_p0 }
  0x1f   : > { %v2565_v16 = vld [vmem:[%s3029_s5 + $0x98] sm:$0xff]  ;;  %v2566_v20 = vld [vmem:[%s3029_s5 + $0xa0] sm:$0xff]  ;;  %v2567_v24 = vld [vmem:[%s3029_s5 + $0xa8] sm:$0xff]  ;;  %p2904_p13 = pneg %p2903_p12 }
  0x20   : > { %v2573_v17 = vld [vmem:[%s3029_s5 + $0xd8] sm:$0xff]  ;;  %v2574_v21 = vld [vmem:[%s3029_s5 + $0xe0] sm:$0xff]  ;;  %v2575_v25 = vld [vmem:[%s3029_s5 + $0xe8] sm:$0xff] }
  0x21   : > { %v2552_v26 = vld [vmem:[%s3029_s5 + $0x30] sm:$0xff]  ;;  %v2569_v30 = vld [vmem:[%s3029_s5 + $0xb8] sm:$0xff]  ;;  %p2909_p3 = pnand %p2908_p2, %p2904_p13 }
  0x22   : > { %v2560_v27 = vld [vmem:[%s3029_s5 + $0x70] sm:$0xff]  ;;  %v2553_v32 = vld [vmem:[%s3029_s5 + $0x38] sm:$0xff] }
  0x23   : > { %v2568_v28 = vld [vmem:[%s3029_s5 + $0xb0] sm:$0xff]  ;;  %v2561_v33 = vld [vmem:[%s3029_s5 + $0x78] sm:$0xff] }
  0x24   : > { %v2576_v29 = vld [vmem:[%s3029_s5 + $0xf0] sm:$0xff]  ;;  %v2577_v35 = vld [vmem:[%s3029_s5 + $0xf8] sm:$0xff] }
  0x2b   : > { %2510 = vmatmul.msk.bf16.gmra.mxu0 %vm417_vm0, %v2547_v6  ;;  %2518 = vmatmul.msk.bf16.gmra.mxu1 %vm417_vm0, %v2555_v7 }
  0x2c   : > { %2526 = vmatmul.msk.bf16.gmra.mxu2 %vm417_vm0, %v2563_v8 }
  0x2d   : > { %2534 = vmatmul.msk.bf16.gmra.mxu3 %vm417_vm0, %v2571_v9 }
  0x3b   : > { %2511 = vmatmul.msk.bf16.gmra.mxu0 %vm417_vm0, %v2548_v10  ;;  %2519 = vmatmul.msk.bf16.gmra.mxu1 %vm417_vm0, %v2556_v11 }
  0x3c   : > { %2527 = vmatmul.msk.bf16.gmra.mxu2 %vm417_vm0, %v2564_v12 }
  0x3d   : > { %2535 = vmatmul.msk.bf16.gmra.mxu3 %vm417_vm0, %v2572_v13 }
  0x4b   : > { %2512 = vmatmul.msk.bf16.gmra.mxu0 %vm417_vm0, %v2549_v14  ;;  %2520 = vmatmul.msk.bf16.gmra.mxu1 %vm417_vm0, %v2557_v15 }
  0x4c   : > { %2528 = vmatmul.msk.bf16.gmra.mxu2 %vm417_vm0, %v2565_v16 }
  0x4d   : > { %2536 = vmatmul.msk.bf16.gmra.mxu3 %vm417_vm0, %v2573_v17 }
  0x5b   : > { %2513 = vmatmul.msk.bf16.gmra.mxu0 %vm417_vm0, %v2550_v18  ;;  %2521 = vmatmul.msk.bf16.gmra.mxu1 %vm417_vm0, %v2558_v19 }
  0x5c   : > { %2529 = vmatmul.msk.bf16.gmra.mxu2 %vm417_vm0, %v2566_v20 }
  0x5d   : > { %2537 = vmatmul.msk.bf16.gmra.mxu3 %vm417_vm0, %v2574_v21 }
  0x6b   : > { %2514 = vmatmul.msk.bf16.gmra.mxu0 %vm417_vm0, %v2551_v22  ;;  %2522 = vmatmul.msk.bf16.gmra.mxu1 %vm417_vm0, %v2559_v23 }
  0x6c   : > { %2530 = vmatmul.msk.bf16.gmra.mxu2 %vm417_vm0, %v2567_v24 }
  0x6d   : > { %2538 = vmatmul.msk.bf16.gmra.mxu3 %vm417_vm0, %v2575_v25 }
  0x7b   : > { %2515 = vmatmul.msk.bf16.gmra.mxu0 %vm417_vm0, %v2552_v26  ;;  %2523 = vmatmul.msk.bf16.gmra.mxu1 %vm417_vm0, %v2560_v27 }
  0x7c   : > { %2531 = vmatmul.msk.bf16.gmra.mxu2 %vm417_vm0, %v2568_v28 }
  0x7d   : > { %2539 = vmatmul.msk.bf16.gmra.mxu3 %vm417_vm0, %v2576_v29 }
  0x8b   : > { %2516 = vmatmul.msk.bf16.gmra.mxu0 %vm417_vm0, %v2553_v32  ;;  %2524 = vmatmul.msk.bf16.gmra.mxu1 %vm417_vm0, %v2561_v33 }
  0x8c   : > { %2532 = vmatmul.msk.bf16.gmra.mxu2 %vm417_vm0, %v2569_v30 }
  0x8d   : > { %2540 = vmatmul.msk.bf16.gmra.mxu3 %vm417_vm0, %v2577_v35 }
  0x98   : > { %v523_v37 = vpop.f32.mrf.mxu0  ;;  %v563_v38 = vpop.f32.mrf.mxu1 }
  0x99   : > { %v3105_v40 = vadd.f32 %v3098_v36, %v523_v37  ;;  %v3108_v41 = vadd.f32 %v3098_v36, %v563_v38 }
  0x9b   : > { %5486 = vst [vmem:[#allocation5_spill] sm:$0xff] %v3105_v40  ;;  %v3113_v42 = vsel %vm3100_vm3, %v3108_v41, -1e+30  ;;  %v3118_v43 = vsel %vm3100_vm3, %v3105_v40, -1e+30 }
  0x9c   : > { %5487 = vst [vmem:[#allocation6_spill] sm:$0xff] %v3108_v41  ;;  %784 = vmax.xlane.f32.xlu1 %v3113_v42  ;;  %752 = vmax.xlane.f32.xlu0 %v3118_v43 }
  0x9f   : > { %v603_v44 = vpop.f32.mrf.mxu2 }
  0xa0   : > { %v643_v45 = vpop.f32.mrf.mxu3  ;;  %v3123_v46 = vadd.f32 %v3098_v36, %v603_v44  ;;  %v525_v48 = vpop.f32.mrf.mxu0 }
  0xa1   : > { %v3126_v47 = vadd.f32 %v3098_v36, %v643_v45  ;;  %v565_v50 = vpop.f32.mrf.mxu1  ;;  %v3144_v53 = vadd.f32 %v3098_v36, %v525_v48 }
  0xa2   : > { %5488 = vst [vmem:[#allocation7_spill] sm:$0xff] %v3123_v46  ;;  %v3131_v49 = vsel %vm3100_vm3, %v3123_v46, -1e+30  ;;  %v3141_v52 = vadd.f32 %v3098_v36, %v565_v50 }
  0xa3   : > { %5489 = vst [vmem:[#allocation8_spill] sm:$0xff] %v3126_v47  ;;  %816 = vmax.xlane.f32.xlu2 %v3131_v49  ;;  %v3137_v51 = vsel %vm3100_vm3, %v3126_v47, -1e+30  ;;  %v3164_v60 = vsel %vm3100_vm3, %v3144_v53, -1e+30 }
  0xa4   : > { %848 = vmax.xlane.f32.xlu0 %v3137_v51  ;;  %5490 = vst [vmem:[#allocation9_spill] sm:$0xff] %v3141_v52  ;;  %v3152_v58 = vsel %vm3100_vm3, %v3141_v52, -1e+30 }
  0xa5   : > { %5491 = vst [vmem:[#allocation10_spill] sm:$0xff] %v3144_v53 }
  0xa7   : > { %v605_v54 = vpop.f32.mrf.mxu2 }
  0xa8   : > { %v645_v55 = vpop.f32.mrf.mxu3  ;;  %v528_v57 = vpop.f32.mrf.mxu0  ;;  %v3171_v63 = vadd.f32 %v3098_v36, %v605_v54 }
  0xa9   : > { %v3147_v56 = vadd.f32 %v3098_v36, %v645_v55  ;;  %v3167_v61 = vadd.f32 %v3098_v36, %v528_v57  ;;  %v568_v62 = vpop.f32.mrf.mxu1 }
  0xaa   : > { %5494 = vst [vmem:[#allocation13_spill] sm:$0xff] %v3171_v63  ;;  %v3191_v6 = vsel %vm3100_vm3, %v3171_v63, -1e+30  ;;  %v3198_v8 = vadd.f32 %v3098_v36, %v568_v62 }
  0xab   : > { %5492 = vst [vmem:[#allocation11_spill] sm:$0xff] %v3147_v56  ;;  %v3157_v59 = vsel %vm3100_vm3, %v3147_v56, -1e+30  ;;  %786 = vmax.xlane.f32.xlu2 %v3152_v58  ;;  %v3179_v3 = vsel %vm3100_vm3, %v3167_v61, -1e+30 }
  0xac   : > { %850 = vmax.xlane.f32.xlu1 %v3157_v59  ;;  %5493 = vst [vmem:[#allocation12_spill] sm:$0xff] %v3167_v61  ;;  %754 = vmax.xlane.f32.xlu0 %v3164_v60  ;;  %v3211_v13 = vsel %vm3100_vm3, %v3198_v8, -1e+30 }
  0xad   : > { %5497 = vst [vmem:[#allocation16_spill] sm:$0xff] %v3198_v8 }
  0xaf   : > { %v608_v0 = vpop.f32.mrf.mxu2 }
  0xb0   : > { %v648_v1 = vpop.f32.mrf.mxu3  ;;  %v530_v4 = vpop.f32.mrf.mxu0  ;;  %v3194_v7 = vadd.f32 %v3098_v36, %v608_v0 }
  0xb1   : > { %v3174_v2 = vadd.f32 %v3098_v36, %v648_v1  ;;  %v570_v10 = vpop.f32.mrf.mxu1  ;;  %v3225_v18 = vadd.f32 %v3098_v36, %v530_v4 }
  0xb2   : > { %5496 = vst [vmem:[#allocation15_spill] sm:$0xff] %v3194_v7  ;;  %v3206_v12 = vsel %vm3100_vm3, %v3194_v7, -1e+30  ;;  %v3255_v27 = vadd.f32 %v3098_v36, %v570_v10 }
  0xb3   : > { %5495 = vst [vmem:[#allocation14_spill] sm:$0xff] %v3174_v2  ;;  %v3184_v5 = vsel %vm3100_vm3, %v3174_v2, -1e+30  ;;  %v3238_v22 = vsel %vm3100_vm3, %v3225_v18, -1e+30 }
  0xb4   : > { %852 = vmax.xlane.f32.xlu2 %v3184_v5  ;;  %756 = vmax.xlane.f32.xlu1 %v3179_v3  ;;  %5500 = vst [vmem:[#allocation19_spill] sm:$0xff] %v3225_v18  ;;  %v3270_v31 = vsel %vm3100_vm3, %v3255_v27, -1e+30 }
  0xb5   : > { %818 = vmax.xlane.f32.xlu0 %v3191_v6  ;;  %5504 = vst [vmem:[#allocation23_spill] sm:$0xff] %v3255_v27 }
  0xb7   : > { %v610_v9 = vpop.f32.mrf.mxu2 }
  0xb8   : > { %v3201_v11 = vadd.f32 %v3098_v36, %v610_v9  ;;  %v533_v14 = vpop.f32.mrf.mxu0  ;;  %v650_v16 = vpop.f32.mrf.mxu3 }
  0xb9   : > { %v3222_v17 = vadd.f32 %v3098_v36, %v533_v14  ;;  %v3228_v19 = vadd.f32 %v3098_v36, %v650_v16  ;;  %v573_v21 = vpop.f32.mrf.mxu1 }
  0xba   : > { %5498 = vst [vmem:[#allocation17_spill] sm:$0xff] %v3201_v11  ;;  %v3216_v15 = vsel %vm3100_vm3, %v3201_v11, -1e+30  ;;  %v3249_v24 = vadd.f32 %v3098_v36, %v573_v21 }
  0xbb   : > { %5499 = vst [vmem:[#allocation18_spill] sm:$0xff] %v3222_v17  ;;  %v3233_v20 = vsel %vm3100_vm3, %v3222_v17, -1e+30  ;;  %v3245_v23 = vsel %vm3100_vm3, %v3228_v19, -1e+30 }
  0xbc   : > { %822 = vmax.xlane.f32.xlu2 %v3216_v15  ;;  %820 = vmax.xlane.f32.xlu1 %v3206_v12  ;;  %5501 = vst [vmem:[#allocation20_spill] sm:$0xff] %v3228_v19  ;;  %v3260_v28 = vsel %vm3100_vm3, %v3249_v24, -1e+30 }
  0xbd   : > { %788 = vmax.xlane.f32.xlu0 %v3211_v13  ;;  %5502 = vst [vmem:[#allocation21_spill] sm:$0xff] %v3249_v24 }
  0xbf   : > { %v613_v25 = vpop.f32.mrf.mxu2 }
  0xc0   : > { %v3252_v26 = vadd.f32 %v3098_v36, %v613_v25  ;;  %v653_v29 = vpop.f32.mrf.mxu3  ;;  %v535_v32 = vpop.f32.mrf.mxu0 }
  0xc1   : > { %v3275_v33 = vadd.f32 %v3098_v36, %v653_v29  ;;  %v575_v34 = vpop.f32.mrf.mxu1  ;;  %v3279_v35 = vadd.f32 %v3098_v36, %v535_v32 }
  0xc2   : > { %5503 = vst [vmem:[#allocation22_spill] sm:$0xff] %v3252_v26  ;;  %v3265_v30 = vsel %vm3100_vm3, %v3252_v26, -1e+30  ;;  %v3282_v37 = vadd.f32 %v3098_v36, %v575_v34 }
  0xc3   : > { %5505 = vst [vmem:[#allocation24_spill] sm:$0xff] %v3275_v33  ;;  %v3287_v38 = vsel %vm3100_vm3, %v3275_v33, -1e+30  ;;  %v3292_v45 = vsel %vm3100_vm3, %v3279_v35, -1e+30 }
  0xc4   : > { %760 = vmax.xlane.f32.xlu2 %v3233_v20  ;;  %758 = vmax.xlane.f32.xlu1 %v3238_v22  ;;  %5506 = vst [vmem:[#allocation25_spill] sm:$0xff] %v3279_v35  ;;  %v3299_v50 = vsel %vm3100_vm3, %v3282_v37, -1e+30 }
  0xc5   : > { %854 = vmax.xlane.f32.xlu0 %v3245_v23  ;;  %5507 = vst [vmem:[#allocation26_spill] sm:$0xff] %v3282_v37 }
  0xc7   : > { %v615_v44 = vpop.f32.mrf.mxu2 }
  0xc8   : > { %v655_v48 = vpop.f32.mrf.mxu3  ;;  %v538_v54 = vpop.f32.mrf.mxu0  ;;  %v3306_v57 = vadd.f32 %v3098_v36, %v615_v44 }
  0xc9   : > { %v3303_v55 = vadd.f32 %v3098_v36, %v538_v54  ;;  %v3309_v62 = vadd.f32 %v3098_v36, %v655_v48  ;;  %v578_v0 = vpop.f32.mrf.mxu1 }
  0xca   : > { %5509 = vst [vmem:[#allocation28_spill] sm:$0xff] %v3306_v57  ;;  %v3324_v10 = vsel %vm3100_vm3, %v3306_v57, -1e+30  ;;  %v3329_v14 = vadd.f32 %v3098_v36, %v578_v0 }
  0xcb   : > { %5508 = vst [vmem:[#allocation27_spill] sm:$0xff] %v3303_v55  ;;  %v3314_v1 = vsel %vm3100_vm3, %v3303_v55, -1e+30  ;;  %v3319_v9 = vsel %vm3100_vm3, %v3309_v62, -1e+30 }
  0xcc   : > { %792 = vmax.xlane.f32.xlu2 %v3260_v28  ;;  %790 = vmax.xlane.f32.xlu1 %v3270_v31  ;;  %5510 = vst [vmem:[#allocation29_spill] sm:$0xff] %v3309_v62  ;;  %v3346_v32 = vsel %vm3100_vm3, %v3329_v14, -1e+30 }
  0xcd   : > { %824 = vmax.xlane.f32.xlu0 %v3265_v30  ;;  %5511 = vst [vmem:[#allocation30_spill] sm:$0xff] %v3329_v14 }
  0xcf   : > { %v618_v4 = vpop.f32.mrf.mxu2 }
  0xd0   : > { %v3333_v16 = vadd.f32 %v3098_v36, %v618_v4  ;;  %v658_v21 = vpop.f32.mrf.mxu3  ;;  %v540_v34 = vpop.f32.mrf.mxu0 }
  0xd1   : > { %v3336_v25 = vadd.f32 %v3098_v36, %v658_v21  ;;  %v580_v48 = vpop.f32.mrf.mxu1  ;;  %v3357_v0 = vadd.f32 %v3098_v36, %v540_v34 }
  0xd2   : > { %5512 = vst [vmem:[#allocation31_spill] sm:$0xff] %v3333_v16  ;;  %v3341_v29 = vsel %vm3100_vm3, %v3333_v16, -1e+30  ;;  %v3360_v4 = vadd.f32 %v3098_v36, %v580_v48 }
  0xd3   : > { %5513 = vst [vmem:[#allocation32_spill] sm:$0xff] %v3336_v25  ;;  %v3351_v44 = vsel %vm3100_vm3, %v3336_v25, -1e+30  ;;  %v3373_v14 = vsel %vm3100_vm3, %v3357_v0, -1e+30 }
  0xd4   : > { %762 = vmax.xlane.f32.xlu2 %v3292_v45  ;;  %856 = vmax.xlane.f32.xlu1 %v3287_v38  ;;  %5514 = vst [vmem:[#allocation33_spill] sm:$0xff] %v3357_v0  ;;  %v3368_v55 = vsel %vm3100_vm3, %v3360_v4, -1e+30 }
  0xd5   : > { %794 = vmax.xlane.f32.xlu0 %v3299_v50  ;;  %5515 = vst [vmem:[#allocation34_spill] sm:$0xff] %v3360_v4 }
  0xd7   : > { %v620_v54 = vpop.f32.mrf.mxu2 }
  0xd8   : > { %v3363_v21 = vadd.f32 %v3098_v36, %v620_v54  ;;  %v660_v16 = vpop.f32.mrf.mxu3  ;;  %v543_v25 = vpop.f32.mrf.mxu0 }
  0xd9   : > { %v3384_v48 = vadd.f32 %v3098_v36, %v543_v25  ;;  %v583_v54 = vpop.f32.mrf.mxu1  ;;  %v3390_v0 = vadd.f32 %v3098_v36, %v660_v16 }
  0xda   : > { %5516 = vst [vmem:[#allocation35_spill] sm:$0xff] %v3363_v21  ;;  %v3380_v34 = vsel %vm3100_vm3, %v3363_v21, -1e+30  ;;  %v3387_v4 = vadd.f32 %v3098_v36, %v583_v54 }
  0xdb   : > { %5517 = vst [vmem:[#allocation36_spill] sm:$0xff] %v3384_v48  ;;  %v3395_v62 = vsel %vm3100_vm3, %v3384_v48, -1e+30  ;;  %v3405_v54 = vsel %vm3100_vm3, %v3390_v0, -1e+30 }
  0xdc   : > { %858 = vmax.xlane.f32.xlu2 %v3319_v9  ;;  %826 = vmax.xlane.f32.xlu1 %v3324_v10  ;;  %5518 = vst [vmem:[#allocation37_spill] sm:$0xff] %v3387_v4  ;;  %v3400_v21 = vsel %vm3100_vm3, %v3387_v4, -1e+30 }
  0xdd   : > { %764 = vmax.xlane.f32.xlu0 %v3314_v1  ;;  %5519 = vst [vmem:[#allocation38_spill] sm:$0xff] %v3390_v0 }
  0xdf   : > { %v623_v37 = vpop.f32.mrf.mxu2 }
  0xe0   : > { %v663_v25 = vpop.f32.mrf.mxu3  ;;  %v3410_v16 = vadd.f32 %v3098_v36, %v623_v37  ;;  %v545_v48 = vpop.f32.mrf.mxu0 }
  0xe1   : > { %v3414_v57 = vadd.f32 %v3098_v36, %v663_v25  ;;  %v3417_v4 = vadd.f32 %v3098_v36, %v545_v48  ;;  %v585_v37 = vpop.f32.mrf.mxu1 }
  0xe2   : > { %5520 = vst [vmem:[#allocation39_spill] sm:$0xff] %v3410_v16  ;;  %v3427_v35 = vsel %vm3100_vm3, %v3410_v16, -1e+30 }
  0xe3   : > { %5521 = vst [vmem:[#allocation40_spill] sm:$0xff] %v3414_v57  ;;  %v3422_v0 = vsel %vm3100_vm3, %v3414_v57, -1e+30  ;;  %v3434_v48 = vsel %vm3100_vm3, %v3417_v4, -1e+30  ;;  %v3438_v57 = vadd.f32 %v3098_v36, %v585_v37 }
  0xe4   : > { %828 = vmax.xlane.f32.xlu2 %v3341_v29  ;;  %796 = vmax.xlane.f32.xlu1 %v3346_v32  ;;  %5522 = vst [vmem:[#allocation41_spill] sm:$0xff] %v3417_v4 }
  0xe5   : > { %860 = vmax.xlane.f32.xlu0 %v3351_v44  ;;  %5523 = vst [vmem:[#allocation42_spill] sm:$0xff] %v3422_v0  ;;  %v3454_v4 = vsel %vm3100_vm3, %v3438_v57, -1e+30 }
  0xe6   : > { %5524 = vst [vmem:[#allocation43_spill] sm:$0xff] %v3434_v48 }
  0xe7   : > { %v625_v26 = vpop.f32.mrf.mxu2  ;;  %5525 = vst [vmem:[#allocation44_spill] sm:$0xff] %v3438_v57 }
  0xe8   : > { %v665_v25 = vpop.f32.mrf.mxu3  ;;  %v3441_v16 = vadd.f32 %v3098_v36, %v625_v26  ;;  %v548_v24 = vpop.f32.mrf.mxu0  ;;  %5529 = vst [vmem:[#allocation48_spill] sm:$0xff] %v3454_v4 }
  0xe9   : > { %v3444_v33 = vadd.f32 %v3098_v36, %v665_v25  ;;  %v588_v19 = vpop.f32.mrf.mxu1  ;;  %v3464_v37 = vadd.f32 %v3098_v36, %v548_v24 }
  0xea   : > { %5526 = vst [vmem:[#allocation45_spill] sm:$0xff] %v3441_v16  ;;  %v3449_v17 = vsel %vm3100_vm3, %v3441_v16, -1e+30  ;;  %v3468_v25 = vadd.f32 %v3098_v36, %v588_v19 }
  0xeb   : > { %5527 = vst [vmem:[#allocation46_spill] sm:$0xff] %v3444_v33  ;;  %v3461_v26 = vsel %vm3100_vm3, %v3444_v33, -1e+30  ;;  %v3481_v33 = vsel %vm3100_vm3, %v3464_v37, -1e+30 }
  0xec   : > { %798 = vmax.xlane.f32.xlu2 %v3368_v55  ;;  %766 = vmax.xlane.f32.xlu1 %v3373_v14  ;;  %5528 = vst [vmem:[#allocation47_spill] sm:$0xff] %v3449_v17  ;;  %v3476_v11 = vsel %vm3100_vm3, %v3468_v25, -1e+30 }
  0xed   : > { %830 = vmax.xlane.f32.xlu0 %v3380_v34  ;;  %5530 = vst [vmem:[#allocation49_spill] sm:$0xff] %v3461_v26 }
  0xee   : > { %5531 = vst [vmem:[#allocation50_spill] sm:$0xff] %v3464_v37 }
  0xef   : > { %5532 = vst [vmem:[#allocation51_spill] sm:$0xff] %v3468_v25  ;;  %v628_v16 = vpop.f32.mrf.mxu2 }
  0xf0   : > { %v3471_v57 = vadd.f32 %v3098_v36, %v628_v16  ;;  %5534 = vst [vmem:[#allocation53_spill] sm:$0xff] %v3476_v11  ;;  %v668_v24 = vpop.f32.mrf.mxu3  ;;  %v550_v18 = vpop.f32.mrf.mxu0 }
  0xf1   : > { %5535 = vst [vmem:[#allocation54_spill] sm:$0xff] %v3481_v33  ;;  %v3491_v16 = vadd.f32 %v3098_v36, %v668_v24  ;;  %v590_v25 = vpop.f32.mrf.mxu1  ;;  %v3495_v37 = vadd.f32 %v3098_v36, %v550_v18 }
  0xf2   : > { %5533 = vst [vmem:[#allocation52_spill] sm:$0xff] %v3471_v57  ;;  %v3486_v19 = vsel %vm3100_vm3, %v3471_v57, -1e+30  ;;  %v3498_v27 = vadd.f32 %v3098_v36, %v590_v25 }
  0xf3   : > { %5536 = vst [vmem:[#allocation55_spill] sm:$0xff] %v3486_v19  ;;  %v3505_v57 = vsel %vm3100_vm3, %v3491_v16, -1e+30  ;;  %v3510_v24 = vsel %vm3100_vm3, %v3495_v37, -1e+30 }
  0xf4   : > { %768 = vmax.xlane.f32.xlu2 %v3395_v62  ;;  %862 = vmax.xlane.f32.xlu1 %v3405_v54  ;;  %5537 = vst [vmem:[#allocation56_spill] sm:$0xff] %v3491_v16  ;;  %v3517_v18 = vsel %vm3100_vm3, %v3498_v27, -1e+30 }
  0xf5   : > { %800 = vmax.xlane.f32.xlu0 %v3400_v21  ;;  %5538 = vst [vmem:[#allocation57_spill] sm:$0xff] %v3495_v37 }
  0xf6   : > { %5539 = vst [vmem:[#allocation58_spill] sm:$0xff] %v3498_v27 }
  0xf7   : > { %5540 = vst [vmem:[#allocation59_spill] sm:$0xff] %v3505_v57  ;;  %v630_v8 = vpop.f32.mrf.mxu2 }
  0xf8   : > { %5541 = vst [vmem:[#allocation60_spill] sm:$0xff] %v3510_v24  ;;  %v670_v7 = vpop.f32.mrf.mxu3  ;;  %v553_v25 = vpop.f32.mrf.mxu0  ;;  %v3524_v61 = vadd.f32 %v3098_v36, %v630_v8 }
  0xf9   : > { %5542 = vst [vmem:[#allocation61_spill] sm:$0xff] %v3517_v18  ;;  %v3521_v16 = vadd.f32 %v3098_v36, %v553_v25  ;;  %v3527_v37 = vadd.f32 %v3098_v36, %v670_v7  ;;  %v593_v27 = vpop.f32.mrf.mxu1 }
  0xfa   : > { %5544 = vst [vmem:[#allocation63_spill] sm:$0xff] %v3524_v61  ;;  %v3548_v7 = vsel %vm3100_vm3, %v3524_v61, -1e+30  ;;  %v3553_v47 = vadd.f32 %v3098_v36, %v593_v27 }
  0xfb   : > { %5543 = vst [vmem:[#allocation62_spill] sm:$0xff] %v3521_v16  ;;  %v3538_v53 = vsel %vm3100_vm3, %v3521_v16, -1e+30  ;;  %v3543_v8 = vsel %vm3100_vm3, %v3527_v37, -1e+30 }
  0xfc   : > { %864 = vmax.xlane.f32.xlu2 %v3422_v0  ;;  %832 = vmax.xlane.f32.xlu1 %v3427_v35  ;;  %5545 = vst [vmem:[#allocation64_spill] sm:$0xff] %v3527_v37 }
  0xfd   : > { %770 = vmax.xlane.f32.xlu0 %v3434_v48  ;;  %5546 = vst [vmem:[#allocation65_spill] sm:$0xff] %v3538_v53 }
  0xfe   : > { %5547 = vst [vmem:[#allocation66_spill] sm:$0xff] %v3543_v8 }
  0xff   : > { %v633_v25 = vpop.f32.mrf.mxu2  ;;  %5548 = vst [vmem:[#allocation67_spill] sm:$0xff] %v3548_v7 }
 0x100   : > { %5549 = vst [vmem:[#allocation68_spill] sm:$0xff] %v3553_v47  ;;  %v3557_v16 = vadd.f32 %v3098_v36, %v633_v25  ;;  %v673_v46 = vpop.f32.mrf.mxu3  ;;  %v3576_v25 = vsel %vm3100_vm3, %v3553_v47, -1e+30 }
 0x101   : > { %v3560_v37 = vadd.f32 %v3098_v36, %v673_v46  ;;  %5553 = vst [vmem:[#allocation72_spill] sm:$0xff] %v3576_v25 }
 0x102   : > { %5550 = vst [vmem:[#allocation69_spill] sm:$0xff] %v3557_v16  ;;  %v3571_v27 = vsel %vm3100_vm3, %v3557_v16, -1e+30 }
 0x103   : > { %5551 = vst [vmem:[#allocation70_spill] sm:$0xff] %v3560_v37  ;;  %v3581_v46 = vsel %vm3100_vm3, %v3560_v37, -1e+30 }
 0x104   : > { %834 = vmax.xlane.f32.xlu2 %v3449_v17  ;;  %802 = vmax.xlane.f32.xlu1 %v3454_v4  ;;  %5552 = vst [vmem:[#allocation71_spill] sm:$0xff] %v3571_v27 }
 0x105   : > { %866 = vmax.xlane.f32.xlu0 %v3461_v26  ;;  %5554 = vst [vmem:[#allocation73_spill] sm:$0xff] %v3581_v46 }
 0x107   : > { %v635_v16 = vpop.f32.mrf.mxu2 }
 0x108   : > { %v3597_v37 = vadd.f32 %v3098_v36, %v635_v16 }
 0x10a   : > { %5557 = vst [vmem:[#allocation76_spill] sm:$0xff] %v3597_v37  ;;  %v3616_v16 = vsel %vm3100_vm3, %v3597_v37, -1e+30 }
 0x10b   : > { %5560 = vst [vmem:[#allocation79_spill] sm:$0xff] %v3616_v16 }
 0x10c   : > { %804 = vmax.xlane.f32.xlu2 %v3476_v11  ;;  %772 = vmax.xlane.f32.xlu1 %v3481_v33 }
 0x10d   : > { %836 = vmax.xlane.f32.xlu0 %v3486_v19 }
 0x10f   : > { %v3500_v2 = vpop.xlane.xlu0 %752  ;;  %v3529_v63 = vpop.xlane.xlu1 %784 }
 0x114   : > { %774 = vmax.xlane.f32.xlu2 %v3510_v24  ;;  %868 = vmax.xlane.f32.xlu1 %v3505_v57 }
 0x115   : > { %806 = vmax.xlane.f32.xlu0 %v3517_v18 }
 0x116   : > { %v3531_v56 = vpop.xlane.xlu2 %816 }
 0x117   : > { %v3533_v52 = vpop.xlane.xlu0 %848 }
 0x11c   : > { %870 = vmax.xlane.f32.xlu2 %v3543_v8  ;;  %838 = vmax.xlane.f32.xlu1 %v3548_v7  ;;  %v595_v7 = vpop.f32.mrf.mxu1 }
 0x11d   : > { %776 = vmax.xlane.f32.xlu0 %v3538_v53  ;;  %v555_v53 = vpop.f32.mrf.mxu0  ;;  %v3590_v47 = vadd.f32 %v3098_v36, %v595_v7 }
 0x11e   : > { %v3562_v40 = vpop.xlane.xlu2 %786  ;;  %v3587_v8 = vadd.f32 %v3098_v36, %v555_v53 }
 0x11f   : > { %v3564_v61 = vpop.xlane.xlu1 %850  ;;  %v3566_v41 = vpop.xlane.xlu0 %754  ;;  %5556 = vst [vmem:[#allocation75_spill] sm:$0xff] %v3590_v47 }
 0x120   : > { %5555 = vst [vmem:[#allocation74_spill] sm:$0xff] %v3587_v8  ;;  %v3609_v53 = vsel %vm3100_vm3, %v3587_v8, -1e+30 }
 0x121   : > { %5559 = vst [vmem:[#allocation78_spill] sm:$0xff] %v3609_v53 }
 0x124   : > { %840 = vmax.xlane.f32.xlu2 %v3571_v27  ;;  %808 = vmax.xlane.f32.xlu1 %v3576_v25  ;;  %v675_v27 = vpop.f32.mrf.mxu3 }
 0x125   : > { %872 = vmax.xlane.f32.xlu0 %v3581_v46  ;;  %v558_v25 = vpop.f32.mrf.mxu0  ;;  %v3604_v46 = vsel %vm3100_vm3, %v3590_v47, -1e+30  ;;  %v598_v47 = vpop.f32.mrf.mxu1  ;;  %v3626_v8 = vadd.f32 %v3098_v36, %v675_v27 }
 0x126   : > { %5558 = vst [vmem:[#allocation77_spill] sm:$0xff] %v3604_v46  ;;  %v3620_v7 = vadd.f32 %v3098_v36, %v558_v25  ;;  %v3623_v19 = vadd.f32 %v3098_v36, %v598_v47  ;;  %v638_v25 = vpop.f32.mrf.mxu2 }
 0x127   : > { %v3592_v18 = vpop.xlane.xlu2 %852  ;;  %v3594_v57 = vpop.xlane.xlu1 %756  ;;  %5563 = vst [vmem:[#allocation82_spill] sm:$0xff] %v3626_v8  ;;  %v3647_v27 = vsel %vm3100_vm3, %v3626_v8, -1e+30  ;;  %v3652_v11 = vadd.f32 %v3098_v36, %v638_v25 }
 0x128   : > { %v3599_v24 = vpop.xlane.xlu0 %818  ;;  %5561 = vst [vmem:[#allocation80_spill] sm:$0xff] %v3620_v7  ;;  %v3637_v37 = vsel %vm3100_vm3, %v3620_v7, -1e+30  ;;  %v3642_v47 = vsel %vm3100_vm3, %v3623_v19, -1e+30 }
 0x129   : > { %5562 = vst [vmem:[#allocation81_spill] sm:$0xff] %v3623_v19 }
 0x12a   : > { %5564 = vst [vmem:[#allocation83_spill] sm:$0xff] %v3637_v37 }
 0x12b   : > { %5565 = vst [vmem:[#allocation84_spill] sm:$0xff] %v3642_v47 }
 0x12c   : > { %810 = vmax.xlane.f32.xlu2 %v3604_v46  ;;  %778 = vmax.xlane.f32.xlu1 %v3609_v53  ;;  %5566 = vst [vmem:[#allocation85_spill] sm:$0xff] %v3647_v27 }
 0x12d   : > { %842 = vmax.xlane.f32.xlu0 %v3616_v16  ;;  %v678_v16 = vpop.f32.mrf.mxu3  ;;  %5567 = vst [vmem:[#allocation86_spill] sm:$0xff] %v3652_v11  ;;  %v560_v7 = vpop.f32.mrf.mxu0 }
 0x12e   : > { %v3656_v26 = vadd.f32 %v3098_v36, %v678_v16  ;;  %v3663_v8 = vadd.f32 %v3098_v36, %v560_v7  ;;  %v896_v16 = vsub.f32 %v3113_v42, %v3529_v63  ;;  %v912_v42 = vsub.f32 %v3131_v49, %v3531_v56 }
 0x12f   : > { %v3628_v46 = vpop.xlane.xlu2 %822  ;;  %v3630_v53 = vpop.xlane.xlu1 %820 }
 0x130   : > { %v3632_v33 = vpop.xlane.xlu0 %788  ;;  %5568 = vst [vmem:[#allocation87_spill] sm:$0xff] %v3656_v26  ;;  %v3670_v25 = vsel %vm3100_vm3, %v3656_v26, -1e+30  ;;  %v3684_v7 = vsel %vm3100_vm3, %v3663_v8, -1e+30  ;;  %v880_v26 = vsub.f32 %v3118_v43, %v3500_v2 }
 0x131   : > { %5569 = vst [vmem:[#allocation88_spill] sm:$0xff] %v3663_v8  ;;  %v976_v8 = vmul.f32 1.442695, %v896_v16 }
 0x132   : > { %5570 = vst [vmem:[#allocation89_spill] sm:$0xff] %v3670_v25  ;;  %v944_v2 = vmul.f32 1.442695, %v880_v26  ;;  %v897_v26 = vsub.f32 %v3152_v58, %v3562_v40  ;;  %v913_v40 = vsub.f32 %v3191_v6, %v3599_v24  ;;  %v882_v58 = vsub.f32 %v3179_v3, %v3594_v57 }
 0x133   : > { %5572 = vst [vmem:[#allocation91_spill] sm:$0xff] %v3684_v7  ;;  %2629 = vpow2.f32 %v976_v8  ;;  %v914_v24 = vsub.f32 %v3206_v12, %v3630_v53  ;;  %v898_v3 = vsub.f32 %v3211_v13, %v3632_v33  ;;  %v930_v57 = vsub.f32 %v3184_v5, %v3592_v18 }
 0x134   : > { %780 = vmax.xlane.f32.xlu2 %v3637_v37  ;;  %874 = vmax.xlane.f32.xlu1 %v3647_v27  ;;  %v600_v27 = vpop.f32.mrf.mxu1  ;;  %v640_v37 = vpop.f32.mrf.mxu2  ;;  %2631 = vpow2.f32 %v944_v2  ;;  %v978_v2 = vmul.f32 1.442695, %v897_v26  ;;  %v915_v18 = vsub.f32 %v3216_v15, %v3628_v46 }
 0x135   : > { %812 = vmax.xlane.f32.xlu0 %v3642_v47  ;;  %v3675_v47 = vsel %vm3100_vm3, %v3652_v11, -1e+30  ;;  %v680_v11 = vpop.f32.mrf.mxu3  ;;  %v3692_v63 = vadd.f32 %v3098_v36, %v600_v27  ;;  %v980_v53 = vmul.f32 1.442695, %v898_v3 }
 0x136   : > { %5571 = vst [vmem:[#allocation90_spill] sm:$0xff] %v3675_v47  ;;  %v3702_v0 = vadd.f32 %v3098_v36, %v680_v11  ;;  %v881_v11 = vsub.f32 %v3164_v60, %v3566_v41  ;;  %v929_v60 = vsub.f32 %v3157_v59, %v3564_v61  ;;  %v1010_v61 = vmul.f32 1.442695, %v913_v40 }
 0x137   : > { %v3658_v19 = vpop.xlane.xlu2 %760  ;;  %v3660_v17 = vpop.xlane.xlu1 %758  ;;  %5573 = vst [vmem:[#allocation92_spill] sm:$0xff] %v3692_v63  ;;  %v3714_v56 = vsel %vm3100_vm3, %v3692_v63, -1e+30  ;;  %v1012_v40 = vmul.f32 1.442695, %v914_v24 }
 0x138   : > { %v3665_v4 = vpop.xlane.xlu0 %854  ;;  %5575 = vst [vmem:[#allocation94_spill] sm:$0xff] %v3702_v0  ;;  %v946_v16 = vmul.f32 1.442695, %v881_v11  ;;  %v1042_v11 = vmul.f32 1.442695, %v929_v60  ;;  %v883_v5 = vsub.f32 %v3238_v22, %v3660_v17 }
 0x139   : > { %v931_v15 = vsub.f32 %v3245_v23, %v3665_v4 }
 0x13a   : > { %v950_v3 = vmul.f32 1.442695, %v883_v5 }
 0x13c   : > { %876 = vmax.xlane.f32.xlu2 %v3670_v25  ;;  %844 = vmax.xlane.f32.xlu1 %v3675_v47  ;;  %v3695_v25 = vadd.f32 %v3098_v36, %v640_v37  ;;  %v928_v37 = vsub.f32 %v3137_v51, %v3533_v52  ;;  %v3723_v36 = vsel %vm3100_vm3, %v3702_v0, -1e+30 }
 0x13d   : > { %782 = vmax.xlane.f32.xlu0 %v3684_v7  ;;  %v1008_v7 = vmul.f32 1.442695, %v912_v42  ;;  %v3736_v42 = vpop.eup %2629 }
 0x13e   : > { %5574 = vst [vmem:[#allocation93_spill] sm:$0xff] %v3695_v25  ;;  %v3709_v49 = vsel %vm3100_vm3, %v3695_v25, -1e+30  ;;  %v1040_v8 = vmul.f32 1.442695, %v928_v37  ;;  %v3738_v0 = vpop.eup %2631 }
 0x13f   : > { %v3697_v47 = vpop.xlane.xlu2 %792  ;;  %v3699_v48 = vpop.xlane.xlu1 %790  ;;  %2633 = vpow2.f32 %v1008_v7 }
 0x140   : > { %v3704_v43 = vpop.xlane.xlu0 %824  ;;  %2635 = vpow2.f32 %v1040_v8  ;;  %v948_v8 = vmul.f32 1.442695, %v882_v58  ;;  %v899_v33 = vsub.f32 %v3270_v31, %v3699_v48  ;;  %v884_v48 = vsub.f32 %v3233_v20, %v3658_v19 }
 0x141   : > { %2637 = vpow2.f32 %v946_v16  ;;  %v900_v46 = vsub.f32 %v3260_v28, %v3697_v47  ;;  %v916_v4 = vsub.f32 %v3265_v30, %v3704_v43 }
 0x142   : > { %2639 = vpow2.f32 %v978_v2  ;;  %v982_v22 = vmul.f32 1.442695, %v899_v33  ;;  %v952_v20 = vmul.f32 1.442695, %v884_v48  ;;  %v1046_v33 = vmul.f32 1.442695, %v931_v15 }
 0x143   : > { %2641 = vpow2.f32 %v1042_v11  ;;  %v1044_v11 = vmul.f32 1.442695, %v930_v57  ;;  %v1016_v48 = vmul.f32 1.442695, %v916_v4 }
 0x144   : > { %846 = vmax.xlane.f32.xlu2 %v3709_v49  ;;  %814 = vmax.xlane.f32.xlu1 %v3714_v56  ;;  %2643 = vpow2.f32 %v1010_v61 }
 0x145   : > { %878 = vmax.xlane.f32.xlu0 %v3723_v36  ;;  %v3740_v41 = vpop.eup %2633  ;;  %2645 = vpow2.f32 %v948_v8 }
 0x146   : > { %v3757_v26 = vpop.eup %2635  ;;  %2647 = vpow2.f32 %v1012_v40  ;;  %v1014_v40 = vmul.f32 1.442695, %v915_v18 }
 0x147   : > { %v3730_v51 = vpop.xlane.xlu2 %762  ;;  %v3732_v52 = vpop.xlane.xlu1 %856  ;;  %2649 = vpow2.f32 %v980_v53 }
 0x148   : > { %v3734_v27 = vpop.xlane.xlu0 %794  ;;  %v3759_v16 = vpop.eup %2637  ;;  %2651 = vpow2.f32 %v1044_v11  ;;  %v932_v28 = vsub.f32 %v3287_v38, %v3732_v52  ;;  %v885_v47 = vsub.f32 %v3292_v45, %v3730_v51 }
 0x149   : > { %v3761_v6 = vpop.eup %2639  ;;  %2653 = vpow2.f32 %v950_v3  ;;  %v984_v3 = vmul.f32 1.442695, %v900_v46  ;;  %v901_v52 = vsub.f32 %v3299_v50, %v3734_v27 }
 0x14a   : > { %v3778_v58 = vpop.eup %2641  ;;  %2655 = vpow2.f32 %v982_v22  ;;  %v1048_v43 = vmul.f32 1.442695, %v932_v28  ;;  %v954_v46 = vmul.f32 1.442695, %v885_v47 }
 0x14b   : > { %v3780_v61 = vpop.eup %2643  ;;  %2657 = vpow2.f32 %v1014_v40  ;;  %v986_v4 = vmul.f32 1.442695, %v901_v52 }
 0x14c   : > { %1104 = vadd.xlane.f32.xlu2 %v3736_v42  ;;  %1072 = vadd.xlane.f32.xlu1 %v3738_v0  ;;  %v3782_v13 = vpop.eup %2645  ;;  %2659 = vpow2.f32 %v952_v20 }
 0x14d   : > { %1136 = vadd.xlane.f32.xlu0 %v3740_v41  ;;  %v3799_v57 = vpop.eup %2647  ;;  %2661 = vpow2.f32 %v1046_v33 }
 0x14e   : > { %v3801_v53 = vpop.eup %2649  ;;  %2663 = vpow2.f32 %v984_v3 }
 0x14f   : > { %v3751_v7 = vpop.xlane.xlu2 %858  ;;  %v3753_v37 = vpop.xlane.xlu1 %826  ;;  %2665 = vpow2.f32 %v1016_v48 }
 0x150   : > { %v3755_v59 = vpop.xlane.xlu0 %764  ;;  %v3803_v31 = vpop.eup %2651  ;;  %2667 = vpow2.f32 %v1048_v43  ;;  %v917_v45 = vsub.f32 %v3324_v10, %v3753_v37  ;;  %v933_v51 = vsub.f32 %v3319_v9, %v3751_v7 }
 0x151   : > { %v3820_v18 = vpop.eup %2653  ;;  %2669 = vpow2.f32 %v954_v46  ;;  %v886_v37 = vsub.f32 %v3314_v1, %v3755_v59 }
 0x152   : > { %v3822_v25 = vpop.eup %2655  ;;  %v1018_v27 = vmul.f32 1.442695, %v917_v45  ;;  %v1050_v47 = vmul.f32 1.442695, %v933_v51  ;;  %2671 = vpow2.f32 %v986_v4 }
 0x153   : > { %v3824_v23 = vpop.eup %2657  ;;  %v956_v52 = vmul.f32 1.442695, %v886_v37 }
 0x154   : > { %1168 = vadd.xlane.f32.xlu1 %v3757_v26  ;;  %1074 = vadd.xlane.f32.xlu2 %v3759_v16  ;;  %v3841_v15 = vpop.eup %2659  ;;  %2673 = vpow2.f32 %v1018_v27 }
 0x155   : > { %1106 = vadd.xlane.f32.xlu0 %v3761_v6  ;;  %v3843_v20 = vpop.eup %2661  ;;  %2675 = vpow2.f32 %v1050_v47 }
 0x156   : > { %v3845_v38 = vpop.eup %2663  ;;  %2677 = vpow2.f32 %v956_v52 }
 0x157   : > { %v3772_v2 = vpop.xlane.xlu2 %828  ;;  %v3774_v60 = vpop.xlane.xlu1 %796 }
 0x158   : > { %v3776_v12 = vpop.xlane.xlu0 %860  ;;  %v3862_v28 = vpop.eup %2665  ;;  %v902_v9 = vsub.f32 %v3346_v32, %v3774_v60  ;;  %v918_v7 = vsub.f32 %v3341_v29, %v3772_v2 }
 0x159   : > { %v3864_v48 = vpop.eup %2667  ;;  %v934_v60 = vsub.f32 %v3351_v44, %v3776_v12 }
 0x15a   : > { %v3866_v10 = vpop.eup %2669  ;;  %v988_v59 = vmul.f32 1.442695, %v902_v9  ;;  %v1020_v51 = vmul.f32 1.442695, %v918_v7 }
 0x15b   : > { %v3883_v45 = vpop.eup %2671  ;;  %v1052_v37 = vmul.f32 1.442695, %v934_v60 }
 0x15c   : > { %1170 = vadd.xlane.f32.xlu2 %v3778_v58  ;;  %1138 = vadd.xlane.f32.xlu1 %v3780_v61  ;;  %v3885_v4 = vpop.eup %2673  ;;  %2679 = vpow2.f32 %v988_v59 }
 0x15d   : > { %1076 = vadd.xlane.f32.xlu0 %v3782_v13  ;;  %v3887_v32 = vpop.eup %2675  ;;  %2681 = vpow2.f32 %v1020_v51 }
 0x15e   : > { %5576 = vst [vmem:[#allocation95_spill] sm:$0xff] %v3887_v32  ;;  %v3904_v9 = vpop.eup %2677  ;;  %2683 = vpow2.f32 %v1052_v37 }
 0x15f   : > { %v3793_v8 = vpop.xlane.xlu2 %798  ;;  %v3795_v24 = vpop.xlane.xlu1 %766  ;;  %5577 = vst [vmem:[#allocation96_spill] sm:$0xff] %v3904_v9 }
 0x160   : > { %v3797_v17 = vpop.xlane.xlu0 %830  ;;  %v887_v29 = vsub.f32 %v3373_v14, %v3795_v24  ;;  %v903_v2 = vsub.f32 %v3368_v55, %v3793_v8 }
 0x161   : > { %v919_v24 = vsub.f32 %v3380_v34, %v3797_v17 }
 0x162   : > { %v958_v12 = vmul.f32 1.442695, %v887_v29  ;;  %v990_v7 = vmul.f32 1.442695, %v903_v2  ;;  %v3906_v52 = vpop.eup %2679 }
 0x163   : > { %5578 = vst [vmem:[#allocation97_spill] sm:$0xff] %v3906_v52  ;;  %v3908_v14 = vpop.eup %2681  ;;  %v1022_v60 = vmul.f32 1.442695, %v919_v24 }
 0x164   : > { %1140 = vadd.xlane.f32.xlu2 %v3799_v57  ;;  %1108 = vadd.xlane.f32.xlu1 %v3801_v53  ;;  %5579 = vst [vmem:[#allocation98_spill] sm:$0xff] %v3908_v14  ;;  %2685 = vpow2.f32 %v958_v12  ;;  %v3925_v29 = vpop.eup %2683 }
 0x165   : > { %1172 = vadd.xlane.f32.xlu0 %v3803_v31  ;;  %2687 = vpow2.f32 %v990_v7  ;;  %5580 = vst [vmem:[#allocation99_spill] sm:$0xff] %v3925_v29 }
 0x166   : > { %2689 = vpow2.f32 %v1022_v60 }
 0x167   : > { %v3814_v11 = vpop.xlane.xlu2 %768  ;;  %v3816_v5 = vpop.xlane.xlu1 %862 }
 0x168   : > { %v3818_v19 = vpop.xlane.xlu0 %800  ;;  %v935_v55 = vsub.f32 %v3405_v54, %v3816_v5  ;;  %v888_v8 = vsub.f32 %v3395_v62, %v3814_v11  ;;  %v5583_v11 = vld [vmem:[#allocation42_spill] sm:$0xff] }
 0x169   : > { %v904_v5 = vsub.f32 %v3400_v21, %v3818_v19 }
 0x16a   : > { %v1054_v17 = vmul.f32 1.442695, %v935_v55  ;;  %v960_v2 = vmul.f32 1.442695, %v888_v8  ;;  %v3927_v37 = vpop.eup %2685 }
 0x16b   : > { %5581 = vst [vmem:[#allocation100_spill] sm:$0xff] %v3927_v37  ;;  %v3929_v54 = vpop.eup %2687  ;;  %v992_v55 = vmul.f32 1.442695, %v904_v5 }
 0x16c   : > { %1110 = vadd.xlane.f32.xlu2 %v3822_v25  ;;  %1078 = vadd.xlane.f32.xlu1 %v3820_v18  ;;  %5582 = vst [vmem:[#allocation101_spill] sm:$0xff] %v3929_v54  ;;  %2691 = vpow2.f32 %v1054_v17  ;;  %v3946_v8 = vpop.eup %2689 }
 0x16d   : > { %1142 = vadd.xlane.f32.xlu0 %v3824_v23  ;;  %2693 = vpow2.f32 %v960_v2  ;;  %5584 = vst [vmem:[#allocation42_spill] sm:$0xff] %v3946_v8 }
 0x16e   : > { %2695 = vpow2.f32 %v992_v55 }
 0x16f   : > { %v3835_v22 = vpop.xlane.xlu2 %864  ;;  %v3837_v40 = vpop.xlane.xlu1 %832 }
 0x170   : > { %v3839_v30 = vpop.xlane.xlu0 %770  ;;  %v920_v62 = vsub.f32 %v3427_v35, %v3837_v40  ;;  %v936_v12 = vsub.f32 %v5583_v11, %v3835_v22  ;;  %v5587_v40 = vld [vmem:[#allocation43_spill] sm:$0xff]  ;;  %v5588_v22 = vld [vmem:[#allocation48_spill] sm:$0xff] }
 0x171   : > { %v889_v2 = vsub.f32 %v5587_v40, %v3839_v30 }
 0x172   : > { %v1024_v19 = vmul.f32 1.442695, %v920_v62  ;;  %v1056_v60 = vmul.f32 1.442695, %v936_v12  ;;  %v3948_v17 = vpop.eup %2691  ;;  %v5589_v62 = vld [vmem:[#allocation47_spill] sm:$0xff] }
 0x173   : > { %5585 = vst [vmem:[#allocation102_spill] sm:$0xff] %v3948_v17  ;;  %v3950_v35 = vpop.eup %2693  ;;  %v962_v63 = vmul.f32 1.442695, %v889_v2  ;;  %v5595_v2 = vld [vmem:[#allocation54_spill] sm:$0xff] }
 0x174   : > { %1080 = vadd.xlane.f32.xlu2 %v3841_v15  ;;  %1174 = vadd.xlane.f32.xlu1 %v3843_v20  ;;  %5586 = vst [vmem:[#allocation103_spill] sm:$0xff] %v3950_v35  ;;  %2697 = vpow2.f32 %v1024_v19 }
 0x175   : > { %1112 = vadd.xlane.f32.xlu0 %v3845_v38  ;;  %2699 = vpow2.f32 %v1056_v60 }
 0x176   : > { %2701 = vpow2.f32 %v962_v63  ;;  %v5597_v63 = vld [vmem:[#allocation60_spill] sm:$0xff] }
 0x177   : > { %v3856_v33 = vpop.xlane.xlu2 %834  ;;  %v3858_v3 = vpop.xlane.xlu1 %802 }
 0x178   : > { %v3860_v50 = vpop.xlane.xlu0 %866  ;;  %v905_v5 = vsub.f32 %v5588_v22, %v3858_v3  ;;  %v921_v11 = vsub.f32 %v5589_v62, %v3856_v33  ;;  %v5592_v3 = vld [vmem:[#allocation49_spill] sm:$0xff] }
 0x179   : > { %v937_v22 = vsub.f32 %v5592_v3, %v3860_v50  ;;  %v5594_v33 = vld [vmem:[#allocation53_spill] sm:$0xff] }
 0x17a   : > { %v994_v40 = vmul.f32 1.442695, %v905_v5  ;;  %v1026_v19 = vmul.f32 1.442695, %v921_v11  ;;  %v5596_v11 = vld [vmem:[#allocation55_spill] sm:$0xff] }
 0x17b   : > { %v1058_v3 = vmul.f32 1.442695, %v937_v22  ;;  %v5601_v22 = vld [vmem:[#allocation66_spill] sm:$0xff] }
 0x17c   : > { %1176 = vadd.xlane.f32.xlu2 %v3864_v48  ;;  %1144 = vadd.xlane.f32.xlu1 %v3862_v28  ;;  %2703 = vpow2.f32 %v994_v40  ;;  %v5598_v40 = vld [vmem:[#allocation59_spill] sm:$0xff] }
 0x17d   : > { %1082 = vadd.xlane.f32.xlu0 %v3866_v10  ;;  %2705 = vpow2.f32 %v1026_v19  ;;  %v5599_v19 = vld [vmem:[#allocation61_spill] sm:$0xff] }
 0x17e   : > { %2707 = vpow2.f32 %v1058_v3 }
 0x17f   : > { %v3877_v43 = vpop.xlane.xlu2 %804  ;;  %v3879_v46 = vpop.xlane.xlu1 %772 }
 0x180   : > { %v3881_v1 = vpop.xlane.xlu0 %836  ;;  %v906_v62 = vsub.f32 %v5594_v33, %v3877_v43  ;;  %v890_v5 = vsub.f32 %v5595_v2, %v3879_v46 }
 0x181   : > { %v922_v50 = vsub.f32 %v5596_v11, %v3881_v1 }
 0x182   : > { %v996_v33 = vmul.f32 1.442695, %v906_v62  ;;  %v964_v46 = vmul.f32 1.442695, %v890_v5  ;;  %v5603_v62 = vld [vmem:[#allocation67_spill] sm:$0xff] }
 0x183   : > { %v1028_v1 = vmul.f32 1.442695, %v922_v50  ;;  %v5606_v50 = vld [vmem:[#allocation71_spill] sm:$0xff] }
 0x184   : > { %1146 = vadd.xlane.f32.xlu2 %v3885_v4  ;;  %1114 = vadd.xlane.f32.xlu1 %v3883_v45  ;;  %2709 = vpow2.f32 %v996_v33 }
 0x185   : > { %1178 = vadd.xlane.f32.xlu0 %v3887_v32  ;;  %2711 = vpow2.f32 %v964_v46 }
 0x186   : > { %2713 = vpow2.f32 %v1028_v1 }
 0x187   : > { %v3898_v27 = vpop.xlane.xlu2 %774  ;;  %v3900_v47 = vpop.xlane.xlu1 %868 }
 0x188   : > { %v3902_v44 = vpop.xlane.xlu0 %806 }
 0x189   : > { %v907_v2 = vsub.f32 %v5599_v19, %v3902_v44 }
 0x18c   : > { %1116 = vadd.xlane.f32.xlu2 %v3906_v52  ;;  %1084 = vadd.xlane.f32.xlu1 %v3904_v9 }
 0x18d   : > { %1148 = vadd.xlane.f32.xlu0 %v3908_v14 }
 0x18f   : > { %v3919_v59 = vpop.xlane.xlu2 %870  ;;  %v3921_v51 = vpop.xlane.xlu1 %838 }
 0x190   : > { %v3923_v34 = vpop.xlane.xlu0 %776 }
 0x194   : > { %1086 = vadd.xlane.f32.xlu2 %v3927_v37  ;;  %1180 = vadd.xlane.f32.xlu1 %v3925_v29  ;;  %v923_v29 = vsub.f32 %v5603_v62, %v3921_v51 }
 0x195   : > { %1118 = vadd.xlane.f32.xlu0 %v3929_v54 }
 0x197   : > { %v3940_v7 = vpop.xlane.xlu2 %840  ;;  %v3942_v24 = vpop.xlane.xlu1 %808 }
 0x198   : > { %v3944_v21 = vpop.xlane.xlu0 %872  ;;  %v924_v3 = vsub.f32 %v5606_v50, %v3940_v7 }
 0x19a   : > { %v1032_v1 = vmul.f32 1.442695, %v924_v3 }
 0x19c   : > { %1182 = vadd.xlane.f32.xlu2 %v3948_v17  ;;  %1150 = vadd.xlane.f32.xlu1 %v3946_v8  ;;  %v3967_v17 = vpop.eup %2695 }
 0x19d   : > { %1088 = vadd.xlane.f32.xlu0 %v3950_v35  ;;  %5590 = vst [vmem:[#allocation43_spill] sm:$0xff] %v3967_v17  ;;  %v3969_v8 = vpop.eup %2697  ;;  %v891_v35 = vsub.f32 %v5597_v63, %v3898_v27  ;;  %v939_v27 = vsub.f32 %v5601_v22, %v3919_v59  ;;  %v998_v59 = vmul.f32 1.442695, %v907_v2  ;;  %v5609_v2 = vld [vmem:[#allocation77_spill] sm:$0xff] }
 0x19e   : > { %5591 = vst [vmem:[#allocation48_spill] sm:$0xff] %v3969_v8  ;;  %v3973_v60 = vpop.eup %2699 }
 0x19f   : > { %v3961_v12 = vpop.xlane.xlu2 %810  ;;  %v3963_v55 = vpop.xlane.xlu1 %778  ;;  %5593 = vst [vmem:[#allocation47_spill] sm:$0xff] %v3973_v60  ;;  %v966_v63 = vmul.f32 1.442695, %v891_v35  ;;  %v1062_v51 = vmul.f32 1.442695, %v939_v27  ;;  %v5607_v35 = vld [vmem:[#allocation72_spill] sm:$0xff] }
 0x1a0   : > { %v3965_v30 = vpop.xlane.xlu0 %842  ;;  %v908_v33 = vsub.f32 %v5607_v35, %v3942_v24  ;;  %v5611_v27 = vld [vmem:[#allocation78_spill] sm:$0xff] }
 0x1a1   : > { %2715 = vpow2.f32 %v966_v63  ;;  %v893_v24 = vsub.f32 %v5611_v27, %v3963_v55  ;;  %v5617_v55 = vld [vmem:[#allocation85_spill] sm:$0xff] }
 0x1a4   : > { %1152 = vadd.xlane.f32.xlu2 %v3969_v8  ;;  %1120 = vadd.xlane.f32.xlu1 %v3967_v17  ;;  %v938_v17 = vsub.f32 %v5598_v40, %v3900_v47  ;;  %v5605_v40 = vld [vmem:[#allocation65_spill] sm:$0xff] }
 0x1a5   : > { %1184 = vadd.xlane.f32.xlu0 %v3973_v60  ;;  %v3996_v60 = vpop.eup %2701  ;;  %v892_v44 = vsub.f32 %v5605_v40, %v3923_v34  ;;  %v5608_v34 = vld [vmem:[#allocation73_spill] sm:$0xff]  ;;  %v909_v40 = vsub.f32 %v5609_v2, %v3961_v12  ;;  %v5615_v12 = vld [vmem:[#allocation83_spill] sm:$0xff] }
 0x1a6   : > { %5600 = vst [vmem:[#allocation49_spill] sm:$0xff] %v3996_v60  ;;  %v4000_v11 = vpop.eup %2703  ;;  %v1060_v5 = vmul.f32 1.442695, %v938_v17  ;;  %v1030_v17 = vmul.f32 1.442695, %v923_v29  ;;  %v940_v19 = vsub.f32 %v5608_v34, %v3944_v21  ;;  %v5613_v21 = vld [vmem:[#allocation79_spill] sm:$0xff] }
 0x1a7   : > { %v3986_v54 = vpop.xlane.xlu2 %780  ;;  %v3988_v43 = vpop.xlane.xlu1 %874  ;;  %5602 = vst [vmem:[#allocation53_spill] sm:$0xff] %v4000_v11  ;;  %v968_v46 = vmul.f32 1.442695, %v892_v44  ;;  %v1000_v29 = vmul.f32 1.442695, %v908_v33  ;;  %v925_v35 = vsub.f32 %v5613_v21, %v3965_v30  ;;  %v5619_v33 = vld [vmem:[#allocation84_spill] sm:$0xff] }
 0x1a8   : > { %v3992_v8 = vpop.xlane.xlu0 %812  ;;  %v4004_v47 = vpop.eup %2705  ;;  %2717 = vpow2.f32 %v1060_v5  ;;  %v1064_v44 = vmul.f32 1.442695, %v940_v19  ;;  %v894_v34 = vsub.f32 %v5615_v12, %v3986_v54  ;;  %v941_v3 = vsub.f32 %v5617_v55, %v3988_v43  ;;  %v5623_v21 = vld [vmem:[#allocation90_spill] sm:$0xff] }
 0x1a9   : > { %5604 = vst [vmem:[#allocation54_spill] sm:$0xff] %v4004_v47  ;;  %v4019_v50 = vpop.eup %2707  ;;  %2719 = vpow2.f32 %v998_v59  ;;  %v1002_v59 = vmul.f32 1.442695, %v909_v40  ;;  %v970_v30 = vmul.f32 1.442695, %v893_v24 }
 0x1aa   : > { %5610 = vst [vmem:[#allocation55_spill] sm:$0xff] %v4019_v50  ;;  %v4023_v63 = vpop.eup %2709  ;;  %2721 = vpow2.f32 %v1062_v51  ;;  %v1034_v19 = vmul.f32 1.442695, %v925_v35  ;;  %v972_v27 = vmul.f32 1.442695, %v894_v34 }
 0x1ab   : > { %5612 = vst [vmem:[#allocation60_spill] sm:$0xff] %v4023_v63  ;;  %v4027_v5 = vpop.eup %2711  ;;  %2723 = vpow2.f32 %v1030_v17  ;;  %v910_v17 = vsub.f32 %v5619_v33, %v3992_v8  ;;  %v1066_v8 = vmul.f32 1.442695, %v941_v3 }
 0x1ac   : > { %1122 = vadd.xlane.f32.xlu2 %v4000_v11  ;;  %1090 = vadd.xlane.f32.xlu1 %v3996_v60  ;;  %5614 = vst [vmem:[#allocation59_spill] sm:$0xff] %v4027_v5  ;;  %v4031_v2 = vpop.eup %2713  ;;  %2725 = vpow2.f32 %v968_v46  ;;  %v5621_v46 = vld [vmem:[#allocation89_spill] sm:$0xff] }
 0x1ad   : > { %1154 = vadd.xlane.f32.xlu0 %v4004_v47  ;;  %5616 = vst [vmem:[#allocation61_spill] sm:$0xff] %v4031_v2  ;;  %v4037_v51 = vpop.eup %2715  ;;  %2727 = vpow2.f32 %v1032_v1 }
 0x1ae   : > { %5618 = vst [vmem:[#allocation66_spill] sm:$0xff] %v4037_v51  ;;  %v4042_v54 = vpop.eup %2717  ;;  %2729 = vpow2.f32 %v1000_v29  ;;  %v1004_v29 = vmul.f32 1.442695, %v910_v17 }
 0x1af   : > { %v877_v22 = vpop.xlane.xlu2 %876  ;;  %v845_v62 = vpop.xlane.xlu1 %844  ;;  %5620 = vst [vmem:[#allocation67_spill] sm:$0xff] %v4042_v54  ;;  %2731 = vpow2.f32 %v1064_v44 }
 0x1b0   : > { %v783_v7 = vpop.xlane.xlu0 %782  ;;  %v942_v40 = vsub.f32 %v5621_v46, %v877_v22  ;;  %v4045_v43 = vpop.eup %2719  ;;  %v926_v12 = vsub.f32 %v5623_v21, %v845_v62  ;;  %2733 = vpow2.f32 %v1002_v59  ;;  %v5628_v62 = vld [vmem:[#allocation91_spill] sm:$0xff] }
 0x1b1   : > { %5622 = vst [vmem:[#allocation65_spill] sm:$0xff] %v4045_v43  ;;  %v4048_v24 = vpop.eup %2721  ;;  %2735 = vpow2.f32 %v970_v30  ;;  %v895_v34 = vsub.f32 %v5628_v62, %v783_v7 }
 0x1b2   : > { %5624 = vst [vmem:[#allocation71_spill] sm:$0xff] %v4048_v24  ;;  %2737 = vpow2.f32 %v1034_v19  ;;  %v1068_v22 = vmul.f32 1.442695, %v942_v40  ;;  %v1036_v44 = vmul.f32 1.442695, %v926_v12 }
 0x1b3   : > { %2739 = vpow2.f32 %v972_v27 }
 0x1b4   : > { %1092 = vadd.xlane.f32.xlu2 %v4027_v5  ;;  %1186 = vadd.xlane.f32.xlu1 %v4019_v50  ;;  %2741 = vpow2.f32 %v1066_v8 }
 0x1b5   : > { %1124 = vadd.xlane.f32.xlu0 %v4023_v63  ;;  %v4050_v63 = vpop.eup %2723  ;;  %2743 = vpow2.f32 %v1004_v29 }
 0x1b6   : > { %5625 = vst [vmem:[#allocation72_spill] sm:$0xff] %v4050_v63  ;;  %v4052_v35 = vpop.eup %2725  ;;  %2745 = vpow2.f32 %v1068_v22 }
 0x1b7   : > { %v847_v55 = vpop.xlane.xlu2 %846  ;;  %v815_v1 = vpop.xlane.xlu1 %814  ;;  %5626 = vst [vmem:[#allocation73_spill] sm:$0xff] %v4052_v35  ;;  %2747 = vpow2.f32 %v1036_v44 }
 0x1b8   : > { %v879_v33 = vpop.xlane.xlu0 %878  ;;  %v4054_v46 = vpop.eup %2727  ;;  %v927_v59 = vsub.f32 %v3709_v49, %v847_v55  ;;  %v911_v30 = vsub.f32 %v3714_v56, %v815_v1  ;;  %v974_v49 = vmul.f32 1.442695, %v895_v34 }
 0x1b9   : > { %5627 = vst [vmem:[#allocation77_spill] sm:$0xff] %v4054_v46  ;;  %v4057_v21 = vpop.eup %2729  ;;  %v943_v7 = vsub.f32 %v3723_v36, %v879_v33 }
 0x1ba   : > { %5629 = vst [vmem:[#allocation78_spill] sm:$0xff] %v4057_v21  ;;  %v4062_v3 = vpop.eup %2731  ;;  %v1038_v55 = vmul.f32 1.442695, %v927_v59  ;;  %v1006_v8 = vmul.f32 1.442695, %v911_v30 }
 0x1bb   : > { %v4066_v17 = vpop.eup %2733  ;;  %v1070_v33 = vmul.f32 1.442695, %v943_v7 }
 0x1bc   : > { %1188 = vadd.xlane.f32.xlu2 %v4042_v54  ;;  %1156 = vadd.xlane.f32.xlu1 %v4031_v2  ;;  %v4069_v19 = vpop.eup %2735 }
 0x1bd   : > { %1094 = vadd.xlane.f32.xlu0 %v4037_v51  ;;  %v4075_v12 = vpop.eup %2737 }
 0x1be   : > { %v4080_v1 = vpop.eup %2739 }
 0x1bf   : > { %v4071_v40 = vpop.xlane.xlu2 %1104  ;;  %v4073_v27 = vpop.xlane.xlu1 %1072 }
 0x1c0   : > { %2749 = vrcp.f32 %v4071_v40  ;;  %v4078_v56 = vpop.xlane.xlu0 %1136  ;;  %v4083_v36 = vpop.eup %2741  ;;  %v1433_v44 = vand.u32 2147483647, %v4071_v40  ;;  %v1435_v34 = vand.u32 2147483648, %v4071_v40  ;;  %vm1429_vm4 = vweird.f32 %v4071_v40 }
 0x1c1   : > { %2751 = vrcp.f32 %v4073_v27  ;;  %v4086_v29 = vpop.eup %2743  ;;  %vm1205_vm5 = vweird.f32 %v4073_v27  ;;  %vm1653_vm7 = vweird.f32 %v4078_v56  ;;  %v1657_v60 = vand.u32 2147483647, %v4078_v56 }
 0x1c2   : > { %2753 = vrcp.f32 %v4078_v56  ;;  %v4088_v22 = vpop.eup %2745  ;;  %vm4107_vm6 = vcmp.eq.f32.partialorder %v1433_v44, 8.507059e+37  ;;  %v1436_v54 = vor.u32 1.1754944e-38, %v1435_v34  ;;  %v1659_v11 = vand.u32 2147483648, %v4078_v56 }
 0x1c3   : > { %2755 = vpow2.f32 %v974_v49  ;;  %v4093_v62 = vpop.eup %2747  ;;  %v1209_v49 = vand.u32 2147483647, %v4073_v27  ;;  %vm4150_vm13 = vcmp.eq.f32.partialorder %v1657_v60, 8.507059e+37 }
 0x1c4   : > { %2757 = vpow2.f32 %v1038_v55  ;;  %1158 = vadd.xlane.f32.xlu2 %v4050_v63  ;;  %1126 = vadd.xlane.f32.xlu1 %v4045_v43 }
 0x1c5   : > { %2759 = vpow2.f32 %v1006_v8  ;;  %1190 = vadd.xlane.f32.xlu0 %v4048_v24  ;;  %v1211_v24 = vand.u32 2147483648, %v4073_v27  ;;  %vm4129_vm9 = vcmp.eq.f32.partialorder %v1209_v49, 8.507059e+37 }
 0x1c6   : > { %v2750_v59 = vpop.eup %2749  ;;  %2761 = vpow2.f32 %v1070_v33 }
 0x1c7   : > { %v4097_v30 = vpop.eup %2751  ;;  %v1425_v7 = vmul.f32 %v2750_v59, %v4071_v40  ;;  %v4103_v55 = vpop.xlane.xlu1 %1168  ;;  %vm1430_vm8 = vweird.f32 %v2750_v59  ;;  %v1212_v49 = vor.u32 1.1754944e-38, %v1211_v24 }
 0x1c8   : > { %v4105_v43 = vpop.xlane.xlu2 %1074  ;;  %v2754_v8 = vpop.eup %2753  ;;  %v1201_v33 = vmul.f32 %v4097_v30, %v4073_v27  ;;  %2763 = vrcp.f32 %v4103_v55  ;;  %vm1206_vm10 = vweird.f32 %v4097_v30  ;;  %v1883_v52 = vand.u32 2147483648, %v4103_v55  ;;  %vm1431_vm12 = vmor %vm1429_vm4, %vm1430_vm8 }
 0x1c9   : > { %v4115_v51 = vpop.eup %2755  ;;  %v1426_v2 = vsub.f32 1.0, %v1425_v7  ;;  %v1649_v50 = vmul.f32 %v2754_v8, %v4078_v56  ;;  %v4119_v44 = vpop.xlane.xlu0 %1106  ;;  %2765 = vrcp.f32 %v4105_v43  ;;  %vm1654_vm11 = vweird.f32 %v2754_v8  ;;  %vm1207_vm15 = vmor %vm1205_vm5, %vm1206_vm10 }
 0x1ca   : > { %v4121_v5 = vpop.eup %2757  ;;  %v1202_v47 = vsub.f32 1.0, %v1201_v33  ;;  %2767 = vrcp.f32 %v4119_v44  ;;  %vm1877_vm14 = vweird.f32 %v4103_v55  ;;  %v1881_v40 = vand.u32 2147483647, %v4103_v55  ;;  %vm1655_vm0 = vmor %vm1653_vm7, %vm1654_vm11 }
 0x1cb   : > { %v4126_v37 = vpop.eup %2759  ;;  %v1427_v7 = vmul.f32 %v2750_v59, %v1426_v2  ;;  %v1650_v14 = vsub.f32 1.0, %v1649_v50  ;;  %vm1219_vm1 = vweird.f32 %v4105_v43 }
 0x1cc   : > { %v4133_v9 = vpop.eup %2761  ;;  %v1203_v33 = vmul.f32 %v4097_v30, %v1202_v47  ;;  %1128 = vadd.xlane.f32.xlu2 %v4057_v21  ;;  %1096 = vadd.xlane.f32.xlu1 %v4052_v35 }
 0x1cd   : > { %v1428_v2 = vadd.f32 %v2750_v59, %v1427_v7  ;;  %v1651_v32 = vmul.f32 %v2754_v8, %v1650_v14  ;;  %1160 = vadd.xlane.f32.xlu0 %v4054_v46  ;;  %v1660_v7 = vor.u32 1.1754944e-38, %v1659_v11 }
 0x1ce   : > { %v2764_v50 = vpop.eup %2763  ;;  %v1204_v47 = vadd.f32 %v4097_v30, %v1203_v33 }
 0x1cf   : > { %v1432_v14 = vsel %vm1431_vm12, %v2750_v59, %v1428_v2  ;;  %v1652_v24 = vadd.f32 %v2754_v8, %v1651_v32  ;;  %v1873_v46 = vmul.f32 %v2764_v50, %v4103_v55  ;;  %v4161_v35 = vpop.eup %2765  ;;  %v1884_v59 = vor.u32 1.1754944e-38, %v1883_v52 }
 0x1d0   : > { %v1437_v60 = vsel %vm4107_vm6, %v1436_v54, %v1432_v14  ;;  %v1208_v11 = vsel %vm1207_vm15, %v4097_v30, %v1204_v47  ;;  %v1223_v32 = vand.u32 2147483647, %v4105_v43  ;;  %v4174_v54 = vpop.xlane.xlu2 %1170  ;;  %v2768_v30 = vpop.eup %2767  ;;  %vm1878_vm2 = vweird.f32 %v2764_v50  ;;  %v5636_v14 = vld [vmem:[#allocation6_spill] sm:$0xff] }
 0x1d1   : > { %v2112_v27 = vmul.f32 %v3736_v42, %v1437_v60  ;;  %v1213_v33 = vsel %vm4129_vm9, %v1212_v49, %v1208_v11  ;;  %v1656_v2 = vsel %vm1655_vm0, %v2754_v8, %v1652_v24  ;;  %v1874_v63 = vsub.f32 1.0, %v1873_v46  ;;  %v4186_v49 = vpop.xlane.xlu1 %1138  ;;  %vm1879_vm4 = vmor %vm1877_vm14, %vm1878_vm2 }
 0x1d2   : > { %v2096_v47 = vmul.f32 %v3738_v0, %v1213_v33  ;;  %v1661_v52 = vsel %vm4150_vm13, %v1660_v7, %v1656_v2  ;;  %v1215_v56 = vmul.f32 %v4161_v35, %v4105_v43  ;;  %v1439_v46 = vmul.f32 %v2768_v30, %v4119_v44  ;;  %v5637_v0 = vld [vmem:[#allocation5_spill] sm:$0xff] }
 0x1d3   : > { %v2176_v42 = vsel %vm3100_vm3, %v2112_v27, %v5636_v14  ;;  %v2128_v34 = vmul.f32 %v3740_v41, %v1661_v52  ;;  %v1875_v8 = vmul.f32 %v2764_v50, %v1874_v63  ;;  %v1225_v24 = vand.u32 2147483648, %v4105_v43  ;;  %v5638_v41 = vld [vmem:[#allocation7_spill] sm:$0xff] }
 0x1d4   : > { %2240 = vst [vmem:[%s4189_s10 + $0x80] sm:$0xff] %v2176_v42  ;;  %v2160_v21 = vsel %vm3100_vm3, %v2096_v47, %v5637_v0  ;;  %v1216_v7 = vsub.f32 1.0, %v1215_v56  ;;  %2769 = vrcp.f32 %v4174_v54  ;;  %1098 = vadd.xlane.f32.xlu2 %v4069_v19  ;;  %1192 = vadd.xlane.f32.xlu1 %v4062_v3  ;;  %v1440_v27 = vsub.f32 1.0, %v1439_v46  ;;  %v4213_v56 = vpop.xlane.xlu0 %1076 }
 0x1d5   : > { %2224 = vst [vmem:[%s4189_s10] sm:$0xff] %v2160_v21  ;;  %v2192_v60 = vsel %vm3100_vm3, %v2128_v34, %v5638_v41  ;;  %v1876_v11 = vadd.f32 %v2764_v50, %v1875_v8  ;;  %v1447_v33 = vand.u32 2147483647, %v4119_v44  ;;  %1130 = vadd.xlane.f32.xlu0 %v4066_v17  ;;  %vm1220_vm5 = vweird.f32 %v4161_v35 }
 0x1d6   : > { %2256 = vst [vmem:[%s4189_s10 + $0x100] sm:$0xff] %v2192_v60  ;;  %v1217_v2 = vmul.f32 %v4161_v35, %v1216_v7  ;;  %v1449_v63 = vand.u32 2147483648, %v4119_v44  ;;  %2771 = vrcp.f32 %v4186_v49  ;;  %vm1882_vm6 = vcmp.eq.f32.partialorder %v1881_v40, 8.507059e+37  ;;  %vm1221_vm10 = vmor %vm1219_vm1, %vm1220_vm5 }
 0x1d7   : > { %v1880_v47 = vsel %vm1879_vm4, %v2764_v50, %v1876_v11  ;;  %v1441_v52 = vmul.f32 %v2768_v30, %v1440_v27  ;;  %vm1444_vm7 = vweird.f32 %v2768_v30  ;;  %vm1224_vm8 = vcmp.eq.f32.partialorder %v1223_v32, 8.507059e+37  ;;  %v5639_v32 = vld [vmem:[#allocation8_spill] sm:$0xff] }
 0x1d8   : > { %v1885_v14 = vsel %vm1882_vm6, %v1884_v59, %v1880_v47  ;;  %v1218_v42 = vadd.f32 %v4161_v35, %v1217_v2  ;;  %vm1443_vm9 = vweird.f32 %v4119_v44  ;;  %v1226_v34 = vor.u32 1.1754944e-38, %v1225_v24  ;;  %v4227_v21 = vpop.xlane.xlu2 %1140 }
 0x1d9   : > { %v2144_v55 = vmul.f32 %v3757_v26, %v1885_v14  ;;  %v1442_v8 = vadd.f32 %v2768_v30, %v1441_v52  ;;  %vm1448_vm11 = vcmp.eq.f32.partialorder %v1447_v33, 8.507059e+37  ;;  %vm1445_vm12 = vmor %vm1443_vm9, %vm1444_vm7  ;;  %v1450_v46 = vor.u32 1.1754944e-38, %v1449_v63  ;;  %v4238_v33 = vpop.xlane.xlu1 %1108 }
 0x1da   : > { %v2770_v50 = vpop.eup %2769  ;;  %v1222_v40 = vsel %vm1221_vm10, %v4161_v35, %v1218_v42  ;;  %v1895_v59 = vand.u32 2147483647, %v4174_v54  ;;  %2773 = vrcp.f32 %v4213_v56  ;;  %v1897_v41 = vand.u32 2147483648, %v4174_v54 }
 0x1db   : > { %v2208_v26 = vsel %vm3100_vm3, %v2144_v55, %v5639_v32  ;;  %v1227_v44 = vsel %vm1224_vm8, %v1226_v34, %v1222_v40  ;;  %v1446_v43 = vsel %vm1445_vm12, %v2768_v30, %v1442_v8  ;;  %v1887_v0 = vmul.f32 %v2770_v50, %v4174_v54 }
 0x1dc   : > { %v2772_v7 = vpop.eup %2771  ;;  %2272 = vst [vmem:[%s4189_s10 + $0x180] sm:$0xff] %v2208_v26  ;;  %v2097_v35 = vmul.f32 %v3759_v16, %v1227_v44  ;;  %v1451_v24 = vsel %vm1448_vm11, %v1450_v46, %v1446_v43  ;;  %v1671_v60 = vand.u32 2147483647, %v4186_v49  ;;  %1164 = vadd.xlane.f32.xlu2 %v4093_v62  ;;  %1162 = vadd.xlane.f32.xlu1 %v4075_v12  ;;  %vm1891_vm13 = vweird.f32 %v4174_v54  ;;  %v5640_v16 = vld [vmem:[#allocation10_spill] sm:$0xff]  ;;  %v4262_v26 = vpop.xlane.xlu0 %1172 }
 0x1dd   : > { %v2113_v30 = vmul.f32 %v3761_v6, %v1451_v24  ;;  %v1888_v11 = vsub.f32 1.0, %v1887_v0  ;;  %v1663_v27 = vmul.f32 %v2772_v7, %v4186_v49  ;;  %1100 = vadd.xlane.f32.xlu0 %v4080_v1  ;;  %vm1667_vm14 = vweird.f32 %v4186_v49  ;;  %v5641_v6 = vld [vmem:[#allocation9_spill] sm:$0xff] }
 0x1de   : > { %v2161_v2 = vsel %vm3100_vm3, %v2097_v35, %v5640_v16  ;;  %v1673_v63 = vand.u32 2147483648, %v4186_v49  ;;  %2775 = vrcp.f32 %v4227_v21  ;;  %vm1892_vm15 = vweird.f32 %v2770_v50 }
 0x1df   : > { %2225 = vst [vmem:[%s4189_s10 + $0x8] sm:$0xff] %v2161_v2  ;;  %v2177_v47 = vsel %vm3100_vm3, %v2113_v30, %v5641_v6  ;;  %v1889_v52 = vmul.f32 %v2770_v50, %v1888_v11  ;;  %v1664_v14 = vsub.f32 1.0, %v1663_v27  ;;  %vm4252_vm0 = vcmp.eq.f32.partialorder %v1895_v59, 8.507059e+37  ;;  %vm1893_vm4 = vmor %vm1891_vm13, %vm1892_vm15 }
 0x1e0   : > { %v2774_v42 = vpop.eup %2773  ;;  %2241 = vst [vmem:[%s4189_s10 + $0x88] sm:$0xff] %v2177_v47  ;;  %v1898_v34 = vor.u32 1.1754944e-38, %v1897_v41  ;;  %vm4256_vm1 = vcmp.eq.f32.partialorder %v1671_v60, 8.507059e+37  ;;  %2777 = vrcp.f32 %v4238_v33  ;;  %vm1668_vm2 = vweird.f32 %v2772_v7  ;;  %v4288_v47 = vpop.xlane.xlu2 %1110 }
 0x1e1   : > { %v1890_v40 = vadd.f32 %v2770_v50, %v1889_v52  ;;  %v1665_v46 = vmul.f32 %v2772_v7, %v1664_v14  ;;  %v1229_v32 = vmul.f32 %v2774_v42, %v4213_v56  ;;  %v1674_v59 = vor.u32 1.1754944e-38, %v1673_v63  ;;  %vm1669_vm6 = vmor %vm1667_vm14, %vm1668_vm2 }
 0x1e2   : > { %vm1233_vm5 = vweird.f32 %v4213_v56  ;;  %v1237_v44 = vand.u32 2147483647, %v4213_v56  ;;  %v1239_v43 = vand.u32 2147483648, %v4213_v56  ;;  %v1685_v41 = vand.u32 2147483647, %v4227_v21 }
 0x1e3   : > { %v1894_v0 = vsel %vm1893_vm4, %v2770_v50, %v1890_v40  ;;  %v1666_v35 = vadd.f32 %v2772_v7, %v1665_v46  ;;  %v1230_v24 = vsub.f32 1.0, %v1229_v32  ;;  %vm1234_vm7 = vweird.f32 %v2774_v42  ;;  %v5651_v46 = vld [vmem:[#allocation13_spill] sm:$0xff] }
 0x1e4   : > { %v2776_v60 = vpop.eup %2775  ;;  %v1899_v30 = vsel %vm4252_vm0, %v1898_v34, %v1894_v0  ;;  %v1687_v54 = vand.u32 2147483648, %v4227_v21  ;;  %2779 = vrcp.f32 %v4262_v26  ;;  %1134 = vadd.xlane.f32.xlu2 %v4126_v37  ;;  %1132 = vadd.xlane.f32.xlu1 %v4086_v29  ;;  %vm4283_vm8 = vcmp.eq.f32.partialorder %v1237_v44, 8.507059e+37  ;;  %vm1235_vm10 = vmor %vm1233_vm5, %vm1234_vm7  ;;  %v4307_v44 = vpop.xlane.xlu1 %1078 }
 0x1e5   : > { %v2145_v50 = vmul.f32 %v3778_v58, %v1899_v30  ;;  %v1670_v11 = vsel %vm1669_vm6, %v2772_v7, %v1666_v35  ;;  %v1231_v27 = vmul.f32 %v2774_v42, %v1230_v24  ;;  %v1677_v16 = vmul.f32 %v2776_v60, %v4227_v21  ;;  %1166 = vadd.xlane.f32.xlu0 %v4121_v5  ;;  %v5648_v58 = vld [vmem:[#allocation11_spill] sm:$0xff] }
 0x1e6   : > { %v2778_v49 = vpop.eup %2777  ;;  %v1675_v2 = vsel %vm4256_vm1, %v1674_v59, %v1670_v11  ;;  %v1240_v6 = vor.u32 1.1754944e-38, %v1239_v43  ;;  %vm1681_vm9 = vweird.f32 %v4227_v21  ;;  %vm1682_vm11 = vweird.f32 %v2776_v60  ;;  %v4328_v21 = vpop.xlane.xlu0 %1142 }
 0x1e7   : > { %v2209_v7 = vsel %vm3100_vm3, %v2145_v50, %v5648_v58  ;;  %v2129_v52 = vmul.f32 %v3780_v61, %v1675_v2  ;;  %v1232_v14 = vadd.f32 %v2774_v42, %v1231_v27  ;;  %v1678_v55 = vsub.f32 1.0, %v1677_v16  ;;  %vm1683_vm14 = vmor %vm1681_vm9, %vm1682_vm11 }
 0x1e8   : > { %2273 = vst [vmem:[%s4189_s10 + $0x188] sm:$0xff] %v2209_v7  ;;  %vm4298_vm12 = vcmp.eq.f32.partialorder %v1685_v41, 8.507059e+37  ;;  %v1688_v8 = vor.u32 1.1754944e-38, %v1687_v54  ;;  %v1453_v40 = vmul.f32 %v2778_v49, %v4238_v33  ;;  %2781 = vrcp.f32 %v4288_v47 }
 0x1e9   : > { %v2193_v32 = vsel %vm3100_vm3, %v2129_v52, %v5651_v46  ;;  %v1236_v61 = vsel %vm1235_vm10, %v2774_v42, %v1232_v14  ;;  %v1679_v59 = vmul.f32 %v2776_v60, %v1678_v55  ;;  %vm1457_vm13 = vweird.f32 %v4238_v33 }
 0x1ea   : > { %v2780_v56 = vpop.eup %2779  ;;  %2257 = vst [vmem:[%s4189_s10 + $0x108] sm:$0xff] %v2193_v32  ;;  %v1241_v43 = vsel %vm4283_vm8, %v1240_v6, %v1236_v61  ;;  %v1454_v0 = vsub.f32 1.0, %v1453_v40  ;;  %v1461_v35 = vand.u32 2147483647, %v4238_v33  ;;  %v1463_v42 = vand.u32 2147483648, %v4238_v33  ;;  %v4348_v32 = vpop.xlane.xlu2 %1080 }
 0x1eb   : > { %v2098_v24 = vmul.f32 %v3782_v13, %v1241_v43  ;;  %v1680_v41 = vadd.f32 %v2776_v60, %v1679_v59  ;;  %v1901_v30 = vmul.f32 %v2780_v56, %v4262_v26  ;;  %vm1458_vm15 = vweird.f32 %v2778_v49  ;;  %v5652_v13 = vld [vmem:[#allocation12_spill] sm:$0xff] }
 0x1ec   : > { %v1455_v54 = vmul.f32 %v2778_v49, %v1454_v0  ;;  %v1909_v50 = vand.u32 2147483647, %v4262_v26  ;;  %2783 = vrcp.f32 %v4307_v44  ;;  %1194 = vadd.xlane.f32.xlu2 %v4083_v36  ;;  %1102 = vadd.xlane.f32.xlu1 %v4115_v51  ;;  %v1911_v2 = vand.u32 2147483648, %v4262_v26  ;;  %vm1459_vm2 = vmor %vm1457_vm13, %vm1458_vm15 }
 0x1ed   : > { %v2162_v11 = vsel %vm3100_vm3, %v2098_v24, %v5652_v13  ;;  %v1684_v27 = vsel %vm1683_vm14, %v2776_v60, %v1680_v41  ;;  %v1902_v16 = vsub.f32 1.0, %v1901_v30  ;;  %1196 = vadd.xlane.f32.xlu0 %v4088_v22  ;;  %vm1462_vm0 = vcmp.eq.f32.partialorder %v1461_v35, 8.507059e+37 }
 0x1ee   : > { %2226 = vst [vmem:[%s4189_s10 + $0x10] sm:$0xff] %v2162_v11  ;;  %v1689_v63 = vsel %vm4298_vm12, %v1688_v8, %v1684_v27  ;;  %v1456_v6 = vadd.f32 %v2778_v49, %v1455_v54  ;;  %vm1905_vm1 = vweird.f32 %v4262_v26  ;;  %v2782_v58 = vpop.eup %2781  ;;  %v1464_v60 = vor.u32 1.1754944e-38, %v1463_v42  ;;  %v5655_v8 = vld [vmem:[#allocation15_spill] sm:$0xff]  ;;  %v5656_v42 = vld [vmem:[#allocation16_spill] sm:$0xff] }
 0x1ef   : > { %v2130_v7 = vmul.f32 %v3799_v57, %v1689_v63  ;;  %v1903_v52 = vmul.f32 %v2780_v56, %v1902_v16  ;;  %vm1906_vm4 = vweird.f32 %v2780_v56  ;;  %vm4339_vm5 = vcmp.eq.f32.partialorder %v1909_v50, 8.507059e+37  ;;  %v4369_v50 = vpop.xlane.xlu1 %1174 }
 0x1f0   : > { %v1460_v14 = vsel %vm1459_vm2, %v2778_v49, %v1456_v6  ;;  %v1467_v34 = vmul.f32 %v2782_v58, %v4288_v47  ;;  %2785 = vrcp.f32 %v4328_v21  ;;  %v1912_v33 = vor.u32 1.1754944e-38, %v1911_v2  ;;  %vm1907_vm6 = vmor %vm1905_vm1, %vm1906_vm4  ;;  %v5657_v2 = vld [vmem:[#allocation14_spill] sm:$0xff] }
 0x1f1   : > { %v2194_v57 = vsel %vm3100_vm3, %v2130_v7, %v5655_v8  ;;  %v1465_v40 = vsel %vm1462_vm0, %v1464_v60, %v1460_v14  ;;  %v1904_v46 = vadd.f32 %v2780_v56, %v1903_v52  ;;  %v1475_v43 = vand.u32 2147483647, %v4288_v47  ;;  %v4385_v14 = vpop.xlane.xlu0 %1112 }
 0x1f2   : > { %v2784_v61 = vpop.eup %2783  ;;  %2258 = vst [vmem:[%s4189_s10 + $0x110] sm:$0xff] %v2194_v57  ;;  %v2114_v49 = vmul.f32 %v3801_v53, %v1465_v40  ;;  %v1468_v59 = vsub.f32 1.0, %v1467_v34  ;;  %v1477_v0 = vand.u32 2147483648, %v4288_v47  ;;  %vm1471_vm7 = vweird.f32 %v4288_v47 }
 0x1f3   : > { %v1908_v35 = vsel %vm1907_vm6, %v2780_v56, %v1904_v46  ;;  %v1243_v24 = vmul.f32 %v2784_v61, %v4307_v44  ;;  %v1251_v41 = vand.u32 2147483647, %v4307_v44  ;;  %vm1472_vm8 = vweird.f32 %v2782_v58 }
 0x1f4   : > { %v2178_v30 = vsel %vm3100_vm3, %v2114_v49, %v5656_v42  ;;  %v1913_v53 = vsel %vm4339_vm5, %v1912_v33, %v1908_v35  ;;  %v1469_v26 = vmul.f32 %v2782_v58, %v1468_v59  ;;  %1198 = vadd.xlane.f32.xlu1 %v4133_v9  ;;  %vm1247_vm9 = vweird.f32 %v4307_v44  ;;  %vm1473_vm11 = vmor %vm1471_vm7, %vm1472_vm8  ;;  %v4394_v59 = vpop.xlane.xlu2 %1176 }
 0x1f5   : > { %2242 = vst [vmem:[%s4189_s10 + $0x90] sm:$0xff] %v2178_v30  ;;  %v2146_v56 = vmul.f32 %v3803_v31, %v1913_v53  ;;  %v1244_v54 = vsub.f32 1.0, %v1243_v24  ;;  %2787 = vrcp.f32 %v4348_v32  ;;  %vm1476_vm10 = vcmp.eq.f32.partialorder %v1475_v43, 8.507059e+37  ;;  %v5660_v43 = vld [vmem:[#allocation23_spill] sm:$0xff] }
 0x1f6   : > { %v2786_v13 = vpop.eup %2785  ;;  %v1470_v11 = vadd.f32 %v2782_v58, %v1469_v26  ;;  %v1478_v27 = vor.u32 1.1754944e-38, %v1477_v0  ;;  %v1253_v16 = vand.u32 2147483648, %v4307_v44  ;;  %vm1248_vm12 = vweird.f32 %v2784_v61 }
 0x1f7   : > { %v2210_v63 = vsel %vm3100_vm3, %v2146_v56, %v5657_v2  ;;  %v1245_v31 = vmul.f32 %v2784_v61, %v1244_v54  ;;  %v1691_v6 = vmul.f32 %v2786_v13, %v4328_v21  ;;  %vm4379_vm13 = vcmp.eq.f32.partialorder %v1251_v41, 8.507059e+37  ;;  %vm1249_vm14 = vmor %vm1247_vm9, %vm1248_vm12  ;;  %v5663_v56 = vld [vmem:[#allocation19_spill] sm:$0xff] }
 0x1f8   : > { %2274 = vst [vmem:[%s4189_s10 + $0x190] sm:$0xff] %v2210_v63  ;;  %v1474_v7 = vsel %vm1473_vm11, %v2782_v58, %v1470_v11  ;;  %v1699_v52 = vand.u32 2147483647, %v4328_v21  ;;  %2789 = vrcp.f32 %v4369_v50  ;;  %v1701_v8 = vand.u32 2147483648, %v4328_v21  ;;  %v4426_v63 = vpop.xlane.xlu1 %1144 }
 0x1f9   : > { %v1479_v55 = vsel %vm1476_vm10, %v1478_v27, %v1474_v7  ;;  %v1246_v34 = vadd.f32 %v2784_v61, %v1245_v31  ;;  %v1692_v47 = vsub.f32 1.0, %v1691_v6  ;;  %v1254_v58 = vor.u32 1.1754944e-38, %v1253_v16 }
 0x1fa   : > { %v2115_v57 = vmul.f32 %v3822_v25, %v1479_v55  ;;  %vm1695_vm15 = vweird.f32 %v4328_v21  ;;  %v1265_v40 = vand.u32 2147483647, %v4348_v32  ;;  %vm1696_vm0 = vweird.f32 %v2786_v13 }
 0x1fb   : > { %v2788_v46 = vpop.eup %2787  ;;  %v1250_v33 = vsel %vm1249_vm14, %v2784_v61, %v1246_v34  ;;  %v1693_v49 = vmul.f32 %v2786_v13, %v1692_v47  ;;  %2791 = vrcp.f32 %v4385_v14  ;;  %vm4401_vm1 = vcmp.eq.f32.partialorder %v1699_v52, 8.507059e+37  ;;  %vm1697_vm2 = vmor %vm1695_vm15, %vm1696_vm0  ;;  %v5668_v34 = vld [vmem:[#allocation17_spill] sm:$0xff] }
 0x1fc   : > { %v2179_v25 = vsel %vm3100_vm3, %v2115_v57, %v5660_v43  ;;  %v1255_v44 = vsel %vm4379_vm13, %v1254_v58, %v1250_v33  ;;  %v1257_v35 = vmul.f32 %v2788_v46, %v4348_v32  ;;  %v1702_v41 = vor.u32 1.1754944e-38, %v1701_v8 }
 0x1fd   : > { %2243 = vst [vmem:[%s4189_s10 + $0x98] sm:$0xff] %v2179_v25  ;;  %v2099_v61 = vmul.f32 %v3820_v18, %v1255_v44  ;;  %v1694_v24 = vadd.f32 %v2786_v13, %v1693_v49  ;;  %v1267_v42 = vand.u32 2147483648, %v4348_v32  ;;  %vm1261_vm4 = vweird.f32 %v4348_v32  ;;  %v4444_v49 = vpop.xlane.xlu0 %1082 }
 0x1fe   : > { %v2790_v30 = vpop.eup %2789  ;;  %v1258_v53 = vsub.f32 1.0, %v1257_v35  ;;  %v1923_v26 = vand.u32 2147483647, %v4369_v50  ;;  %2793 = vrcp.f32 %v4394_v59  ;;  %vm4417_vm5 = vcmp.eq.f32.partialorder %v1265_v40, 8.507059e+37 }
 0x1ff   : > { %v2163_v54 = vsel %vm3100_vm3, %v2099_v61, %v5663_v56  ;;  %v1698_v18 = vsel %vm1697_vm2, %v2786_v13, %v1694_v24  ;;  %v1915_v27 = vmul.f32 %v2790_v30, %v4369_v50  ;;  %vm1262_vm6 = vweird.f32 %v2788_v46 }
 0x200   : > { %2227 = vst [vmem:[%s4189_s10 + $0x18] sm:$0xff] %v2163_v54  ;;  %v1703_v21 = vsel %vm4401_vm1, %v1702_v41, %v1698_v18  ;;  %v1259_v16 = vmul.f32 %v2788_v46, %v1258_v53  ;;  %v1925_v2 = vand.u32 2147483648, %v4369_v50  ;;  %v1268_v6 = vor.u32 1.1754944e-38, %v1267_v42  ;;  %vm1263_vm10 = vmor %vm1261_vm4, %vm1262_vm6  ;;  %v5669_v42 = vld [vmem:[#allocation18_spill] sm:$0xff] }
 0x201   : > { %v2792_v31 = vpop.eup %2791  ;;  %v2131_v13 = vmul.f32 %v3824_v23, %v1703_v21  ;;  %v1916_v7 = vsub.f32 1.0, %v1915_v27  ;;  %vm1919_vm7 = vweird.f32 %v4369_v50  ;;  %vm4430_vm8 = vcmp.eq.f32.partialorder %v1923_v26, 8.507059e+37  ;;  %v4461_v50 = vpop.xlane.xlu2 %1146 }
 0x202   : > { %v1260_v60 = vadd.f32 %v2788_v46, %v1259_v16  ;;  %v1481_v55 = vmul.f32 %v2792_v31, %v4385_v14  ;;  %vm1485_vm9 = vweird.f32 %v4385_v14  ;;  %vm1920_vm11 = vweird.f32 %v2790_v30  ;;  %v5672_v16 = vld [vmem:[#allocation20_spill] sm:$0xff] }
 0x203   : > { %v2195_v47 = vsel %vm3100_vm3, %v2131_v13, %v5668_v34  ;;  %v1917_v23 = vmul.f32 %v2790_v30, %v1916_v7  ;;  %2795 = vrcp.f32 %v4426_v63  ;;  %v1926_v58 = vor.u32 1.1754944e-38, %v1925_v2  ;;  %vm1921_vm12 = vmor %vm1919_vm7, %vm1920_vm11  ;;  %v5673_v34 = vld [vmem:[#allocation21_spill] sm:$0xff] }
 0x204   : > { %v2794_v8 = vpop.eup %2793  ;;  %2259 = vst [vmem:[%s4189_s10 + $0x118] sm:$0xff] %v2195_v47  ;;  %v1264_v57 = vsel %vm1263_vm10, %v2788_v46, %v1260_v60  ;;  %v1482_v40 = vsub.f32 1.0, %v1481_v55  ;;  %v1489_v33 = vand.u32 2147483647, %v4385_v14  ;;  %v1491_v32 = vand.u32 2147483648, %v4385_v14  ;;  %v4482_v55 = vpop.xlane.xlu1 %1114 }
 0x205   : > { %v1269_v43 = vsel %vm4417_vm5, %v1268_v6, %v1264_v57  ;;  %v1918_v25 = vadd.f32 %v2790_v30, %v1917_v23  ;;  %v1929_v44 = vmul.f32 %v2794_v8, %v4394_v59  ;;  %vm1486_vm13 = vweird.f32 %v2792_v31 }
 0x206   : > { %v2100_v0 = vmul.f32 %v3841_v15, %v1269_v43  ;;  %v1483_v46 = vmul.f32 %v2792_v31, %v1482_v40  ;;  %v1937_v35 = vand.u32 2147483647, %v4394_v59  ;;  %v1939_v41 = vand.u32 2147483648, %v4394_v59  ;;  %vm1487_vm15 = vmor %vm1485_vm9, %vm1486_vm13 }
 0x207   : > { %v1922_v61 = vsel %vm1921_vm12, %v2790_v30, %v1918_v25  ;;  %v1930_v24 = vsub.f32 1.0, %v1929_v44  ;;  %2797 = vrcp.f32 %v4444_v49  ;;  %vm1490_vm14 = vcmp.eq.f32.partialorder %v1489_v33, 8.507059e+37  ;;  %v5674_v44 = vld [vmem:[#allocation24_spill] sm:$0xff] }
 0x208   : > { %v2164_v53 = vsel %vm3100_vm3, %v2100_v0, %v5669_v42  ;;  %v1927_v15 = vsel %vm4430_vm8, %v1926_v58, %v1922_v61  ;;  %v1484_v26 = vadd.f32 %v2792_v31, %v1483_v46  ;;  %v1492_v54 = vor.u32 1.1754944e-38, %v1491_v32  ;;  %v4490_v58 = vpop.xlane.xlu0 %1178 }
 0x209   : > { %v2796_v56 = vpop.eup %2795  ;;  %2228 = vst [vmem:[%s4189_s10 + $0x20] sm:$0xff] %v2164_v53  ;;  %v2147_v30 = vmul.f32 %v3843_v20, %v1927_v15  ;;  %v1931_v18 = vmul.f32 %v2794_v8, %v1930_v24  ;;  %vm1934_vm0 = vweird.f32 %v2794_v8  ;;  %vm1933_vm1 = vweird.f32 %v4394_v59  ;;  %v5685_v53 = vld [vmem:[#allocation28_spill] sm:$0xff] }
 0x20a   : > { %v1488_v11 = vsel %vm1487_vm15, %v2792_v31, %v1484_v26  ;;  %vm4468_vm2 = vcmp.eq.f32.partialorder %v1937_v35, 8.507059e+37  ;;  %v1705_v21 = vmul.f32 %v2796_v56, %v4426_v63  ;;  %v1940_v14 = vor.u32 1.1754944e-38, %v1939_v41  ;;  %vm1935_vm4 = vmor %vm1933_vm1, %vm1934_vm0  ;;  %v4508_v41 = vpop.xlane.xlu2 %1116 }
 0x20b   : > { %v2211_v2 = vsel %vm3100_vm3, %v2147_v30, %v5672_v16  ;;  %v1493_v20 = vsel %vm1490_vm14, %v1492_v54, %v1488_v11  ;;  %v1932_v13 = vadd.f32 %v2794_v8, %v1931_v18  ;;  %vm1709_vm5 = vweird.f32 %v4426_v63 }
 0x20c   : > { %2275 = vst [vmem:[%s4189_s10 + $0x198] sm:$0xff] %v2211_v2  ;;  %v2116_v6 = vmul.f32 %v3845_v38, %v1493_v20  ;;  %v1706_v31 = vsub.f32 1.0, %v1705_v21  ;;  %2799 = vrcp.f32 %v4461_v50  ;;  %vm1710_vm6 = vweird.f32 %v2796_v56  ;;  %v5679_v21 = vld [vmem:[#allocation22_spill] sm:$0xff] }
 0x20d   : > { %v2798_v59 = vpop.eup %2797  ;;  %v1936_v7 = vsel %vm1935_vm4, %v2794_v8, %v1932_v13  ;;  %v1713_v60 = vand.u32 2147483647, %v4426_v63  ;;  %v1715_v52 = vand.u32 2147483648, %v4426_v63  ;;  %vm1275_vm7 = vweird.f32 %v4444_v49  ;;  %vm1711_vm8 = vmor %vm1709_vm5, %vm1710_vm6 }
 0x20e   : > { %v2180_v38 = vsel %vm3100_vm3, %v2116_v6, %v5673_v34  ;;  %v1941_v47 = vsel %vm4468_vm2, %v1940_v14, %v1936_v7  ;;  %v1707_v23 = vmul.f32 %v2796_v56, %v1706_v31  ;;  %v1271_v57 = vmul.f32 %v2798_v59, %v4444_v49  ;;  %v4534_v31 = vpop.xlane.xlu1 %1084 }
 0x20f   : > { %2244 = vst [vmem:[%s4189_s10 + $0xa0] sm:$0xff] %v2180_v38  ;;  %v2148_v8 = vmul.f32 %v3864_v48, %v1941_v47  ;;  %v1279_v40 = vand.u32 2147483647, %v4444_v49  ;;  %v1281_v33 = vand.u32 2147483648, %v4444_v49  ;;  %v1727_v32 = vand.u32 2147483647, %v4461_v50 }
 0x210   : > { %v1708_v43 = vadd.f32 %v2796_v56, %v1707_v23  ;;  %v1272_v25 = vsub.f32 1.0, %v1271_v57  ;;  %2801 = vrcp.f32 %v4482_v55  ;;  %vm1714_vm9 = vcmp.eq.f32.partialorder %v1713_v60, 8.507059e+37  ;;  %v5682_v47 = vld [vmem:[#allocation25_spill] sm:$0xff] }
 0x211   : > { %v2212_v0 = vsel %vm3100_vm3, %v2148_v8, %v5674_v44  ;;  %v1716_v48 = vor.u32 1.1754944e-38, %v1715_v52  ;;  %2803 = vrcp.f32 %v4490_v58  ;;  %vm1276_vm10 = vweird.f32 %v2798_v59 }
 0x212   : > { %v2800_v46 = vpop.eup %2799  ;;  %2276 = vst [vmem:[%s4189_s10 + $0x1a0] sm:$0xff] %v2212_v0  ;;  %v1712_v35 = vsel %vm1711_vm8, %v2796_v56, %v1708_v43  ;;  %v1273_v61 = vmul.f32 %v2798_v59, %v1272_v25  ;;  %v1729_v24 = vand.u32 2147483648, %v4461_v50  ;;  %vm4510_vm11 = vcmp.eq.f32.partialorder %v1279_v40, 8.507059e+37  ;;  %vm1277_vm14 = vmor %vm1275_vm7, %vm1276_vm10  ;;  %v4556_v25 = vpop.xlane.xlu0 %1148 }
 0x213   : > { %v1717_v42 = vsel %vm1714_vm9, %v1716_v48, %v1712_v35  ;;  %v1282_v63 = vor.u32 1.1754944e-38, %v1281_v33  ;;  %v1719_v15 = vmul.f32 %v2800_v46, %v4461_v50  ;;  %vm1723_vm12 = vweird.f32 %v4461_v50  ;;  %v4564_v35 = vpop.xlane.xlu2 %1086 }
 0x214   : > { %v2132_v26 = vmul.f32 %v3862_v28, %v1717_v42  ;;  %v1274_v30 = vadd.f32 %v2798_v59, %v1273_v61  ;;  %vm4517_vm13 = vcmp.eq.f32.partialorder %v1727_v32, 8.507059e+37  ;;  %v1503_v18 = vand.u32 2147483647, %v4482_v55 }
 0x215   : > { %v1720_v54 = vsub.f32 1.0, %v1719_v15  ;;  %v1505_v11 = vand.u32 2147483648, %v4482_v55  ;;  %2805 = vrcp.f32 %v4508_v41  ;;  %v1730_v2 = vor.u32 1.1754944e-38, %v1729_v24 }
 0x216   : > { %v2802_v27 = vpop.eup %2801  ;;  %v2196_v28 = vsel %vm3100_vm3, %v2132_v26, %v5679_v21  ;;  %v1278_v16 = vsel %vm1277_vm14, %v2798_v59, %v1274_v30  ;;  %v1951_v20 = vand.u32 2147483647, %v4490_v58  ;;  %vm1724_vm15 = vweird.f32 %v2800_v46  ;;  %v5688_v21 = vld [vmem:[#allocation95_spill] sm:$0xff] }
 0x217   : > { %v2804_v13 = vpop.eup %2803  ;;  %2260 = vst [vmem:[%s4189_s10 + $0x120] sm:$0xff] %v2196_v28  ;;  %v1283_v49 = vsel %vm4510_vm11, %v1282_v63, %v1278_v16  ;;  %v1721_v14 = vmul.f32 %v2800_v46, %v1720_v54  ;;  %v1495_v6 = vmul.f32 %v2802_v27, %v4482_v55  ;;  %vm1499_vm0 = vweird.f32 %v4482_v55  ;;  %vm1725_vm4 = vmor %vm1723_vm12, %vm1724_vm15 }
 0x218   : > { %v2101_v7 = vmul.f32 %v3866_v10, %v1283_v49  ;;  %v1943_v59 = vmul.f32 %v2804_v13, %v4490_v58  ;;  %vm1947_vm1 = vweird.f32 %v4490_v58  ;;  %vm4540_vm2 = vcmp.eq.f32.partialorder %v1503_v18, 8.507059e+37 }
 0x219   : > { %v1722_v60 = vadd.f32 %v2800_v46, %v1721_v14  ;;  %v1496_v52 = vsub.f32 1.0, %v1495_v6  ;;  %v1506_v38 = vor.u32 1.1754944e-38, %v1505_v11  ;;  %vm4549_vm5 = vcmp.eq.f32.partialorder %v1951_v20, 8.507059e+37 }
 0x21a   : > { %v2165_v23 = vsel %vm3100_vm3, %v2101_v7, %v5682_v47  ;;  %v1944_v10 = vsub.f32 1.0, %v1943_v59  ;;  %2807 = vrcp.f32 %v4534_v31  ;;  %vm1500_vm6 = vweird.f32 %v2802_v27  ;;  %v5690_v7 = vld [vmem:[#allocation29_spill] sm:$0xff]  ;;  %v4609_v47 = vpop.xlane.xlu0 %1118 }
 0x21b   : > { %v2806_v8 = vpop.eup %2805  ;;  %2229 = vst [vmem:[%s4189_s10 + $0x28] sm:$0xff] %v2165_v23  ;;  %v1726_v40 = vsel %vm1725_vm4, %v2800_v46, %v1722_v60  ;;  %v1497_v33 = vmul.f32 %v2802_v27, %v1496_v52  ;;  %v1953_v43 = vand.u32 2147483648, %v4490_v58  ;;  %vm1948_vm7 = vweird.f32 %v2804_v13  ;;  %vm1501_vm9 = vmor %vm1499_vm0, %vm1500_vm6 }
 0x21c   : > { %v1731_v50 = vsel %vm4517_vm13, %v1730_v2, %v1726_v40  ;;  %v1945_v32 = vmul.f32 %v2804_v13, %v1944_v10  ;;  %v1509_v44 = vmul.f32 %v2806_v8, %v4508_v41  ;;  %vm1513_vm8 = vweird.f32 %v4508_v41  ;;  %vm1949_vm10 = vmor %vm1947_vm1, %vm1948_vm7  ;;  %v5691_v10 = vld [vmem:[#allocation97_spill] sm:$0xff] }
 0x21d   : > { %v2133_v0 = vmul.f32 %v3885_v4, %v1731_v50  ;;  %v1498_v48 = vadd.f32 %v2802_v27, %v1497_v33  ;;  %v1517_v46 = vand.u32 2147483647, %v4508_v41  ;;  %v1519_v42 = vand.u32 2147483648, %v4508_v41 }
 0x21e   : > { %v1946_v61 = vadd.f32 %v2804_v13, %v1945_v32  ;;  %v1510_v24 = vsub.f32 1.0, %v1509_v44  ;;  %2809 = vrcp.f32 %v4556_v25  ;;  %v1954_v15 = vor.u32 1.1754944e-38, %v1953_v43  ;;  %v5694_v44 = vld [vmem:[#allocation30_spill] sm:$0xff] }
 0x21f   : > { %v2197_v4 = vsel %vm3100_vm3, %v2133_v0, %v5685_v53  ;;  %v1502_v63 = vsel %vm1501_vm9, %v2802_v27, %v1498_v48  ;;  %vm1514_vm11 = vweird.f32 %v2806_v8  ;;  %2811 = vrcp.f32 %v4564_v35  ;;  %v4587_v27 = vpop.xlane.xlu1 %1180  ;;  %v4631_v53 = vpop.xlane.xlu2 %1182 }
 0x220   : > { %v2808_v26 = vpop.eup %2807  ;;  %2261 = vst [vmem:[%s4189_s10 + $0x128] sm:$0xff] %v2197_v4  ;;  %v1507_v55 = vsel %vm4540_vm2, %v1506_v38, %v1502_v63  ;;  %v1950_v30 = vsel %vm1949_vm10, %v2804_v13, %v1946_v61  ;;  %v1511_v56 = vmul.f32 %v2806_v8, %v1510_v24  ;;  %vm4582_vm12 = vcmp.eq.f32.partialorder %v1517_v46, 8.507059e+37  ;;  %vm1515_vm13 = vmor %vm1513_vm8, %vm1514_vm11 }
 0x221   : > { %v2117_v54 = vmul.f32 %v3883_v45, %v1507_v55  ;;  %v1955_v18 = vsel %vm4549_vm5, %v1954_v15, %v1950_v30  ;;  %v1285_v11 = vmul.f32 %v2808_v26, %v4534_v31  ;;  %v1293_v2 = vand.u32 2147483647, %v4534_v31  ;;  %v5689_v45 = vld [vmem:[#allocation26_spill] sm:$0xff]  ;;  %v5697_v55 = vld [vmem:[#allocation96_spill] sm:$0xff] }
 0x222   : > { %v2149_v28 = vmul.f32 %v5688_v21, %v1955_v18  ;;  %v1512_v16 = vadd.f32 %v2806_v8, %v1511_v56  ;;  %v1295_v20 = vand.u32 2147483648, %v4534_v31  ;;  %v1520_v49 = vor.u32 1.1754944e-38, %v1519_v42 }
 0x223   : > { %v2181_v13 = vsel %vm3100_vm3, %v2117_v54, %v5689_v45  ;;  %v1286_v14 = vsub.f32 1.0, %v1285_v11  ;;  %vm1289_vm14 = vweird.f32 %v4534_v31  ;;  %v1741_v52 = vand.u32 2147483647, %v4556_v25  ;;  %v5700_v11 = vld [vmem:[#allocation27_spill] sm:$0xff] }
 0x224   : > { %v2810_v6 = vpop.eup %2809  ;;  %2245 = vst [vmem:[%s4189_s10 + $0xa8] sm:$0xff] %v2181_v13  ;;  %v2213_v59 = vsel %vm3100_vm3, %v2149_v28, %v5690_v7  ;;  %v1516_v60 = vsel %vm1515_vm13, %v2806_v8, %v1512_v16  ;;  %2813 = vrcp.f32 %v4587_v27  ;;  %vm1290_vm15 = vweird.f32 %v2808_v26 }
 0x225   : > { %2277 = vst [vmem:[%s4189_s10 + $0x1a8] sm:$0xff] %v2213_v59  ;;  %v1521_v41 = vsel %vm4582_vm12, %v1520_v49, %v1516_v60  ;;  %v1287_v34 = vmul.f32 %v2808_v26, %v1286_v14  ;;  %v1733_v38 = vmul.f32 %v2810_v6, %v4556_v25  ;;  %v2812_v23 = vpop.eup %2811  ;;  %vm4612_vm0 = vcmp.eq.f32.partialorder %v1293_v2, 8.507059e+37  ;;  %vm1291_vm2 = vmor %vm1289_vm14, %vm1290_vm15  ;;  %v5701_v49 = vld [vmem:[#allocation98_spill] sm:$0xff] }
 0x226   : > { %v2118_v57 = vmul.f32 %v5691_v10, %v1521_v41  ;;  %v1296_v40 = vor.u32 1.1754944e-38, %v1295_v20  ;;  %v1743_v33 = vand.u32 2147483648, %v4556_v25  ;;  %vm1737_vm1 = vweird.f32 %v4556_v25  ;;  %v5705_v10 = vld [vmem:[#allocation100_spill] sm:$0xff] }
 0x227   : > { %v1288_v43 = vadd.f32 %v2808_v26, %v1287_v34  ;;  %v1734_v50 = vsub.f32 1.0, %v1733_v38  ;;  %v1299_v32 = vmul.f32 %v2812_v23, %v4564_v35  ;;  %vm4624_vm4 = vcmp.eq.f32.partialorder %v1741_v52, 8.507059e+37  ;;  %v4650_v20 = vpop.xlane.xlu1 %1150  ;;  %v5704_v34 = vld [vmem:[#allocation31_spill] sm:$0xff] }
 0x228   : > { %v2182_v0 = vsel %vm3100_vm3, %v2118_v57, %v5694_v44  ;;  %v1307_v46 = vand.u32 2147483647, %v4564_v35  ;;  %2815 = vrcp.f32 %v4609_v47  ;;  %vm1738_vm5 = vweird.f32 %v2810_v6 }
 0x229   : > { %2246 = vst [vmem:[%s4189_s10 + $0xb0] sm:$0xff] %v2182_v0  ;;  %v1292_v61 = vsel %vm1291_vm2, %v2808_v26, %v1288_v43  ;;  %v1735_v24 = vmul.f32 %v2810_v6, %v1734_v50  ;;  %v1300_v42 = vsub.f32 1.0, %v1299_v32  ;;  %v1744_v63 = vor.u32 1.1754944e-38, %v1743_v33  ;;  %vm1739_vm7 = vmor %vm1737_vm1, %vm1738_vm5  ;;  %v4675_v43 = vpop.xlane.xlu0 %1088  ;;  %v5706_v50 = vld [vmem:[#allocation33_spill] sm:$0xff] }
 0x22a   : > { %v2814_v4 = vpop.eup %2813  ;;  %v1297_v31 = vsel %vm4612_vm0, %v1296_v40, %v1292_v61  ;;  %vm1304_vm6 = vweird.f32 %v2812_v23  ;;  %v1309_v15 = vand.u32 2147483648, %v4564_v35  ;;  %vm1303_vm8 = vweird.f32 %v4564_v35 }
 0x22b   : > { %v2102_v30 = vmul.f32 %v5697_v55, %v1297_v31  ;;  %v1736_v56 = vadd.f32 %v2810_v6, %v1735_v24  ;;  %v1301_v54 = vmul.f32 %v2812_v23, %v1300_v42  ;;  %v1957_v26 = vmul.f32 %v2814_v4, %v4587_v27  ;;  %vm1305_vm10 = vmor %vm1303_vm8, %vm1304_vm6  ;;  %v4690_v42 = vpop.xlane.xlu2 %1152  ;;  %v5709_v31 = vld [vmem:[#allocation99_spill] sm:$0xff] }
 0x22c   : > { %vm4641_vm9 = vcmp.eq.f32.partialorder %v1307_v46, 8.507059e+37  ;;  %v1965_v58 = vand.u32 2147483647, %v4587_v27  ;;  %2817 = vrcp.f32 %v4631_v53  ;;  %v1310_v45 = vor.u32 1.1754944e-38, %v1309_v15 }
 0x22d   : > { %v2166_v21 = vsel %vm3100_vm3, %v2102_v30, %v5700_v11  ;;  %v1740_v28 = vsel %vm1739_vm7, %v2810_v6, %v1736_v56  ;;  %v1302_v16 = vadd.f32 %v2812_v23, %v1301_v54  ;;  %v1958_v2 = vsub.f32 1.0, %v1957_v26  ;;  %v5710_v56 = vld [vmem:[#allocation32_spill] sm:$0xff] }
 0x22e   : > { %v2816_v25 = vpop.eup %2815  ;;  %2230 = vst [vmem:[%s4189_s10 + $0x30] sm:$0xff] %v2166_v21  ;;  %v1745_v35 = vsel %vm4624_vm4, %v1744_v63, %v1740_v28  ;;  %vm1962_vm11 = vweird.f32 %v2814_v4  ;;  %v1967_v13 = vand.u32 2147483648, %v4587_v27  ;;  %vm1961_vm12 = vweird.f32 %v4587_v27 }
 0x22f   : > { %v2134_v14 = vmul.f32 %v5701_v49, %v1745_v35  ;;  %v1306_v7 = vsel %vm1305_vm10, %v2812_v23, %v1302_v16  ;;  %v1959_v6 = vmul.f32 %v2814_v4, %v1958_v2  ;;  %v1523_v59 = vmul.f32 %v2816_v25, %v4609_v47  ;;  %vm1963_vm14 = vmor %vm1961_vm12, %vm1962_vm11  ;;  %v5713_v2 = vld [vmem:[#allocation101_spill] sm:$0xff] }
 0x230   : > { %v1311_v60 = vsel %vm4641_vm9, %v1310_v45, %v1306_v7  ;;  %vm4662_vm13 = vcmp.eq.f32.partialorder %v1965_v58, 8.507059e+37  ;;  %v1531_v41 = vand.u32 2147483647, %v4609_v47  ;;  %v1968_v27 = vor.u32 1.1754944e-38, %v1967_v13  ;;  %v4701_v58 = vpop.xlane.xlu1 %1120  ;;  %v5714_v7 = vld [vmem:[#allocation34_spill] sm:$0xff] }
 0x231   : > { %v2198_v38 = vsel %vm3100_vm3, %v2134_v14, %v5704_v34  ;;  %v2103_v23 = vmul.f32 %v5705_v10, %v1311_v60  ;;  %v1960_v57 = vadd.f32 %v2814_v4, %v1959_v6  ;;  %v1524_v8 = vsub.f32 1.0, %v1523_v59  ;;  %v4731_v10 = vpop.xlane.xlu0 %1184 }
 0x232   : > { %v2818_v40 = vpop.eup %2817  ;;  %2262 = vst [vmem:[%s4189_s10 + $0x130] sm:$0xff] %v2198_v38  ;;  %vm1528_vm15 = vweird.f32 %v2816_v25  ;;  %v1533_v33 = vand.u32 2147483648, %v4609_v47  ;;  %2819 = vrcp.f32 %v4650_v20  ;;  %vm1527_vm0 = vweird.f32 %v4609_v47 }
 0x233   : > { %v2167_v32 = vsel %vm3100_vm3, %v2103_v23, %v5706_v50  ;;  %v1964_v44 = vsel %vm1963_vm14, %v2814_v4, %v1960_v57  ;;  %v1525_v0 = vmul.f32 %v2816_v25, %v1524_v8  ;;  %v1971_v48 = vmul.f32 %v2818_v40, %v4631_v53  ;;  %vm1529_vm2 = vmor %vm1527_vm0, %vm1528_vm15  ;;  %v5717_v57 = vld [vmem:[#allocation102_spill] sm:$0xff] }
 0x234   : > { %2231 = vst [vmem:[%s4189_s10 + $0x38] sm:$0xff] %v2167_v32  ;;  %v1969_v46 = vsel %vm4662_vm13, %v1968_v27, %v1964_v44  ;;  %vm4685_vm1 = vcmp.eq.f32.partialorder %v1531_v41, 8.507059e+37  ;;  %v1979_v24 = vand.u32 2147483647, %v4631_v53  ;;  %2821 = vrcp.f32 %v4675_v43  ;;  %v5720_v44 = vld [vmem:[#allocation38_spill] sm:$0xff] }
 0x235   : > { %v2150_v4 = vmul.f32 %v5709_v31, %v1969_v46  ;;  %v1526_v63 = vadd.f32 %v2816_v25, %v1525_v0  ;;  %v1972_v15 = vsub.f32 1.0, %v1971_v48  ;;  %v1534_v55 = vor.u32 1.1754944e-38, %v1533_v33 }
 0x236   : > { %vm1976_vm4 = vweird.f32 %v2818_v40  ;;  %v1981_v47 = vand.u32 2147483648, %v4631_v53  ;;  %v1755_v30 = vand.u32 2147483647, %v4650_v20  ;;  %2823 = vrcp.f32 %v4690_v42 }
 0x237   : > { %v2214_v54 = vsel %vm3100_vm3, %v2150_v4, %v5710_v56  ;;  %v1530_v26 = vsel %vm1529_vm2, %v2816_v25, %v1526_v63  ;;  %v1973_v18 = vmul.f32 %v2818_v40, %v1972_v15  ;;  %vm1975_vm5 = vweird.f32 %v4631_v53  ;;  %v4749_v63 = vpop.xlane.xlu2 %1122 }
 0x238   : > { %v2820_v11 = vpop.eup %2819  ;;  %2278 = vst [vmem:[%s4189_s10 + $0x1b0] sm:$0xff] %v2214_v54  ;;  %v1535_v21 = vsel %vm4685_vm1, %v1534_v55, %v1530_v26  ;;  %vm4707_vm6 = vcmp.eq.f32.partialorder %v1979_v24, 8.507059e+37  ;;  %v1757_v16 = vand.u32 2147483648, %v4650_v20  ;;  %v1321_v13 = vand.u32 2147483647, %v4675_v43  ;;  %vm1977_vm7 = vmor %vm1975_vm5, %vm1976_vm4  ;;  %v5721_v54 = vld [vmem:[#allocation42_spill] sm:$0xff] }
 0x239   : > { %v2119_v25 = vmul.f32 %v5713_v2, %v1535_v21  ;;  %v1974_v35 = vadd.f32 %v2818_v40, %v1973_v18  ;;  %v1747_v45 = vmul.f32 %v2820_v11, %v4650_v20  ;;  %v1982_v49 = vor.u32 1.1754944e-38, %v1981_v47  ;;  %v4761_v2 = vpop.xlane.xlu1 %1090 }
 0x23a   : > { %vm1751_vm8 = vweird.f32 %v4650_v20  ;;  %v1323_v53 = vand.u32 2147483648, %v4675_v43  ;;  %2825 = vrcp.f32 %v4701_v58  ;;  %v2822_v14 = vpop.eup %2821  ;;  %vm4722_vm9 = vcmp.eq.f32.partialorder %v1755_v30, 8.507059e+37 }
 0x23b   : > { %v2183_v6 = vsel %vm3100_vm3, %v2119_v25, %v5714_v7  ;;  %v1978_v59 = vsel %vm1977_vm7, %v2818_v40, %v1974_v35  ;;  %v1748_v60 = vsub.f32 1.0, %v1747_v45  ;;  %v1758_v34 = vor.u32 1.1754944e-38, %v1757_v16  ;;  %v5722_v35 = vld [vmem:[#allocation35_spill] sm:$0xff] }
 0x23c   : > { %2247 = vst [vmem:[%s4189_s10 + $0xb8] sm:$0xff] %v2183_v6  ;;  %v1983_v41 = vsel %vm4707_vm6, %v1982_v49, %v1978_v59  ;;  %v1313_v38 = vmul.f32 %v2822_v14, %v4675_v43  ;;  %vm1317_vm10 = vweird.f32 %v4675_v43  ;;  %v2824_v23 = vpop.eup %2823  ;;  %vm1752_vm11 = vweird.f32 %v2820_v11  ;;  %v5723_v49 = vld [vmem:[#allocation103_spill] sm:$0xff] }
 0x23d   : > { %v2151_v8 = vmul.f32 %v5717_v57, %v1983_v41  ;;  %v1749_v40 = vmul.f32 %v2820_v11, %v1748_v60  ;;  %vm4734_vm12 = vcmp.eq.f32.partialorder %v1321_v13, 8.507059e+37  ;;  %v1324_v50 = vor.u32 1.1754944e-38, %v1323_v53  ;;  %vm1753_vm14 = vmor %vm1751_vm8, %vm1752_vm11 }
 0x23e   : > { %v1314_v33 = vsub.f32 1.0, %v1313_v38  ;;  %v1761_v32 = vmul.f32 %v2824_v23, %v4690_v42  ;;  %vm1765_vm13 = vweird.f32 %v4690_v42  ;;  %v1769_v46 = vand.u32 2147483647, %v4690_v42  ;;  %v5727_v38 = vld [vmem:[#allocation48_spill] sm:$0xff] }
 0x23f   : > { %v2215_v0 = vsel %vm3100_vm3, %v2151_v8, %v5720_v44  ;;  %v1750_v48 = vadd.f32 %v2820_v11, %v1749_v40  ;;  %2827 = vrcp.f32 %v4731_v10  ;;  %vm1318_vm15 = vweird.f32 %v2822_v14 }
 0x240   : > { %v2826_v61 = vpop.eup %2825  ;;  %2279 = vst [vmem:[%s4189_s10 + $0x1b8] sm:$0xff] %v2215_v0  ;;  %v1315_v24 = vmul.f32 %v2822_v14, %v1314_v33  ;;  %v1762_v31 = vsub.f32 1.0, %v1761_v32  ;;  %v1771_v4 = vand.u32 2147483648, %v4690_v42  ;;  %vm1541_vm0 = vweird.f32 %v4701_v58  ;;  %vm1319_vm2 = vmor %vm1317_vm10, %vm1318_vm15  ;;  %v5726_v42 = vld [vmem:[#allocation36_spill] sm:$0xff]  ;;  %v4788_v33 = vpop.xlane.xlu0 %1154 }
 0x241   : > { %v1754_v15 = vsel %vm1753_vm14, %v2820_v11, %v1750_v48  ;;  %v1537_v55 = vmul.f32 %v2826_v61, %v4701_v58  ;;  %v1545_v47 = vand.u32 2147483647, %v4701_v58  ;;  %vm1766_vm1 = vweird.f32 %v2824_v23  ;;  %v4796_v48 = vpop.xlane.xlu2 %1092 }
 0x242   : > { %v1759_v30 = vsel %vm4722_vm9, %v1758_v34, %v1754_v15  ;;  %v1316_v56 = vadd.f32 %v2822_v14, %v1315_v24  ;;  %v1763_v20 = vmul.f32 %v2824_v23, %v1762_v31  ;;  %v1547_v11 = vand.u32 2147483648, %v4701_v58  ;;  %vm1767_vm5 = vmor %vm1765_vm13, %vm1766_vm1 }
 0x243   : > { %v2135_v26 = vmul.f32 %v5721_v54, %v1759_v30  ;;  %v1538_v18 = vsub.f32 1.0, %v1537_v55  ;;  %2829 = vrcp.f32 %v4749_v63  ;;  %vm1770_vm4 = vcmp.eq.f32.partialorder %v1769_v46, 8.507059e+37  ;;  %v5729_v46 = vld [vmem:[#allocation43_spill] sm:$0xff]  ;;  %v5732_v30 = vld [vmem:[#allocation37_spill] sm:$0xff] }
 0x244   : > { %v1320_v21 = vsel %vm1319_vm2, %v2822_v14, %v1316_v56  ;;  %v1764_v28 = vadd.f32 %v2824_v23, %v1763_v20  ;;  %v1772_v16 = vor.u32 1.1754944e-38, %v1771_v4  ;;  %vm1542_vm6 = vweird.f32 %v2826_v61 }
 0x245   : > { %v2828_v25 = vpop.eup %2827  ;;  %v2199_v45 = vsel %vm3100_vm3, %v2135_v26, %v5722_v35  ;;  %v1325_v43 = vsel %vm4734_vm12, %v1324_v50, %v1320_v21  ;;  %v1539_v13 = vmul.f32 %v2826_v61, %v1538_v18  ;;  %vm4772_vm7 = vcmp.eq.f32.partialorder %v1545_v47, 8.507059e+37  ;;  %vm1543_vm8 = vmor %vm1541_vm0, %vm1542_vm6  ;;  %v5728_v50 = vld [vmem:[#allocation39_spill] sm:$0xff]  ;;  %v4818_v21 = vpop.xlane.xlu1 %1186 }
 0x246   : > { %2263 = vst [vmem:[%s4189_s10 + $0x138] sm:$0xff] %v2199_v45  ;;  %v2104_v53 = vmul.f32 %v5723_v49, %v1325_v43  ;;  %v1768_v14 = vsel %vm1767_vm5, %v2824_v23, %v1764_v28  ;;  %v1985_v6 = vmul.f32 %v2828_v25, %v4731_v10  ;;  %v1548_v52 = vor.u32 1.1754944e-38, %v1547_v11  ;;  %v5735_v45 = vld [vmem:[#allocation47_spill] sm:$0xff] }
 0x247   : > { %v1773_v59 = vsel %vm1770_vm4, %v1772_v16, %v1768_v14  ;;  %v1540_v60 = vadd.f32 %v2826_v61, %v1539_v13  ;;  %v1993_v41 = vand.u32 2147483647, %v4731_v10  ;;  %2831 = vrcp.f32 %v4761_v2 }
 0x248   : > { %v2168_v34 = vsel %vm3100_vm3, %v2104_v53, %v5726_v42  ;;  %v2136_v57 = vmul.f32 %v5727_v38, %v1773_v59  ;;  %v1986_v23 = vsub.f32 1.0, %v1985_v6  ;;  %vm1989_vm9 = vweird.f32 %v4731_v10  ;;  %v5738_v6 = vld [vmem:[#allocation40_spill] sm:$0xff] }
 0x249   : > { %v2830_v8 = vpop.eup %2829  ;;  %2232 = vst [vmem:[%s4189_s10 + $0x40] sm:$0xff] %v2168_v34  ;;  %v1544_v40 = vsel %vm1543_vm8, %v2826_v61, %v1540_v60  ;;  %vm1990_vm10 = vweird.f32 %v2828_v25  ;;  %v1995_v27 = vand.u32 2147483648, %v4731_v10  ;;  %vm4800_vm11 = vcmp.eq.f32.partialorder %v1993_v41, 8.507059e+37 }
 0x24a   : > { %v2200_v32 = vsel %vm3100_vm3, %v2136_v57, %v5728_v50  ;;  %v1549_v58 = vsel %vm4772_vm7, %v1548_v52, %v1544_v40  ;;  %v1987_v44 = vmul.f32 %v2828_v25, %v1986_v23  ;;  %v1551_v0 = vmul.f32 %v2830_v8, %v4749_v63  ;;  %vm1991_vm12 = vmor %vm1989_vm9, %vm1990_vm10  ;;  %v4846_v57 = vpop.xlane.xlu0 %1124  ;;  %v5739_v23 = vld [vmem:[#allocation53_spill] sm:$0xff] }
 0x24b   : > { %2264 = vst [vmem:[%s4189_s10 + $0x140] sm:$0xff] %v2200_v32  ;;  %v2120_v61 = vmul.f32 %v5729_v46, %v1549_v58  ;;  %v1559_v31 = vand.u32 2147483647, %v4749_v63  ;;  %v1561_v4 = vand.u32 2147483648, %v4749_v63  ;;  %v1335_v47 = vand.u32 2147483647, %v4761_v2 }
 0x24c   : > { %v1988_v15 = vadd.f32 %v2828_v25, %v1987_v44  ;;  %v1552_v55 = vsub.f32 1.0, %v1551_v0  ;;  %2833 = vrcp.f32 %v4788_v33  ;;  %v1996_v20 = vor.u32 1.1754944e-38, %v1995_v27  ;;  %v5742_v44 = vld [vmem:[#allocation44_spill] sm:$0xff] }
 0x24d   : > { %v2184_v56 = vsel %vm3100_vm3, %v2120_v61, %v5732_v30  ;;  %vm1555_vm13 = vweird.f32 %v4749_v63  ;;  %2835 = vrcp.f32 %v4796_v48  ;;  %v2832_v54 = vpop.eup %2831  ;;  %vm1556_vm14 = vweird.f32 %v2830_v8 }
 0x24e   : > { %2248 = vst [vmem:[%s4189_s10 + $0xc0] sm:$0xff] %v2184_v56  ;;  %v1992_v26 = vsel %vm1991_vm12, %v2828_v25, %v1988_v15  ;;  %v1553_v18 = vmul.f32 %v2830_v8, %v1552_v55  ;;  %v1337_v11 = vand.u32 2147483648, %v4761_v2  ;;  %vm4822_vm15 = vcmp.eq.f32.partialorder %v1559_v31, 8.507059e+37  ;;  %vm1557_vm2 = vmor %vm1555_vm13, %vm1556_vm14  ;;  %v4868_v55 = vpop.xlane.xlu2 %1188  ;;  %v5745_v56 = vld [vmem:[#allocation49_spill] sm:$0xff] }
 0x24f   : > { %v1997_v28 = vsel %vm4800_vm11, %v1996_v20, %v1992_v26  ;;  %v1562_v16 = vor.u32 1.1754944e-38, %v1561_v4  ;;  %v1327_v35 = vmul.f32 %v2832_v54, %v4761_v2  ;;  %vm1331_vm0 = vweird.f32 %v4761_v2 }
 0x250   : > { %v2152_v43 = vmul.f32 %v5735_v45, %v1997_v28  ;;  %v1554_v25 = vadd.f32 %v2830_v8, %v1553_v18  ;;  %vm4829_vm1 = vcmp.eq.f32.partialorder %v1335_v47, 8.507059e+37  ;;  %v1783_v53 = vand.u32 2147483647, %v4788_v33  ;;  %v4876_v18 = vpop.xlane.xlu1 %1156 }
 0x251   : > { %v1328_v49 = vsub.f32 1.0, %v1327_v35  ;;  %v1785_v14 = vand.u32 2147483648, %v4788_v33  ;;  %2837 = vrcp.f32 %v4818_v21  ;;  %v1338_v52 = vor.u32 1.1754944e-38, %v1337_v11 }
 0x252   : > { %v2834_v7 = vpop.eup %2833  ;;  %v2216_v59 = vsel %vm3100_vm3, %v2152_v43, %v5738_v6  ;;  %v1558_v60 = vsel %vm1557_vm2, %v2830_v8, %v1554_v25  ;;  %v1349_v41 = vand.u32 2147483647, %v4796_v48  ;;  %vm1332_vm4 = vweird.f32 %v2832_v54 }
 0x253   : > { %v2836_v42 = vpop.eup %2835  ;;  %2280 = vst [vmem:[%s4189_s10 + $0x1c0] sm:$0xff] %v2216_v59  ;;  %v1563_v63 = vsel %vm4822_vm15, %v1562_v16, %v1558_v60  ;;  %v1329_v34 = vmul.f32 %v2832_v54, %v1328_v49  ;;  %v1775_v38 = vmul.f32 %v2834_v7, %v4788_v33  ;;  %vm1779_vm5 = vweird.f32 %v4788_v33  ;;  %vm1333_vm8 = vmor %vm1331_vm0, %vm1332_vm4  ;;  %v5746_v16 = vld [vmem:[#allocation41_spill] sm:$0xff]  ;;  %v4899_v59 = vpop.xlane.xlu0 %1094  ;;  %v5750_v60 = vld [vmem:[#allocation59_spill] sm:$0xff] }
 0x254   : > { %v2121_v40 = vmul.f32 %v5739_v23, %v1563_v63  ;;  %v1341_v8 = vmul.f32 %v2836_v42, %v4796_v48  ;;  %vm1345_vm6 = vweird.f32 %v4796_v48  ;;  %vm4852_vm7 = vcmp.eq.f32.partialorder %v1783_v53, 8.507059e+37  ;;  %v5747_v53 = vld [vmem:[#allocation54_spill] sm:$0xff] }
 0x255   : > { %v1330_v27 = vadd.f32 %v2832_v54, %v1329_v34  ;;  %v1776_v50 = vsub.f32 1.0, %v1775_v38  ;;  %v1786_v58 = vor.u32 1.1754944e-38, %v1785_v14  ;;  %vm4861_vm9 = vcmp.eq.f32.partialorder %v1349_v41, 8.507059e+37  ;;  %v5751_v34 = vld [vmem:[#allocation45_spill] sm:$0xff] }
 0x256   : > { %v2185_v0 = vsel %vm3100_vm3, %v2121_v40, %v5742_v44  ;;  %v1342_v46 = vsub.f32 1.0, %v1341_v8  ;;  %2839 = vrcp.f32 %v4846_v57  ;;  %vm1780_vm10 = vweird.f32 %v2834_v7 }
 0x257   : > { %v2838_v24 = vpop.eup %2837  ;;  %2249 = vst [vmem:[%s4189_s10 + $0xc8] sm:$0xff] %v2185_v0  ;;  %v1334_v31 = vsel %vm1333_vm8, %v2832_v54, %v1330_v27  ;;  %v1777_v4 = vmul.f32 %v2834_v7, %v1776_v50  ;;  %v1351_v15 = vand.u32 2147483648, %v4796_v48  ;;  %vm1346_vm11 = vweird.f32 %v2836_v42  ;;  %vm1781_vm13 = vmor %vm1779_vm5, %vm1780_vm10  ;;  %v5752_v27 = vld [vmem:[#allocation50_spill] sm:$0xff] }
 0x258   : > { %v1339_v2 = vsel %vm4829_vm1, %v1338_v52, %v1334_v31  ;;  %v1343_v47 = vmul.f32 %v2836_v42, %v1342_v46  ;;  %v1999_v30 = vmul.f32 %v2838_v24, %v4818_v21  ;;  %vm2003_vm12 = vweird.f32 %v4818_v21  ;;  %vm1347_vm14 = vmor %vm1345_vm6, %vm1346_vm11  ;;  %v4921_v46 = vpop.xlane.xlu2 %1158  ;;  %v5753_v31 = vld [vmem:[#allocation55_spill] sm:$0xff] }
 0x259   : > { %v2105_v20 = vmul.f32 %v5745_v56, %v1339_v2  ;;  %v1778_v26 = vadd.f32 %v2834_v7, %v1777_v4  ;;  %v2007_v54 = vand.u32 2147483647, %v4818_v21  ;;  %v2009_v10 = vand.u32 2147483648, %v4818_v21 }
 0x25a   : > { %v1344_v11 = vadd.f32 %v2836_v42, %v1343_v47  ;;  %v2000_v28 = vsub.f32 1.0, %v1999_v30  ;;  %2841 = vrcp.f32 %v4868_v55  ;;  %v1352_v43 = vor.u32 1.1754944e-38, %v1351_v15 }
 0x25b   : > { %v2169_v35 = vsel %vm3100_vm3, %v2105_v20, %v5746_v16  ;;  %v1782_v45 = vsel %vm1781_vm13, %v2834_v7, %v1778_v26  ;;  %vm2004_vm15 = vweird.f32 %v2838_v24  ;;  %2843 = vrcp.f32 %v4876_v18  ;;  %v5756_v20 = vld [vmem:[#allocation46_spill] sm:$0xff] }
 0x25c   : > { %v2840_v25 = vpop.eup %2839  ;;  %2233 = vst [vmem:[%s4189_s10 + $0x48] sm:$0xff] %v2169_v35  ;;  %v1787_v33 = vsel %vm4852_vm7, %v1786_v58, %v1782_v45  ;;  %v1348_v13 = vsel %vm1347_vm14, %v2836_v42, %v1344_v11  ;;  %v2001_v49 = vmul.f32 %v2838_v24, %v2000_v28  ;;  %vm4894_vm0 = vcmp.eq.f32.partialorder %v2007_v54, 8.507059e+37  ;;  %vm2005_vm1 = vmor %vm2003_vm12, %vm2004_vm15  ;;  %v4943_v35 = vpop.xlane.xlu1 %1126 }
 0x25d   : > { %v2137_v14 = vmul.f32 %v5747_v53, %v1787_v33  ;;  %v1353_v7 = vsel %vm4861_vm9, %v1352_v43, %v1348_v13  ;;  %v1565_v6 = vmul.f32 %v2840_v25, %v4846_v57  ;;  %v1573_v42 = vand.u32 2147483647, %v4846_v57  ;;  %v5759_v13 = vld [vmem:[#allocation60_spill] sm:$0xff] }
 0x25e   : > { %v2106_v52 = vmul.f32 %v5750_v60, %v1353_v7  ;;  %v2002_v41 = vadd.f32 %v2838_v24, %v2001_v49  ;;  %v1575_v63 = vand.u32 2147483648, %v4846_v57  ;;  %v2010_v23 = vor.u32 1.1754944e-38, %v2009_v10 }
 0x25f   : > { %v2201_v38 = vsel %vm3100_vm3, %v2137_v14, %v5751_v34  ;;  %v1566_v40 = vsub.f32 1.0, %v1565_v6  ;;  %vm1569_vm2 = vweird.f32 %v4846_v57  ;;  %v2021_v58 = vand.u32 2147483647, %v4868_v55  ;;  %v5762_v6 = vld [vmem:[#allocation51_spill] sm:$0xff] }
 0x260   : > { %v2842_v8 = vpop.eup %2841  ;;  %2265 = vst [vmem:[%s4189_s10 + $0x148] sm:$0xff] %v2201_v38  ;;  %v2170_v50 = vsel %vm3100_vm3, %v2106_v52, %v5752_v27  ;;  %v2006_v32 = vsel %vm2005_vm1, %v2838_v24, %v2002_v41  ;;  %2845 = vrcp.f32 %v4899_v59  ;;  %vm1570_vm4 = vweird.f32 %v2840_v25 }
 0x261   : > { %2234 = vst [vmem:[%s4189_s10 + $0x50] sm:$0xff] %v2170_v50  ;;  %v2011_v21 = vsel %vm4894_vm0, %v2010_v23, %v2006_v32  ;;  %v1567_v44 = vmul.f32 %v2840_v25, %v1566_v40  ;;  %v2013_v0 = vmul.f32 %v2842_v8, %v4868_v55  ;;  %v2844_v61 = vpop.eup %2843  ;;  %vm4924_vm5 = vcmp.eq.f32.partialorder %v1573_v42, 8.507059e+37  ;;  %vm1571_vm7 = vmor %vm1569_vm2, %vm1570_vm4  ;;  %v5763_v23 = vld [vmem:[#allocation67_spill] sm:$0xff] }
 0x262   : > { %v2153_v4 = vmul.f32 %v5753_v31, %v2011_v21  ;;  %v1576_v15 = vor.u32 1.1754944e-38, %v1575_v63  ;;  %v2023_v2 = vand.u32 2147483648, %v4868_v55  ;;  %vm2017_vm6 = vweird.f32 %v4868_v55  ;;  %v4962_v63 = vpop.xlane.xlu0 %1190  ;;  %v5767_v31 = vld [vmem:[#allocation61_spill] sm:$0xff] }
 0x263   : > { %v1568_v47 = vadd.f32 %v2840_v25, %v1567_v44  ;;  %v2014_v30 = vsub.f32 1.0, %v2013_v0  ;;  %v1789_v56 = vmul.f32 %v2844_v61, %v4876_v18  ;;  %vm4936_vm8 = vcmp.eq.f32.partialorder %v2021_v58, 8.507059e+37  ;;  %v5766_v44 = vld [vmem:[#allocation56_spill] sm:$0xff] }
 0x264   : > { %v2217_v26 = vsel %vm3100_vm3, %v2153_v4, %v5756_v20  ;;  %v1797_v11 = vand.u32 2147483647, %v4876_v18  ;;  %2847 = vrcp.f32 %v4921_v46  ;;  %vm2018_vm9 = vweird.f32 %v2842_v8 }
 0x265   : > { %2281 = vst [vmem:[%s4189_s10 + $0x1c8] sm:$0xff] %v2217_v26  ;;  %v1572_v28 = vsel %vm1571_vm7, %v2840_v25, %v1568_v47  ;;  %v2015_v10 = vmul.f32 %v2842_v8, %v2014_v30  ;;  %v1790_v16 = vsub.f32 1.0, %v1789_v56  ;;  %v2024_v43 = vor.u32 1.1754944e-38, %v2023_v2  ;;  %vm2019_vm11 = vmor %vm2017_vm6, %vm2018_vm9  ;;  %v4987_v47 = vpop.xlane.xlu2 %1128  ;;  %v5768_v30 = vld [vmem:[#allocation52_spill] sm:$0xff] }
 0x266   : > { %v2846_v45 = vpop.eup %2845  ;;  %v1577_v57 = vsel %vm4924_vm5, %v1576_v15, %v1572_v28  ;;  %vm1794_vm10 = vweird.f32 %v2844_v61  ;;  %v1799_v33 = vand.u32 2147483648, %v4876_v18  ;;  %vm1793_vm12 = vweird.f32 %v4876_v18 }
 0x267   : > { %v2122_v49 = vmul.f32 %v5759_v13, %v1577_v57  ;;  %v2016_v53 = vadd.f32 %v2842_v8, %v2015_v10  ;;  %v1791_v14 = vmul.f32 %v2844_v61, %v1790_v16  ;;  %v1355_v25 = vmul.f32 %v2846_v45, %v4899_v59  ;;  %vm1795_vm14 = vmor %vm1793_vm12, %vm1794_vm10  ;;  %v5002_v16 = vpop.xlane.xlu1 %1096  ;;  %v5771_v57 = vld [vmem:[#allocation66_spill] sm:$0xff] }
 0x268   : > { %vm4953_vm13 = vcmp.eq.f32.partialorder %v1797_v11, 8.507059e+37  ;;  %v1363_v48 = vand.u32 2147483647, %v4899_v59  ;;  %2849 = vrcp.f32 %v4943_v35  ;;  %v1800_v34 = vor.u32 1.1754944e-38, %v1799_v33 }
 0x269   : > { %v2186_v60 = vsel %vm3100_vm3, %v2122_v49, %v5762_v6  ;;  %v2020_v52 = vsel %vm2019_vm11, %v2842_v8, %v2016_v53  ;;  %v1792_v41 = vadd.f32 %v2844_v61, %v1791_v14  ;;  %v1356_v42 = vsub.f32 1.0, %v1355_v25  ;;  %v5772_v53 = vld [vmem:[#allocation57_spill] sm:$0xff] }
 0x26a   : > { %v2848_v55 = vpop.eup %2847  ;;  %2250 = vst [vmem:[%s4189_s10 + $0xd0] sm:$0xff] %v2186_v60  ;;  %v2025_v18 = vsel %vm4936_vm8, %v2024_v43, %v2020_v52  ;;  %vm1360_vm15 = vweird.f32 %v2846_v45  ;;  %v1365_v38 = vand.u32 2147483648, %v4899_v59  ;;  %vm1359_vm0 = vweird.f32 %v4899_v59 }
 0x26b   : > { %v2154_v40 = vmul.f32 %v5763_v23, %v2025_v18  ;;  %v1796_v27 = vsel %vm1795_vm14, %v2844_v61, %v1792_v41  ;;  %v1357_v8 = vmul.f32 %v2846_v45, %v1356_v42  ;;  %v1803_v50 = vmul.f32 %v2848_v55, %v4921_v46  ;;  %vm1361_vm2 = vmor %vm1359_vm0, %vm1360_vm15  ;;  %v5775_v42 = vld [vmem:[#allocation72_spill] sm:$0xff] }
 0x26c   : > { %v1801_v32 = vsel %vm4953_vm13, %v1800_v34, %v1796_v27  ;;  %vm4974_vm1 = vcmp.eq.f32.partialorder %v1363_v48, 8.507059e+37  ;;  %v1811_v21 = vand.u32 2147483647, %v4921_v46  ;;  %v1366_v59 = vor.u32 1.1754944e-38, %v1365_v38  ;;  %v5013_v48 = vpop.xlane.xlu0 %1160  ;;  %v5776_v27 = vld [vmem:[#allocation63_spill] sm:$0xff] }
 0x26d   : > { %v2218_v0 = vsel %vm3100_vm3, %v2154_v40, %v5766_v44  ;;  %v2138_v61 = vmul.f32 %v5767_v31, %v1801_v32  ;;  %v1358_v4 = vadd.f32 %v2846_v45, %v1357_v8  ;;  %v1804_v24 = vsub.f32 1.0, %v1803_v50  ;;  %v5043_v31 = vpop.xlane.xlu2 %1098 }
 0x26e   : > { %v2850_v15 = vpop.eup %2849  ;;  %2282 = vst [vmem:[%s4189_s10 + $0x1d0] sm:$0xff] %v2218_v0  ;;  %vm1808_vm4 = vweird.f32 %v2848_v55  ;;  %v1813_v2 = vand.u32 2147483648, %v4921_v46  ;;  %2851 = vrcp.f32 %v4962_v63  ;;  %vm1807_vm5 = vweird.f32 %v4921_v46 }
 0x26f   : > { %v2202_v56 = vsel %vm3100_vm3, %v2138_v61, %v5768_v30  ;;  %v1362_v20 = vsel %vm1361_vm2, %v2846_v45, %v1358_v4  ;;  %v1805_v26 = vmul.f32 %v2848_v55, %v1804_v24  ;;  %v1579_v54 = vmul.f32 %v2850_v15, %v4943_v35  ;;  %vm1809_vm7 = vmor %vm1807_vm5, %vm1808_vm4  ;;  %v5779_v4 = vld [vmem:[#allocation65_spill] sm:$0xff] }
 0x270   : > { %2266 = vst [vmem:[%s4189_s10 + $0x150] sm:$0xff] %v2202_v56  ;;  %v1367_v11 = vsel %vm4974_vm1, %v1366_v59, %v1362_v20  ;;  %vm4997_vm6 = vcmp.eq.f32.partialorder %v1811_v21, 8.507059e+37  ;;  %v1587_v10 = vand.u32 2147483647, %v4943_v35  ;;  %2853 = vrcp.f32 %v4987_v47  ;;  %v5782_v20 = vld [vmem:[#allocation58_spill] sm:$0xff] }
 0x271   : > { %v2107_v45 = vmul.f32 %v5771_v57, %v1367_v11  ;;  %v1806_v43 = vadd.f32 %v2848_v55, %v1805_v26  ;;  %v1580_v33 = vsub.f32 1.0, %v1579_v54  ;;  %v1814_v13 = vor.u32 1.1754944e-38, %v1813_v2 }
 0x272   : > { %vm1584_vm8 = vweird.f32 %v2850_v15  ;;  %v1589_v46 = vand.u32 2147483648, %v4943_v35  ;;  %v2035_v49 = vand.u32 2147483647, %v4962_v63  ;;  %2855 = vrcp.f32 %v5002_v16 }
 0x273   : > { %v2171_v14 = vsel %vm3100_vm3, %v2107_v45, %v5772_v53  ;;  %v1810_v25 = vsel %vm1809_vm7, %v2848_v55, %v1806_v43  ;;  %v1581_v7 = vmul.f32 %v2850_v15, %v1580_v33  ;;  %vm1583_vm9 = vweird.f32 %v4943_v35  ;;  %v5061_v43 = vpop.xlane.xlu1 %1192 }
 0x274   : > { %v2852_v6 = vpop.eup %2851  ;;  %2235 = vst [vmem:[%s4189_s10 + $0x58] sm:$0xff] %v2171_v14  ;;  %v1815_v60 = vsel %vm4997_vm6, %v1814_v13, %v1810_v25  ;;  %vm5019_vm10 = vcmp.eq.f32.partialorder %v1587_v10, 8.507059e+37  ;;  %v2037_v41 = vand.u32 2147483648, %v4962_v63  ;;  %v1601_v38 = vand.u32 2147483647, %v4987_v47  ;;  %vm1585_vm11 = vmor %vm1583_vm9, %vm1584_vm8  ;;  %v5783_v14 = vld [vmem:[#allocation71_spill] sm:$0xff] }
 0x275   : > { %v2139_v55 = vmul.f32 %v5775_v42, %v1815_v60  ;;  %v1582_v18 = vadd.f32 %v2850_v15, %v1581_v7  ;;  %v2027_v34 = vmul.f32 %v2852_v6, %v4962_v63  ;;  %v1590_v23 = vor.u32 1.1754944e-38, %v1589_v46  ;;  %v5073_v42 = vpop.xlane.xlu0 %1130 }
 0x276   : > { %vm2031_vm12 = vweird.f32 %v4962_v63  ;;  %v1603_v35 = vand.u32 2147483648, %v4987_v47  ;;  %2857 = vrcp.f32 %v5013_v48  ;;  %v2854_v40 = vpop.eup %2853  ;;  %vm5034_vm13 = vcmp.eq.f32.partialorder %v2035_v49, 8.507059e+37 }
 0x277   : > { %v2203_v8 = vsel %vm3100_vm3, %v2139_v55, %v5776_v27  ;;  %v1586_v50 = vsel %vm1585_vm11, %v2850_v15, %v1582_v18  ;;  %v2028_v32 = vsub.f32 1.0, %v2027_v34  ;;  %v2038_v44 = vor.u32 1.1754944e-38, %v2037_v41  ;;  %v5784_v18 = vld [vmem:[#allocation64_spill] sm:$0xff]  ;;  %v5799_v27 = vld [vmem:[#allocation74_spill] sm:$0xff] }
 0x278   : > { %2267 = vst [vmem:[%s4189_s10 + $0x158] sm:$0xff] %v2203_v8  ;;  %v1591_v21 = vsel %vm5019_vm10, %v1590_v23, %v1586_v50  ;;  %v1593_v0 = vmul.f32 %v2854_v40, %v4987_v47  ;;  %vm1597_vm14 = vweird.f32 %v4987_v47  ;;  %v2856_v61 = vpop.eup %2855  ;;  %vm2032_vm15 = vweird.f32 %v2852_v6  ;;  %v5785_v23 = vld [vmem:[#allocation78_spill] sm:$0xff] }
 0x279   : > { %v2123_v24 = vmul.f32 %v5779_v4, %v1591_v21  ;;  %v2029_v15 = vmul.f32 %v2852_v6, %v2028_v32  ;;  %vm5046_vm0 = vcmp.eq.f32.partialorder %v1601_v38, 8.507059e+37  ;;  %v1604_v30 = vor.u32 1.1754944e-38, %v1603_v35  ;;  %vm2033_vm2 = vmor %vm2031_vm12, %vm2032_vm15 }
 0x27a   : > { %v1594_v2 = vsub.f32 1.0, %v1593_v0  ;;  %v1369_v56 = vmul.f32 %v2856_v61, %v5002_v16  ;;  %vm1373_vm1 = vweird.f32 %v5002_v16  ;;  %v1377_v11 = vand.u32 2147483647, %v5002_v16  ;;  %v5789_v0 = vld [vmem:[#allocation73_spill] sm:$0xff] }
 0x27b   : > { %v2187_v26 = vsel %vm3100_vm3, %v2123_v24, %v5782_v20  ;;  %v2030_v54 = vadd.f32 %v2852_v6, %v2029_v15  ;;  %2859 = vrcp.f32 %v5043_v31  ;;  %vm1598_vm4 = vweird.f32 %v2854_v40 }
 0x27c   : > { %v2858_v28 = vpop.eup %2857  ;;  %2251 = vst [vmem:[%s4189_s10 + $0xd8] sm:$0xff] %v2187_v26  ;;  %v1595_v10 = vmul.f32 %v2854_v40, %v1594_v2  ;;  %v1370_v57 = vsub.f32 1.0, %v1369_v56  ;;  %v1379_v45 = vand.u32 2147483648, %v5002_v16  ;;  %vm1821_vm5 = vweird.f32 %v5013_v48  ;;  %vm1599_vm7 = vmor %vm1597_vm14, %vm1598_vm4  ;;  %v5788_v16 = vld [vmem:[#allocation68_spill] sm:$0xff]  ;;  %v5100_v2 = vpop.xlane.xlu2 %1164 }
 0x27d   : > { %v2034_v33 = vsel %vm2033_vm2, %v2852_v6, %v2030_v54  ;;  %v1817_v13 = vmul.f32 %v2858_v28, %v5013_v48  ;;  %v1825_v46 = vand.u32 2147483647, %v5013_v48  ;;  %vm1374_vm6 = vweird.f32 %v2856_v61  ;;  %v5108_v54 = vpop.xlane.xlu1 %1162 }
 0x27e   : > { %v2039_v49 = vsel %vm5034_vm13, %v2038_v44, %v2034_v33  ;;  %v1596_v53 = vadd.f32 %v2854_v40, %v1595_v10  ;;  %v1371_v63 = vmul.f32 %v2856_v61, %v1370_v57  ;;  %v1827_v6 = vand.u32 2147483648, %v5013_v48  ;;  %vm1375_vm9 = vmor %vm1373_vm1, %vm1374_vm6 }
 0x27f   : > { %v2155_v25 = vmul.f32 %v5783_v14, %v2039_v49  ;;  %v1818_v7 = vsub.f32 1.0, %v1817_v13  ;;  %2861 = vrcp.f32 %v5061_v43  ;;  %vm1378_vm8 = vcmp.eq.f32.partialorder %v1377_v11, 8.507059e+37  ;;  %v5791_v11 = vld [vmem:[#allocation77_spill] sm:$0xff] }
 0x280   : > { %v1600_v60 = vsel %vm1599_vm7, %v2854_v40, %v1596_v53  ;;  %v1372_v52 = vadd.f32 %v2856_v61, %v1371_v63  ;;  %v1380_v41 = vor.u32 1.1754944e-38, %v1379_v45  ;;  %vm1822_vm10 = vweird.f32 %v2858_v28  ;;  %v5794_v49 = vld [vmem:[#allocation69_spill] sm:$0xff] }
 0x281   : > { %v2860_v55 = vpop.eup %2859  ;;  %v2219_v34 = vsel %vm3100_vm3, %v2155_v25, %v5784_v18  ;;  %v1605_v47 = vsel %vm5046_vm0, %v1604_v30, %v1600_v60  ;;  %v1819_v38 = vmul.f32 %v2858_v28, %v1818_v7  ;;  %vm5084_vm11 = vcmp.eq.f32.partialorder %v1825_v46, 8.507059e+37  ;;  %vm1823_vm12 = vmor %vm1821_vm5, %vm1822_vm10  ;;  %v5790_v30 = vld [vmem:[#allocation62_spill] sm:$0xff]  ;;  %v5130_v60 = vpop.xlane.xlu0 %1100 }
 0x282   : > { %2283 = vst [vmem:[%s4189_s10 + $0x1d8] sm:$0xff] %v2219_v34  ;;  %v2124_v35 = vmul.f32 %v5785_v23, %v1605_v47  ;;  %v1376_v40 = vsel %vm1375_vm9, %v2856_v61, %v1372_v52  ;;  %v1383_v8 = vmul.f32 %v2860_v55, %v5043_v31  ;;  %v1828_v58 = vor.u32 1.1754944e-38, %v1827_v6 }
 0x283   : > { %v1381_v50 = vsel %vm1378_vm8, %v1380_v41, %v1376_v40  ;;  %v1820_v32 = vadd.f32 %v2858_v28, %v1819_v38  ;;  %v1391_v21 = vand.u32 2147483647, %v5043_v31  ;;  %2863 = vrcp.f32 %v5073_v42 }
 0x284   : > { %v2188_v44 = vsel %vm3100_vm3, %v2124_v35, %v5788_v16  ;;  %v2108_v4 = vmul.f32 %v5789_v0, %v1381_v50  ;;  %v1384_v61 = vsub.f32 1.0, %v1383_v8  ;;  %vm1387_vm13 = vweird.f32 %v5043_v31 }
 0x285   : > { %v2862_v24 = vpop.eup %2861  ;;  %2252 = vst [vmem:[%s4189_s10 + $0xe0] sm:$0xff] %v2188_v44  ;;  %v1824_v15 = vsel %vm1823_vm12, %v2858_v28, %v1820_v32  ;;  %vm1388_vm14 = vweird.f32 %v2860_v55  ;;  %v1393_v59 = vand.u32 2147483648, %v5043_v31  ;;  %vm5112_vm15 = vcmp.eq.f32.partialorder %v1391_v21, 8.507059e+37  ;;  %v5158_v44 = vpop.xlane.xlu2 %1134 }
 0x286   : > { %v2172_v56 = vsel %vm3100_vm3, %v2108_v4, %v5790_v30  ;;  %v1829_v48 = vsel %vm5084_vm11, %v1828_v58, %v1824_v15  ;;  %v1385_v20 = vmul.f32 %v2860_v55, %v1384_v61  ;;  %v2041_v26 = vmul.f32 %v2862_v24, %v5061_v43  ;;  %vm1389_vm0 = vmor %vm1387_vm13, %vm1388_vm14  ;;  %v5802_v30 = vld [vmem:[#allocation70_spill] sm:$0xff]  ;;  %v5180_v10 = vpop.xlane.xlu1 %1132 }
 0x287   : > { %2236 = vst [vmem:[%s4189_s10 + $0x60] sm:$0xff] %v2172_v56  ;;  %v2140_v28 = vmul.f32 %v5791_v11, %v1829_v48  ;;  %v2049_v57 = vand.u32 2147483647, %v5061_v43  ;;  %v2051_v45 = vand.u32 2147483648, %v5061_v43  ;;  %v1615_v46 = vand.u32 2147483647, %v5073_v42 }
 0x288   : > { %v1386_v33 = vadd.f32 %v2860_v55, %v1385_v20  ;;  %v2042_v13 = vsub.f32 1.0, %v2041_v26  ;;  %2865 = vrcp.f32 %v5100_v2  ;;  %v1394_v63 = vor.u32 1.1754944e-38, %v1393_v59  ;;  %v5812_v48 = vld [vmem:[#allocation80_spill] sm:$0xff] }
 0x289   : > { %v2204_v53 = vsel %vm3100_vm3, %v2140_v28, %v5794_v49  ;;  %vm2045_vm1 = vweird.f32 %v5061_v43  ;;  %2867 = vrcp.f32 %v5108_v54  ;;  %v2864_v14 = vpop.eup %2863  ;;  %vm2046_vm2 = vweird.f32 %v2862_v24  ;;  %v5188_v49 = vpop.xlane.xlu0 %1166 }
 0x28a   : > { %2268 = vst [vmem:[%s4189_s10 + $0x160] sm:$0xff] %v2204_v53  ;;  %v1390_v25 = vsel %vm1389_vm0, %v2860_v55, %v1386_v33  ;;  %v2043_v7 = vmul.f32 %v2862_v24, %v2042_v13  ;;  %v1617_v6 = vand.u32 2147483648, %v5073_v42  ;;  %vm5134_vm4 = vcmp.eq.f32.partialorder %v2049_v57, 8.507059e+37  ;;  %vm2047_vm7 = vmor %vm2045_vm1, %vm2046_vm2 }
 0x28b   : > { %v1395_v52 = vsel %vm5112_vm15, %v1394_v63, %v1390_v25  ;;  %v2052_v41 = vor.u32 1.1754944e-38, %v2051_v45  ;;  %v1607_v18 = vmul.f32 %v2864_v14, %v5073_v42  ;;  %vm1611_vm5 = vweird.f32 %v5073_v42  ;;  %v5805_v25 = vld [vmem:[#allocation75_spill] sm:$0xff] }
 0x28c   : > { %v2109_v34 = vmul.f32 %v4069_v19, %v1395_v52  ;;  %v2044_v55 = vadd.f32 %v2862_v24, %v2043_v7  ;;  %vm5141_vm6 = vcmp.eq.f32.partialorder %v1615_v46, 8.507059e+37  ;;  %v1853_v23 = vand.u32 2147483647, %v5100_v2 }
 0x28d   : > { %v1608_v38 = vsub.f32 1.0, %v1607_v18  ;;  %v1855_v35 = vand.u32 2147483648, %v5100_v2  ;;  %2869 = vrcp.f32 %v5130_v60  ;;  %v1618_v50 = vor.u32 1.1754944e-38, %v1617_v6  ;;  %v5211_v47 = vpop.xlane.xlu2 %1194 }
 0x28e   : > { %v2866_v40 = vpop.eup %2865  ;;  %v2173_v19 = vsel %vm3100_vm3, %v2109_v34, %v5799_v27  ;;  %v2048_v8 = vsel %vm2047_vm7, %v2862_v24, %v2044_v55  ;;  %v1839_v32 = vand.u32 2147483647, %v5108_v54  ;;  %vm1612_vm8 = vweird.f32 %v2864_v14 }
 0x28f   : > { %v2868_v58 = vpop.eup %2867  ;;  %2237 = vst [vmem:[%s4189_s10 + $0x68] sm:$0xff] %v2173_v19  ;;  %v2053_v43 = vsel %vm5134_vm4, %v2052_v41, %v2048_v8  ;;  %v1609_v21 = vmul.f32 %v2864_v14, %v1608_v38  ;;  %v1845_v16 = vmul.f32 %v2866_v40, %v5100_v2  ;;  %vm1849_vm9 = vweird.f32 %v5100_v2  ;;  %vm1613_vm12 = vmor %vm1611_vm5, %vm1612_vm8 }
 0x290   : > { %v2156_v0 = vmul.f32 %v4062_v3, %v2053_v43  ;;  %v1831_v4 = vmul.f32 %v2868_v58, %v5108_v54  ;;  %vm1835_vm10 = vweird.f32 %v5108_v54  ;;  %vm5164_vm11 = vcmp.eq.f32.partialorder %v1853_v23, 8.507059e+37 }
 0x291   : > { %v1610_v61 = vadd.f32 %v2864_v14, %v1609_v21  ;;  %v1846_v24 = vsub.f32 1.0, %v1845_v16  ;;  %v1856_v59 = vor.u32 1.1754944e-38, %v1855_v35  ;;  %vm5173_vm13 = vcmp.eq.f32.partialorder %v1839_v32, 8.507059e+37 }
 0x292   : > { %v2220_v56 = vsel %vm3100_vm3, %v2156_v0, %v5802_v30  ;;  %v1832_v3 = vsub.f32 1.0, %v1831_v4  ;;  %2871 = vrcp.f32 %v5158_v44  ;;  %vm1850_vm14 = vweird.f32 %v2866_v40  ;;  %v5233_v4 = vpop.xlane.xlu1 %1102 }
 0x293   : > { %v2870_v20 = vpop.eup %2869  ;;  %2284 = vst [vmem:[%s4189_s10 + $0x1e0] sm:$0xff] %v2220_v56  ;;  %v1614_v26 = vsel %vm1613_vm12, %v2864_v14, %v1610_v61  ;;  %v1847_v11 = vmul.f32 %v2866_v40, %v1846_v24  ;;  %v1841_v28 = vand.u32 2147483648, %v5108_v54  ;;  %vm1836_vm15 = vweird.f32 %v2868_v58  ;;  %vm1851_vm1 = vmor %vm1849_vm9, %vm1850_vm14 }
 0x294   : > { %v1619_v42 = vsel %vm5141_vm6, %v1618_v50, %v1614_v26  ;;  %v1833_v57 = vmul.f32 %v2868_v58, %v1832_v3  ;;  %v1397_v45 = vmul.f32 %v2870_v20, %v5130_v60  ;;  %vm1401_vm0 = vweird.f32 %v5130_v60  ;;  %vm1837_vm2 = vmor %vm1835_vm10, %vm1836_vm15 }
 0x295   : > { %v2125_v33 = vmul.f32 %v4066_v17, %v1619_v42  ;;  %v1848_v13 = vadd.f32 %v2866_v40, %v1847_v11  ;;  %v1405_v46 = vand.u32 2147483647, %v5130_v60  ;;  %v1407_v14 = vand.u32 2147483648, %v5130_v60  ;;  %v5252_v42 = vpop.xlane.xlu0 %1196 }
 0x296   : > { %v1834_v53 = vadd.f32 %v2868_v58, %v1833_v57  ;;  %v1398_v63 = vsub.f32 1.0, %v1397_v45  ;;  %2873 = vrcp.f32 %v5180_v10  ;;  %v1842_v6 = vor.u32 1.1754944e-38, %v1841_v28 }
 0x297   : > { %v2189_v17 = vsel %vm3100_vm3, %v2125_v33, %v5805_v25  ;;  %v1852_v7 = vsel %vm1851_vm1, %v2866_v40, %v1848_v13  ;;  %vm1402_vm4 = vweird.f32 %v2870_v20  ;;  %2875 = vrcp.f32 %v5188_v49 }
 0x298   : > { %v2872_v52 = vpop.eup %2871  ;;  %2253 = vst [vmem:[%s4189_s10 + $0xe8] sm:$0xff] %v2189_v17  ;;  %v1857_v2 = vsel %vm5164_vm11, %v1856_v59, %v1852_v7  ;;  %v1838_v31 = vsel %vm1837_vm2, %v2868_v58, %v1834_v53  ;;  %v1399_v41 = vmul.f32 %v2870_v20, %v1398_v63  ;;  %vm5206_vm5 = vcmp.eq.f32.partialorder %v1405_v46, 8.507059e+37  ;;  %vm1403_vm6 = vmor %vm1401_vm0, %vm1402_vm4  ;;  %v5815_v7 = vld [vmem:[#allocation92_spill] sm:$0xff] }
 0x299   : > { %v2142_v18 = vmul.f32 %v4093_v62, %v1857_v2  ;;  %v1843_v34 = vsel %vm5173_vm13, %v1842_v6, %v1838_v31  ;;  %v1635_v55 = vmul.f32 %v2872_v52, %v5158_v44  ;;  %v1643_v35 = vand.u32 2147483647, %v5158_v44  ;;  %v5808_v62 = vld [vmem:[#allocation86_spill] sm:$0xff] }
 0x29a   : > { %v2141_v38 = vmul.f32 %v4075_v12, %v1843_v34  ;;  %v1400_v23 = vadd.f32 %v2870_v20, %v1399_v41  ;;  %v1645_v40 = vand.u32 2147483648, %v5158_v44  ;;  %v1408_v19 = vor.u32 1.1754944e-38, %v1407_v14  ;;  %v5809_v12 = vld [vmem:[#allocation76_spill] sm:$0xff] }
 0x29b   : > { %v2206_v27 = vsel %vm3100_vm3, %v2142_v18, %v5808_v62  ;;  %v1636_v8 = vsub.f32 1.0, %v1635_v55  ;;  %v1629_v50 = vand.u32 2147483647, %v5180_v10  ;;  %v1631_v21 = vand.u32 2147483648, %v5180_v10  ;;  %v5275_v55 = vpop.xlane.xlu1 %1198 }
 0x29c   : > { %v2874_v32 = vpop.eup %2873  ;;  %2270 = vst [vmem:[%s4189_s10 + $0x170] sm:$0xff] %v2206_v27  ;;  %v2205_v58 = vsel %vm3100_vm3, %v2141_v38, %v5809_v12  ;;  %v1404_v43 = vsel %vm1403_vm6, %v2870_v20, %v1400_v23  ;;  %2877 = vrcp.f32 %v5211_v47  ;;  %vm1640_vm7 = vweird.f32 %v2872_v52 }
 0x29d   : > { %2269 = vst [vmem:[%s4189_s10 + $0x168] sm:$0xff] %v2205_v58  ;;  %v1409_v60 = vsel %vm5206_vm5, %v1408_v19, %v1404_v43  ;;  %v1637_v16 = vmul.f32 %v2872_v52, %v1636_v8  ;;  %v1621_v0 = vmul.f32 %v2874_v32, %v5180_v10  ;;  %v2876_v61 = vpop.eup %2875  ;;  %vm1639_vm8 = vweird.f32 %v5158_v44 }
 0x29e   : > { %v2110_v24 = vmul.f32 %v4080_v1, %v1409_v60  ;;  %vm5237_vm9 = vcmp.eq.f32.partialorder %v1643_v35, 8.507059e+37  ;;  %v1646_v59 = vor.u32 1.1754944e-38, %v1645_v40  ;;  %vm1625_vm10 = vweird.f32 %v5180_v10  ;;  %vm1641_vm11 = vmor %vm1639_vm8, %vm1640_vm7  ;;  %v5818_v40 = vld [vmem:[#allocation81_spill] sm:$0xff] }
 0x29f   : > { %v1638_v30 = vadd.f32 %v2872_v52, %v1637_v16  ;;  %v1622_v56 = vsub.f32 1.0, %v1621_v0  ;;  %v1859_v3 = vmul.f32 %v2876_v61, %v5188_v49  ;;  %vm5246_vm12 = vcmp.eq.f32.partialorder %v1629_v50, 8.507059e+37 }
 0x2a0   : > { %v2174_v20 = vsel %vm3100_vm3, %v2110_v24, %v5812_v48  ;;  %v1632_v44 = vor.u32 1.1754944e-38, %v1631_v21  ;;  %2879 = vrcp.f32 %v5233_v4  ;;  %vm1626_vm13 = vweird.f32 %v2874_v32 }
 0x2a1   : > { %2238 = vst [vmem:[%s4189_s10 + $0x70] sm:$0xff] %v2174_v20  ;;  %v1642_v26 = vsel %vm1641_vm11, %v2872_v52, %v1638_v30  ;;  %v1623_v11 = vmul.f32 %v2874_v32, %v1622_v56  ;;  %v1860_v28 = vsub.f32 1.0, %v1859_v3  ;;  %vm1864_vm14 = vweird.f32 %v2876_v61  ;;  %vm1627_vm15 = vmor %vm1625_vm10, %vm1626_vm13 }
 0x2a2   : > { %v2878_v57 = vpop.eup %2877  ;;  %v1647_v45 = vsel %vm5237_vm9, %v1646_v59, %v1642_v26  ;;  %v1867_v33 = vand.u32 2147483647, %v5188_v49  ;;  %v1869_v13 = vand.u32 2147483648, %v5188_v49  ;;  %vm1863_vm0 = vweird.f32 %v5188_v49  ;;  %v5820_v59 = vld [vmem:[#allocation82_spill] sm:$0xff]  ;;  %v5821_v26 = vld [vmem:[#allocation88_spill] sm:$0xff] }
 0x2a3   : > { %v2127_v46 = vmul.f32 %v4126_v37, %v1647_v45  ;;  %v1624_v53 = vadd.f32 %v2874_v32, %v1623_v11  ;;  %v1861_v63 = vmul.f32 %v2876_v61, %v1860_v28  ;;  %v2055_v14 = vmul.f32 %v2878_v57, %v5211_v47  ;;  %vm1865_vm1 = vmor %vm1863_vm0, %vm1864_vm14 }
 0x2a4   : > { %v2063_v25 = vand.u32 2147483647, %v5211_v47  ;;  %v2065_v17 = vand.u32 2147483648, %v5211_v47  ;;  %2881 = vrcp.f32 %v5252_v42  ;;  %vm1868_vm2 = vcmp.eq.f32.partialorder %v1867_v33, 8.507059e+37 }
 0x2a5   : > { %v2191_v6 = vsel %vm3100_vm3, %v2127_v46, %v5815_v7  ;;  %v1628_v37 = vsel %vm1627_vm15, %v2874_v32, %v1624_v53  ;;  %v1862_v52 = vadd.f32 %v2876_v61, %v1861_v63  ;;  %v2056_v2 = vsub.f32 1.0, %v2055_v14  ;;  %v5819_v32 = vld [vmem:[#allocation93_spill] sm:$0xff]  ;;  %v5822_v46 = vld [vmem:[#allocation87_spill] sm:$0xff]  ;;  %v5823_v7 = vld [vmem:[#allocation94_spill] sm:$0xff] }
 0x2a6   : > { %v2880_v31 = vpop.eup %2879  ;;  %2255 = vst [vmem:[%s4189_s10 + $0xf8] sm:$0xff] %v2191_v6  ;;  %v1633_v10 = vsel %vm5246_vm12, %v1632_v44, %v1628_v37  ;;  %v1870_v49 = vor.u32 1.1754944e-38, %v1869_v13  ;;  %vm2060_vm4 = vweird.f32 %v2878_v57  ;;  %vm2059_vm5 = vweird.f32 %v5211_v47 }
 0x2a7   : > { %v2126_v41 = vmul.f32 %v4086_v29, %v1633_v10  ;;  %v1866_v18 = vsel %vm1865_vm1, %v2876_v61, %v1862_v52  ;;  %v2057_v34 = vmul.f32 %v2878_v57, %v2056_v2  ;;  %v1411_v54 = vmul.f32 %v2880_v31, %v5233_v4  ;;  %vm2061_vm7 = vmor %vm2059_vm5, %vm2060_vm4 }
 0x2a8   : > { %v1871_v38 = vsel %vm1868_vm2, %v1870_v49, %v1866_v18  ;;  %vm5278_vm6 = vcmp.eq.f32.partialorder %v2063_v25, 8.507059e+37  ;;  %v2066_v35 = vor.u32 1.1754944e-38, %v2065_v17  ;;  %vm1416_vm8 = vweird.f32 %v2880_v31 }
 0x2a9   : > { %v2190_v62 = vsel %vm3100_vm3, %v2126_v41, %v5818_v40  ;;  %v2143_v29 = vmul.f32 %v4121_v5, %v1871_v38  ;;  %v2058_v27 = vadd.f32 %v2878_v57, %v2057_v34  ;;  %v1412_v19 = vsub.f32 1.0, %v1411_v54 }
 0x2aa   : > { %v2882_v8 = vpop.eup %2881  ;;  %2254 = vst [vmem:[%s4189_s10 + $0xf0] sm:$0xff] %v2190_v62  ;;  %v1419_v47 = vand.u32 2147483647, %v5233_v4  ;;  %v1421_v50 = vand.u32 2147483648, %v5233_v4  ;;  %2883 = vrcp.f32 %v5275_v55  ;;  %vm1415_vm9 = vweird.f32 %v5233_v4 }
 0x2ab   : > { %v2207_v12 = vsel %vm3100_vm3, %v2143_v29, %v5819_v32  ;;  %v2062_v58 = vsel %vm2061_vm7, %v2878_v57, %v2058_v27  ;;  %v1413_v43 = vmul.f32 %v2880_v31, %v1412_v19  ;;  %v2069_v5 = vmul.f32 %v2882_v8, %v5252_v42  ;;  %vm1417_vm10 = vmor %vm1415_vm9, %vm1416_vm8 }
 0x2ac   : > { %2271 = vst [vmem:[%s4189_s10 + $0x178] sm:$0xff] %v2207_v12  ;;  %v2067_v21 = vsel %vm5278_vm6, %v2066_v35, %v2062_v58  ;;  %vm1420_vm11 = vcmp.eq.f32.partialorder %v1419_v47, 8.507059e+37  ;;  %v1422_v61 = vor.u32 1.1754944e-38, %v1421_v50  ;;  %v2077_v24 = vand.u32 2147483647, %v5252_v42 }
 0x2ad   : > { %v2157_v60 = vmul.f32 %v4083_v36, %v2067_v21  ;;  %v1414_v16 = vadd.f32 %v2880_v31, %v1413_v43  ;;  %v2070_v0 = vsub.f32 1.0, %v2069_v5  ;;  %v2079_v15 = vand.u32 2147483648, %v5252_v42 }
 0x2ae   : > { %vm2074_vm12 = vweird.f32 %v2882_v8  ;;  %vm2073_vm13 = vweird.f32 %v5252_v42  ;;  %vm2078_vm15 = vcmp.eq.f32.partialorder %v2077_v24, 8.507059e+37  ;;  %v2091_v13 = vand.u32 2147483647, %v5275_v55 }
 0x2af   : > { %v2221_v30 = vsel %vm3100_vm3, %v2157_v60, %v5820_v59  ;;  %v1418_v56 = vsel %vm1417_vm10, %v2880_v31, %v1414_v16  ;;  %v2071_v3 = vmul.f32 %v2882_v8, %v2070_v0  ;;  %vm2075_vm14 = vmor %vm2073_vm13, %vm2074_vm12  ;;  %v2080_v44 = vor.u32 1.1754944e-38, %v2079_v15 }
 0x2b0   : > { %v2884_v36 = vpop.eup %2883  ;;  %2285 = vst [vmem:[%s4189_s10 + $0x1e8] sm:$0xff] %v2221_v30  ;;  %v1423_v4 = vsel %vm1420_vm11, %v1422_v61, %v1418_v56  ;;  %vm2087_vm1 = vweird.f32 %v5275_v55  ;;  %vm2092_vm4 = vcmp.eq.f32.partialorder %v2091_v13, 8.507059e+37 }
 0x2b1   : > { %v2111_v48 = vmul.f32 %v4115_v51, %v1423_v4  ;;  %v2072_v20 = vadd.f32 %v2882_v8, %v2071_v3  ;;  %v2083_v1 = vmul.f32 %v2884_v36, %v5275_v55  ;;  %v2093_v51 = vand.u32 2147483648, %v5275_v55 }
 0x2b2   : > { %vm2088_vm0 = vweird.f32 %v2884_v36 }
 0x2b3   : > { %v2175_v11 = vsel %vm3100_vm3, %v2111_v48, %v5821_v26  ;;  %v2076_v28 = vsel %vm2075_vm14, %v2882_v8, %v2072_v20  ;;  %v2084_v57 = vsub.f32 1.0, %v2083_v1  ;;  %vm2089_vm2 = vmor %vm2087_vm1, %vm2088_vm0 }
 0x2b4   : > { %2239 = vst [vmem:[%s4189_s10 + $0x78] sm:$0xff] %v2175_v11  ;;  %v2081_v45 = vsel %vm2078_vm15, %v2080_v44, %v2076_v28 }
 0x2b5   : > { %v2158_v42 = vmul.f32 %v4088_v22, %v2081_v45  ;;  %v2085_v33 = vmul.f32 %v2884_v36, %v2084_v57  ;;  %v2094_v22 = vor.u32 1.1754944e-38, %v2093_v51 }
 0x2b7   : > { %v2222_v53 = vsel %vm3100_vm3, %v2158_v42, %v5822_v46  ;;  %v2086_v63 = vadd.f32 %v2884_v36, %v2085_v33 }
 0x2b8   : > { %2286 = vst [vmem:[%s4189_s10 + $0x1f0] sm:$0xff] %v2222_v53 }
 0x2b9   : > { %v2090_v14 = vsel %vm2089_vm2, %v2884_v36, %v2086_v63 }
 0x2ba   : > { %v2095_v25 = vsel %vm2092_vm4, %v2094_v22, %v2090_v14 }
 0x2bb   : > { %v2159_v17 = vmul.f32 %v4133_v9, %v2095_v25 }
 0x2bd   : > { %v2223_v6 = vsel %vm3100_vm3, %v2159_v17, %v5823_v7 }
 0x2be   : > { %2287 = vst [vmem:[%s4189_s10 + $0x1f8] sm:$0xff] %v2223_v6 }
 0x2bf   : > { %2912 = shalt.err (!%p2909_p3)
}
 0x2c0   : > { %s2949_s6 = smov 128   ;;  %s2950_s7 = smov 8  }
 0x2c1   : > { %2587 = dma.vmem_to_hbm [thread:$0]  (%p3009_p5), %s2302_s20, 8192, %s2304_s24, %s2289_s25, %s2949_s6, %s2949_s6, %s2950_s7  }
 0x2c2 PF: > { %p2593_p4 = scmp.ge.s32.totalorder %s2947_s15, 2  ;;  %s2318_s8 = sand.u32 1, %s2935_s12  }
 0x2c3   : > { %s2319_s9 = scalar_lea.sflag [#allocation3], %s2318_s8 }
 0x2c4   : > { %p2590_p7 = pnand %p2593_p4, %p3013_p6 }
 0x2c6   : > { %p2591_p8 = pneg %p2590_p7 }
 0x2c8   : > { %2930 = dma.done.wait (%p2591_p8), %s2319_s9, 8192  }
 0x2c9   : > { %2932 = vsyncadd (%p2591_p8), %s2319_s9, 4294959104  ;;  %p13_p9 = scmp.ge.s32.totalorder %s2996_s18, 4   ;;  %s5824_s12 = smov %s2939_s13 }
 0x2ca   : > { %s5825_s13 = smov %s2943_s14  ;;  %s5826_s14 = smov %s3007_s21 }
 0x2cb   : > { %s5827_s15 = smov %s2996_s18  ;;  %15 = sbr.rel (!%p13_p9) target bundleno = 3 (0x3), region = 67 }
 0x2d0   :  { %2325 = vsyncpa [#allocation3], 1 }
 0x2d1   :  { %2327 = vsyncpa [#allocation3 + $0x1], 1 }

</bundles_post_ra>
